<compile_context>
chip_gen: v6e
topology: v6e:2x2x1
jax: 0.10.0
libtpu: 0.0.40
codegen_flags: <defaults>
</compile_context>

<pallas_src>
import functools
import math

import jax
import jax.numpy as jnp
from jax.experimental import pallas as pl
from jax.experimental.pallas import tpu as pltpu


_EPS = 1e-6
_VMEM_LIMIT = 64 * 1024 * 1024   # above v5e's 16 MiB scoped default, <= v7x physical


# ----------------------------------------------------------------------------
# Shared in-kernel math
# ----------------------------------------------------------------------------
def _layernorm_math(x, g, b):
    # Annotated-Transformer LayerNorm: g*(x-mean)/(std+eps)+b with torch's
    # default *unbiased* std (divide by D-1), eps=1e-6. (Do not "fix" this.)
    d = x.shape[-1]
    mean = jnp.mean(x, axis=-1, keepdims=True)
    var = jnp.sum((x - mean) ** 2, axis=-1, keepdims=True) / (d - 1)
    return g * (x - mean) / (jnp.sqrt(var) + _EPS) + b


# ----------------------------------------------------------------------------
# Dense (row-tiled) Pallas kernels — encoder / generator path
# ----------------------------------------------------------------------------
def _linear_kernel(x_ref, w_ref, b_ref, o_ref):
    # o = x @ w + b  (bf16 operands, f32 accumulate)
    o_ref[...] = (jnp.dot(x_ref[...].astype(jnp.bfloat16), w_ref[...],
                          preferred_element_type=jnp.float32)
                  + b_ref[...]).astype(o_ref.dtype)


def _residual_linear_kernel(x_ref, res_ref, w_ref, b_ref, o_ref):
    # o = res + x @ w + b   (residual add fused into the output projection)
    y = jnp.dot(x_ref[...].astype(jnp.bfloat16), w_ref[...],
                preferred_element_type=jnp.float32) + b_ref[...]
    o_ref[...] = (res_ref[...].astype(jnp.float32) + y).astype(o_ref.dtype)


def _ln_linear_kernel(x_ref, g_ref, be_ref, w_ref, b_ref, o_ref):
    # o = LN(x) @ w + b   (LayerNorm fused into the projection)
    xn = _layernorm_math(x_ref[...].astype(jnp.float32), g_ref[...], be_ref[...])
    o_ref[...] = (jnp.dot(xn.astype(jnp.bfloat16), w_ref[...],
                          preferred_element_type=jnp.float32)
                  + b_ref[...]).astype(o_ref.dtype)


def _ln_ffn_kernel(x_ref, g_ref, be_ref, w1_ref, b1_ref, w2_ref, b2_ref, o_ref):
    # o = x + relu(LN(x) @ w1 + b1) @ w2 + b2   (full FFN sublayer fused)
    x = x_ref[...].astype(jnp.float32)
    xn = _layernorm_math(x, g_ref[...], be_ref[...])
    h = jnp.dot(xn.astype(jnp.bfloat16), w1_ref[...],
                preferred_element_type=jnp.float32) + b1_ref[...]
    h = jnp.maximum(h, 0.0)
    y = jnp.dot(h.astype(jnp.bfloat16), w2_ref[...],
                preferred_element_type=jnp.float32) + b2_ref[...]
    o_ref[...] = (x + y).astype(o_ref.dtype)


def _layernorm_kernel(x_ref, g_ref, b_ref, o_ref):
    o_ref[...] = _layernorm_math(x_ref[...].astype(jnp.float32),
                                 g_ref[...], b_ref[...]).astype(o_ref.dtype)


def _ln_generator_kernel(x_ref, g_ref, be_ref, w_ref, b_ref, o_ref):
    # log_softmax(LN(x) @ w + b) — decoder final norm fused with the Generator.
    # TODO(synk): for large vocab, tile V with an online logsumexp accumulator
    #             so the (D, V) weight block fits v7x's 64 MiB VMEM.
    xn = _layernorm_math(x_ref[...].astype(jnp.float32), g_ref[...], be_ref[...])
    logits = jnp.dot(xn.astype(jnp.bfloat16), w_ref[...],
                     preferred_element_type=jnp.float32) + b_ref[...]
    m = jnp.max(logits, axis=-1, keepdims=True)
    s = logits - m
    lse = jnp.log(jnp.sum(jnp.exp(s), axis=-1, keepdims=True))
    o_ref[...] = (s - lse).astype(o_ref.dtype)


# ----------------------------------------------------------------------------
# Encoder multi-head attention kernel (fused QKV input, batched heads,
# bf16 matmuls with f32 accumulation, single lane-dense output store)
# ----------------------------------------------------------------------------
def _mha_qkv_kernel(qkv_ref, m_ref, o_ref, *, n_heads):
    D = o_ref.shape[-1]
    dk = D // n_heads
    scale = 1.0 / math.sqrt(dk)

    qkv = qkv_ref[...]                                  # (T, 3D) bf16
    q = jnp.stack([qkv[:, h * dk:(h + 1) * dk] for h in range(n_heads)], axis=0)
    k = jnp.stack([qkv[:, D + h * dk:D + (h + 1) * dk] for h in range(n_heads)],
                  axis=0)
    v = jnp.stack([qkv[:, 2 * D + h * dk:2 * D + (h + 1) * dk]
                   for h in range(n_heads)], axis=0)    # each (H, T, dk) bf16

    s = jnp.einsum('hqd,hkd->hqk', q, k,
                   preferred_element_type=jnp.float32) * scale   # (H, T, T) f32
    mask = m_ref[...]                                   # (1, T); 1 keep, 0 mask
    s = jnp.where(mask[None, :, :] > 0, s, jnp.float32(-1e9))
    s = s - jnp.max(s, axis=-1, keepdims=True)
    p = jnp.exp(s)
    p = p * pl.reciprocal(jnp.sum(p, axis=-1, keepdims=True), approx=True)

    o = jnp.einsum('hqk,hkd->hqd', p.astype(jnp.bfloat16), v,
                   preferred_element_type=jnp.float32)  # (H, T, dk) f32
    o = jnp.concatenate([o[h] for h in range(n_heads)], axis=-1)   # (T, D)
    o_ref[...] = o.astype(o_ref.dtype)                  # single lane-dense store
    # TODO(synk): for long sequences, tile over Tk with an online-softmax
    #             (flash-style) accumulator so K/V need not fit VMEM at once.


# ----------------------------------------------------------------------------
# Fused decode-layer kernels (whole batch per call, layer weights resident)
# ----------------------------------------------------------------------------
def _decode_self_attn_kernel(x_ref, kc_ref, vc_ref, m_ref,
                             lng_ref, lnb_ref, wqkv_ref, bqkv_ref,
                             wo_ref, bo_ref,
                             x_out_ref, k_new_ref, v_new_ref, *, n_heads):
    # LN + fused QKV proj + self-attention over the KV cache (plus the new
    # token's own K/V handled separately) + out-proj + residual, all in-VMEM.
    D = x_out_ref.shape[-1]
    dk = D // n_heads
    scale = 1.0 / math.sqrt(dk)

    x = x_ref[...].astype(jnp.float32)                  # (B, D)
    xn = _layernorm_math(x, lng_ref[...], lnb_ref[...])
    qkv = jnp.dot(xn.astype(jnp.bfloat16), wqkv_ref[...],
                  preferred_element_type=jnp.float32) + bqkv_ref[...]   # (B, 3D)
    q = qkv[:, :D]
    k_new = qkv[:, D:2 * D]
    v_new = qkv[:, 2 * D:]
    k_new_ref[...] = k_new.astype(k_new_ref.dtype)
    v_new_ref[...] = v_new.astype(v_new_ref.dtype)

    kc = kc_ref[...]                                    # (B, T, D) bf16
    vc = vc_ref[...]
    mask = m_ref[...]                                   # (1, T); 1 = cached pos

    outs = []
    for h in range(n_heads):
        lo = h * dk
        qh = q[:, None, lo:lo + dk]                     # (B, 1, dk) f32
        knh = k_new[:, None, lo:lo + dk]                # (B, 1, dk) f32
        vnh = v_new[:, None, lo:lo + dk]                # (B, 1, dk) f32
        kch = kc[:, :, lo:lo + dk]                      # (B, T, dk) bf16
        vch = vc[:, :, lo:lo + dk]

        s_c = jnp.einsum('bqd,bkd->bqk', qh.astype(jnp.bfloat16), kch,
                         preferred_element_type=jnp.float32) * scale   # (B,1,T)
        s_c = jnp.where(mask[None, :, :] > 0, s_c, jnp.float32(-1e9))
        s_s = jnp.sum(qh * knh, axis=-1, keepdims=True) * scale        # (B,1,1)

        m = jnp.maximum(jnp.max(s_c, axis=-1, keepdims=True), s_s)
        p_c = jnp.exp(s_c - m)
        p_s = jnp.exp(s_s - m)
        inv = pl.reciprocal(jnp.sum(p_c, axis=-1, keepdims=True) + p_s,
                            approx=True)
        o_c = jnp.einsum('bqk,bkd->bqd', p_c.astype(jnp.bfloat16), vch,
                         preferred_element_type=jnp.float32)           # (B,1,dk)
        outs.append(((o_c + p_s * vnh) * inv)[:, 0, :])                # (B, dk)

    attn = jnp.concatenate(outs, axis=-1)               # (B, D) f32, one store
    y = jnp.dot(attn.astype(jnp.bfloat16), wo_ref[...],
                preferred_element_type=jnp.float32) + bo_ref[...]
    x_out_ref[...] = (x + y).astype(x_out_ref.dtype)


def _decode_cross_ffn_kernel(x_ref, mkv_ref, m_ref,
                             ln2g_ref, ln2b_ref, wq_ref, bq_ref,
                             wo_ref, bo_ref,
                             ln3g_ref, ln3b_ref, w1_ref, b1_ref,
                             w2_ref, b2_ref, o_ref, *, n_heads):
    # LN + cross-attn Q proj + cross-attention over precomputed memory K/V
    # + out-proj + residual + LN + FFN + residual, all in-VMEM.
    D = o_ref.shape[-1]
    dk = D // n_heads
    scale = 1.0 / math.sqrt(dk)

    x = x_ref[...].astype(jnp.float32)                  # (B, D)
    xn = _layernorm_math(x, ln2g_ref[...], ln2b_ref[...])
    q = jnp.dot(xn.astype(jnp.bfloat16), wq_ref[...],
                preferred_element_type=jnp.float32) + bq_ref[...]       # (B, D)

    mem_kv = mkv_ref[...]                               # (B, S, 2D) bf16
    mask = m_ref[...]                                   # (B, 1, S)

    outs = []
    for h in range(n_heads):
        lo = h * dk
        qh = q[:, None, lo:lo + dk].astype(jnp.bfloat16)     # (B, 1, dk)
        kh = mem_kv[:, :, lo:lo + dk]                        # (B, S, dk)
        vh = mem_kv[:, :, D + lo:D + lo + dk]                # (B, S, dk)

        s = jnp.einsum('bqd,bkd->bqk', qh, kh,
                       preferred_element_type=jnp.float32) * scale      # (B,1,S)
        s = jnp.where(mask > 0, s, jnp.float32(-1e9))
        s = s - jnp.max(s, axis=-1, keepdims=True)
        p = jnp.exp(s)
        p = p * pl.reciprocal(jnp.sum(p, axis=-1, keepdims=True), approx=True)
        oh = jnp.einsum('bqk,bkd->bqd', p.astype(jnp.bfloat16), vh,
                        preferred_element_type=jnp.float32)             # (B,1,dk)
        outs.append(oh[:, 0, :])

    attn = jnp.concatenate(outs, axis=-1)               # (B, D)
    x = x + jnp.dot(attn.astype(jnp.bfloat16), wo_ref[...],
                    preferred_element_type=jnp.float32) + bo_ref[...]

    xn = _layernorm_math(x, ln3g_ref[...], ln3b_ref[...])
    hdn = jnp.dot(xn.astype(jnp.bfloat16), w1_ref[...],
                  preferred_element_type=jnp.float32) + b1_ref[...]
    hdn = jnp.maximum(hdn, 0.0)
    y = jnp.dot(hdn.astype(jnp.bfloat16), w2_ref[...],
                preferred_element_type=jnp.float32) + b2_ref[...]
    o_ref[...] = (x + y).astype(o_ref.dtype)
    # TODO(synk): on v7x, add a column grid split so both TensorCores are busy
    #             during decode (row grid collapses to 1 when M=B).


# ----------------------------------------------------------------------------
# Pallas wrappers
# ----------------------------------------------------------------------------
def _row_block(m, target=512):
    if m <= target:
        return m
    for cand in (target, 256, 128, 64, 32, 16, 8):
        if m % cand == 0:
            return cand
    return m


def _dense_call(kernel, row_inputs, const_inputs, out_cols,
                out_dtype=jnp.bfloat16):
    """row_inputs: (M, *) arrays tiled along rows; const_inputs: loaded whole
    and kept resident across row tiles (constant block index)."""
    # TODO(synk): single-buffer the constant weight blocks (pipeline_mode) to
    #             cut their VMEM footprint in half on v5e/v7x.
    M = row_inputs[0].shape[0]
    bm = _row_block(M)
    in_specs = [pl.BlockSpec((bm, a.shape[1]), lambda i: (i, 0))
                for a in row_inputs]
    in_specs += [pl.BlockSpec(a.shape, lambda i: (0, 0)) for a in const_inputs]
    return pl.pallas_call(
        kernel,
        grid=(M // bm,),
        in_specs=in_specs,
        out_specs=pl.BlockSpec((bm, out_cols), lambda i: (i, 0)),
        out_shape=jax.ShapeDtypeStruct((M, out_cols), out_dtype),
        compiler_params=pltpu.CompilerParams(
            dimension_semantics=("parallel",),
            vmem_limit_bytes=_VMEM_LIMIT),
    )(*row_inputs, *const_inputs)


def linear(x, w, b):
    return _dense_call(_linear_kernel, [x], [w, b], w.shape[1])


def residual_linear(x, res, w, b):
    return _dense_call(_residual_linear_kernel, [x, res], [w, b], w.shape[1])


def ln_linear(x, g, be, w, b):
    return _dense_call(_ln_linear_kernel, [x], [g, be, w, b], w.shape[1])


def ln_ffn(x, g, be, ff):
    return _dense_call(_ln_ffn_kernel, [x],
                       [g, be, ff['w1'], ff['b1'], ff['w2'], ff['b2']],
                       x.shape[1])


def layer_norm(x, g, b):
    return _dense_call(_layernorm_kernel, [x], [g, b], x.shape[1])


def ln_generator(x, g, be, w, b):
    return _dense_call(_ln_generator_kernel, [x], [g, be, w, b], w.shape[1],
                       out_dtype=jnp.float32)


def multi_head_attention_core(qkv, mask, n_heads):
    # qkv: (B, T, 3D) fused Q|K|V (sliced inside the kernel);
    # mask: (B, 1, T)  {1 keep, 0 mask}
    B, T, D3 = qkv.shape
    D = D3 // 3
    Tk = mask.shape[-1]
    kernel = functools.partial(_mha_qkv_kernel, n_heads=n_heads)
    return pl.pallas_call(
        kernel,
        grid=(B,),
        in_specs=[
            pl.BlockSpec((None, T, D3), lambda b: (b, 0, 0)),
            pl.BlockSpec((None, 1, Tk), lambda b: (b, 0, 0)),
        ],
        out_specs=pl.BlockSpec((None, T, D), lambda b: (b, 0, 0)),
        out_shape=jax.ShapeDtypeStruct((B, T, D), jnp.bfloat16),
        compiler_params=pltpu.CompilerParams(
            dimension_semantics=("parallel",),
            vmem_limit_bytes=_VMEM_LIMIT),
    )(qkv, mask.astype(jnp.float32))


def decode_self_attn(x, kc, vc, cache_mask, lng, lnb, w_qkv, b_qkv, wo, bo, *,
                     n_heads):
    B, D = x.shape
    kernel = functools.partial(_decode_self_attn_kernel, n_heads=n_heads)
    return pl.pallas_call(
        kernel,
        out_shape=(jax.ShapeDtypeStruct((B, D), jnp.bfloat16),   # new x
                   jax.ShapeDtypeStruct((B, D), jnp.bfloat16),   # k_new
                   jax.ShapeDtypeStruct((B, D), jnp.bfloat16)),  # v_new
        compiler_params=pltpu.CompilerParams(vmem_limit_bytes=_VMEM_LIMIT),
    )(x, kc, vc, cache_mask, lng, lnb, w_qkv, b_qkv, wo, bo)


def decode_cross_ffn(x, mem_kv, src_mask, ln2g, ln2b, wq, bq, wo, bo,
                     ln3g, ln3b, ff, *, n_heads):
    B, D = x.shape
    kernel = functools.partial(_decode_cross_ffn_kernel, n_heads=n_heads)
    return pl.pallas_call(
        kernel,
        out_shape=jax.ShapeDtypeStruct((B, D), jnp.bfloat16),
        compiler_params=pltpu.CompilerParams(vmem_limit_bytes=_VMEM_LIMIT),
    )(x, mem_kv, src_mask, ln2g, ln2b, wq, bq, wo, bo,
      ln3g, ln3b, ff['w1'], ff['b1'], ff['w2'], ff['b2'])


# ----------------------------------------------------------------------------
# Model glue (plain JAX)
# ----------------------------------------------------------------------------
def embed(emb_table, pe, tokens, d_model):
    # TODO(synk): embedding-table gather stays in plain JAX (glue, not hot path)
    x = jnp.take(emb_table, tokens, axis=0) * math.sqrt(d_model)
    return (x + pe[None, : tokens.shape[1], :]).astype(jnp.bfloat16)


def encoder_layer(p, x, src_mask, n_heads):
    B, T, D = x.shape
    x2 = x.reshape(B * T, D)
    sa = p['self_attn']
    qkv = ln_linear(x2, p['ln1_g'], p['ln1_b'], sa['w_qkv'], sa['b_qkv'])
    attn = multi_head_attention_core(qkv.reshape(B, T, 3 * D), src_mask,
                                     n_heads)                      # (B,T,D)
    x2 = residual_linear(attn.reshape(B * T, D), x2, sa['wo'], sa['bo'])
    x2 = ln_ffn(x2, p['ln2_g'], p['ln2_b'], p['ff'])
    return x2.reshape(B, T, D)


def encode(params, src, src_mask, n_heads):
    d_model = params['src_emb'].shape[1]
    x = embed(params['src_emb'], params['pe'], src, d_model)
    for lp in params['enc_layers']:
        x = encoder_layer(lp, x, src_mask, n_heads)
    B, S, D = x.shape
    x = layer_norm(x.reshape(B * S, D),
                   params['enc_norm_g'], params['enc_norm_b'])
    return x.reshape(B, S, D)


@functools.partial(jax.jit, static_argnames=("max_len", "start_symbol", "n_heads"))
def translator_forward(params, src, src_mask, rng, *,
                       max_len, start_symbol, n_heads):
    """Mirrors Translator.forward: encode once, then sample-decode max_len steps
    with fixed shapes, per-layer bf16 KV caches and two fused Pallas kernels
    per decoder layer per step (compiled once)."""
    B = src.shape[0]
    d_model = params['src_emb'].shape[1]
    vocab = params['gen']['w'].shape[1]
    n_layers = len(params['dec_layers'])

    memory = encode(params, src, src_mask, n_heads)                  # (B, S, D)
    S = memory.shape[1]
    m2 = memory.reshape(B * S, d_model)

    # Cross-attention K/V of the encoder memory, projected once per layer and
    # kept fused as (B, S, 2D) bf16 (sliced inside the cross-attn kernel).
    mem_kv = []
    for lp in params['dec_layers']:
        ca = lp['src_attn']
        mem_kv.append(linear(m2, ca['w_kv'], ca['b_kv'])
                      .reshape(B, S, 2 * d_model))

    pe = params['pe']
    pos = jnp.arange(max_len)
    src_mask_f = src_mask.astype(jnp.float32)

    def step(i, carry):
        ys, logits_buf, k_caches, v_caches, key = carry
        tok = jax.lax.dynamic_slice(ys, (0, i), (B, 1))[:, 0]        # (B,)
        x = jnp.take(params['tgt_emb'], tok, axis=0) * math.sqrt(d_model)
        x = (x + jax.lax.dynamic_slice(pe, (i, 0), (1, d_model))
             ).astype(jnp.bfloat16)                                  # (B, D)

        # valid cached key positions for the single new query: pos < i
        # (the new token's own K/V is handled separately inside the kernel)
        cache_mask = (pos < i).astype(jnp.float32)[None, :]          # (1, T)

        new_k, new_v = [], []
        for l, lp in enumerate(params['dec_layers']):
            sa = lp['self_attn']
            x, k_new, v_new = decode_self_attn(
                x, k_caches[l], v_caches[l], cache_mask,
                lp['ln1_g'], lp['ln1_b'], sa['w_qkv'], sa['b_qkv'],
                sa['wo'], sa['bo'], n_heads=n_heads)
            # TODO(synk): KV-cache writeback stays as plain-JAX dynamic_update_slice.
            new_k.append(jax.lax.dynamic_update_slice(
                k_caches[l], k_new[:, None, :], (0, i, 0)))
            new_v.append(jax.lax.dynamic_update_slice(
                v_caches[l], v_new[:, None, :], (0, i, 0)))

            ca = lp['src_attn']
            x = decode_cross_ffn(
                x, mem_kv[l], src_mask_f,
                lp['ln2_g'], lp['ln2_b'], ca['wq'], ca['bq'],
                ca['wo'], ca['bo'],
                lp['ln3_g'], lp['ln3_b'], lp['ff'], n_heads=n_heads)

        log_probs = ln_generator(x, params['dec_norm_g'], params['dec_norm_b'],
                                 params['gen']['w'], params['gen']['b'])  # (B,V)
        key, sub = jax.random.split(key)
        # TODO(synk): categorical sampling stays in plain JAX (glue).
        nxt = jax.random.categorical(sub, log_probs).astype(ys.dtype)     # (B,)
        ys = jax.lax.dynamic_update_slice(ys, nxt[:, None], (0, i + 1))
        logits_buf = jax.lax.dynamic_update_slice(
            logits_buf, log_probs[:, None, :], (0, i, 0))
        return ys, logits_buf, tuple(new_k), tuple(new_v), key

    ys0 = jnp.full((B, max_len + 1), start_symbol, dtype=src.dtype)
    logits0 = jnp.zeros((B, max_len, vocab), jnp.float32)
    kc0 = tuple(jnp.zeros((B, max_len, d_model), jnp.bfloat16)
                for _ in range(n_layers))
    vc0 = tuple(jnp.zeros((B, max_len, d_model), jnp.bfloat16)
                for _ in range(n_layers))

    ys, logits, _, _, _ = jax.lax.fori_loop(
        0, max_len, step, (ys0, logits0, kc0, vc0, rng))
    return ys[:, 1:], logits


# ----------------------------------------------------------------------------
# Deterministic parameter init (weights stored bf16, biases/LN/embeddings f32)
# ----------------------------------------------------------------------------
def init_params(key, vocab, d_model, n_heads, d_ff, n_layers, max_seq):
    keys = iter(jax.random.split(key, 256))

    def dense(d_in, d_out):
        w = (jax.random.normal(next(keys), (d_in, d_out), jnp.float32)
             / math.sqrt(d_in)).astype(jnp.bfloat16)
        b = jnp.zeros((1, d_out), jnp.float32)
        return w, b

    def self_attn_params():
        w_qkv, b_qkv = dense(d_model, 3 * d_model)       # fused Q|K|V
        wo, bo = dense(d_model, d_model)
        return {'w_qkv': w_qkv, 'b_qkv': b_qkv, 'wo': wo, 'bo': bo}

    def src_attn_params():
        wq, bq = dense(d_model, d_model)
        w_kv, b_kv = dense(d_model, 2 * d_model)         # fused K|V (precomputed)
        wo, bo = dense(d_model, d_model)
        return {'wq': wq, 'bq': bq, 'w_kv': w_kv, 'b_kv': b_kv,
                'wo': wo, 'bo': bo}

    def ln_params():
        return (jnp.ones((1, d_model), jnp.float32),
                jnp.zeros((1, d_model), jnp.float32))

    def ff_params():
        w1, b1 = dense(d_model, d_ff)
        w2, b2 = dense(d_ff, d_model)
        return {'w1': w1, 'b1': b1, 'w2': w2, 'b2': b2}

    def enc_layer():
        g1, b1 = ln_params()
        g2, b2 = ln_params()
        return {'self_attn': self_attn_params(), 'ff': ff_params(),
                'ln1_g': g1, 'ln1_b': b1, 'ln2_g': g2, 'ln2_b': b2}

    def dec_layer():
        g1, b1 = ln_params()
        g2, b2 = ln_params()
        g3, b3 = ln_params()
        return {'self_attn': self_attn_params(), 'src_attn': src_attn_params(),
                'ff': ff_params(),
                'ln1_g': g1, 'ln1_b': b1, 'ln2_g': g2, 'ln2_b': b2,
                'ln3_g': g3, 'ln3_b': b3}

    # sinusoidal positional encoding
    pos = jnp.arange(max_seq, dtype=jnp.float32)[:, None]
    div = jnp.exp(jnp.arange(0, d_model, 2, dtype=jnp.float32)
                  * (-math.log(10000.0) / d_model))
    pe = jnp.zeros((max_seq, d_model), jnp.float32)
    pe = pe.at[:, 0::2].set(jnp.sin(pos * div))
    pe = pe.at[:, 1::2].set(jnp.cos(pos * div))

    enc_g, enc_b = ln_params()
    dec_g, dec_b = ln_params()
    gw, gb = dense(d_model, vocab)

    return {
        'src_emb': jax.random.normal(next(keys), (vocab, d_model), jnp.float32),
        'tgt_emb': jax.random.normal(next(keys), (vocab, d_model), jnp.float32),
        'pe': pe,
        'enc_layers': [enc_layer() for _ in range(n_layers)],
        'dec_layers': [dec_layer() for _ in range(n_layers)],
        'enc_norm_g': enc_g, 'enc_norm_b': enc_b,
        'dec_norm_g': dec_g, 'dec_norm_b': dec_b,
        'gen': {'w': gw, 'b': gb},
    }


# ----------------------------------------------------------------------------
if __name__ == "__main__":
    B, S = 2, 8              # batch, source seq length
    VOCAB, D_MODEL = 16, 32
    N_HEADS, D_FF, N_LAYERS = 4, 64, 2
    MAX_LEN, START_SYMBOL = 6, 1

    root = jax.random.PRNGKey(0)
    k_params, k_src, k_sample = jax.random.split(root, 3)

    params = init_params(k_params, VOCAB, D_MODEL, N_HEADS, D_FF, N_LAYERS,
                         max_seq=32)
    src = jax.random.randint(k_src, (B, S), 2, VOCAB).astype(jnp.int32)
    src_mask = jnp.ones((B, 1, S), jnp.float32)   # no padding

    ys, logits = translator_forward(params, src, src_mask, k_sample,
                                    max_len=MAX_LEN,
                                    start_symbol=START_SYMBOL,
                                    n_heads=N_HEADS)
    jax.block_until_ready((ys, logits))

    assert ys.shape == (B, MAX_LEN)
    assert logits.shape == (B, MAX_LEN, VOCAB)
    assert bool(jnp.all(jnp.isfinite(logits)))
    print("KERNEL_OK")
</pallas_src>

<mosaic_0001>
module attributes {stable_mosaic.version = 11 : i64} {
  func.func @_mha_qkv_kernel(%arg0: i32, %arg1: memref<1x8x96xbf16, #tpu.memory_space<vmem>>, %arg2: memref<1x1x8xf32, #tpu.memory_space<vmem>>, %arg3: memref<1x8x32xbf16, #tpu.memory_space<vmem>>) attributes {dimension_semantics = [#tpu.dimension_semantics<parallel>], iteration_bounds = array<i64: 2>, scalar_prefetch = 0 : i64, scratch_operands = 0 : i64, tpu.core_type = #tpu.core_type<tc>, window_params = [{transform_indices = @transform_0, window_bounds = array<i64: 1, 8, 96>}, {transform_indices = @transform_1, window_bounds = array<i64: 1, 1, 8>}, {transform_indices = @transform_2, window_bounds = array<i64: 1, 8, 32>}]} {
    %c0 = arith.constant 0 : index
    %c0_0 = arith.constant 0 : index
    %c0_1 = arith.constant 0 : index
    %0 = vector.load %arg1[%c0, %c0_0, %c0_1] : memref<1x8x96xbf16, #tpu.memory_space<vmem>>, vector<1x8x96xbf16>
    %1 = vector.shape_cast %0 : vector<1x8x96xbf16> to vector<8x96xbf16>
    %2 = vector.extract_strided_slice %1 {offsets = [0, 0], sizes = [8, 8], strides = [1, 1]} : vector<8x96xbf16> to vector<8x8xbf16>
    %3 = vector.extract_strided_slice %1 {offsets = [0, 8], sizes = [8, 8], strides = [1, 1]} : vector<8x96xbf16> to vector<8x8xbf16>
    %4 = vector.extract_strided_slice %1 {offsets = [0, 16], sizes = [8, 8], strides = [1, 1]} : vector<8x96xbf16> to vector<8x8xbf16>
    %5 = vector.extract_strided_slice %1 {offsets = [0, 24], sizes = [8, 8], strides = [1, 1]} : vector<8x96xbf16> to vector<8x8xbf16>
    %6 = vector.shape_cast %2 : vector<8x8xbf16> to vector<1x8x8xbf16>
    %7 = vector.shape_cast %3 : vector<8x8xbf16> to vector<1x8x8xbf16>
    %8 = vector.shape_cast %4 : vector<8x8xbf16> to vector<1x8x8xbf16>
    %9 = vector.shape_cast %5 : vector<8x8xbf16> to vector<1x8x8xbf16>
    %10 = tpu.concatenate %6, %7, %8, %9 in 0 : vector<1x8x8xbf16>, vector<1x8x8xbf16>, vector<1x8x8xbf16>, vector<1x8x8xbf16> -> vector<4x8x8xbf16>
    %11 = vector.extract_strided_slice %1 {offsets = [0, 32], sizes = [8, 8], strides = [1, 1]} : vector<8x96xbf16> to vector<8x8xbf16>
    %12 = vector.extract_strided_slice %1 {offsets = [0, 40], sizes = [8, 8], strides = [1, 1]} : vector<8x96xbf16> to vector<8x8xbf16>
    %13 = vector.extract_strided_slice %1 {offsets = [0, 48], sizes = [8, 8], strides = [1, 1]} : vector<8x96xbf16> to vector<8x8xbf16>
    %14 = vector.extract_strided_slice %1 {offsets = [0, 56], sizes = [8, 8], strides = [1, 1]} : vector<8x96xbf16> to vector<8x8xbf16>
    %15 = vector.shape_cast %11 : vector<8x8xbf16> to vector<1x8x8xbf16>
    %16 = vector.shape_cast %12 : vector<8x8xbf16> to vector<1x8x8xbf16>
    %17 = vector.shape_cast %13 : vector<8x8xbf16> to vector<1x8x8xbf16>
    %18 = vector.shape_cast %14 : vector<8x8xbf16> to vector<1x8x8xbf16>
    %19 = tpu.concatenate %15, %16, %17, %18 in 0 : vector<1x8x8xbf16>, vector<1x8x8xbf16>, vector<1x8x8xbf16>, vector<1x8x8xbf16> -> vector<4x8x8xbf16>
    %20 = vector.extract_strided_slice %1 {offsets = [0, 64], sizes = [8, 8], strides = [1, 1]} : vector<8x96xbf16> to vector<8x8xbf16>
    %21 = vector.extract_strided_slice %1 {offsets = [0, 72], sizes = [8, 8], strides = [1, 1]} : vector<8x96xbf16> to vector<8x8xbf16>
    %22 = vector.extract_strided_slice %1 {offsets = [0, 80], sizes = [8, 8], strides = [1, 1]} : vector<8x96xbf16> to vector<8x8xbf16>
    %23 = vector.extract_strided_slice %1 {offsets = [0, 88], sizes = [8, 8], strides = [1, 1]} : vector<8x96xbf16> to vector<8x8xbf16>
    %24 = vector.shape_cast %20 : vector<8x8xbf16> to vector<1x8x8xbf16>
    %25 = vector.shape_cast %21 : vector<8x8xbf16> to vector<1x8x8xbf16>
    %26 = vector.shape_cast %22 : vector<8x8xbf16> to vector<1x8x8xbf16>
    %27 = vector.shape_cast %23 : vector<8x8xbf16> to vector<1x8x8xbf16>
    %28 = tpu.concatenate %24, %25, %26, %27 in 0 : vector<1x8x8xbf16>, vector<1x8x8xbf16>, vector<1x8x8xbf16>, vector<1x8x8xbf16> -> vector<4x8x8xbf16>
    "tpu.trace_start"() <{level = 10 : i32, message = "hqd,hkd->hqk"}> : () -> ()
    %cst = arith.constant dense<0.000000e+00> : vector<4x8x8xf32>
    %29 = tpu.matmul %10, %19, %cst {dimension_numbers = #tpu.dot_dimension_numbers<[2], [2], [1], [1], [0, 0, 0, 1, 1, 1], [0], [0]>} : vector<4x8x8xbf16>, vector<4x8x8xbf16>, vector<4x8x8xf32> -> vector<4x8x8xf32>
    "tpu.trace_stop"() : () -> ()
    %cst_2 = arith.constant 0.353553385 : f32
    %30 = vector.broadcast %cst_2 : f32 to vector<4x8x8xf32>
    %31 = arith.mulf %29, %30 : vector<4x8x8xf32>
    %c0_3 = arith.constant 0 : index
    %c0_4 = arith.constant 0 : index
    %c0_5 = arith.constant 0 : index
    %32 = vector.load %arg2[%c0_3, %c0_4, %c0_5] : memref<1x1x8xf32, #tpu.memory_space<vmem>>, vector<1x1x8xf32>
    %33 = vector.shape_cast %32 : vector<1x1x8xf32> to vector<1x8xf32>
    %34 = vector.shape_cast %33 : vector<1x8xf32> to vector<1x1x8xf32>
    %cst_6 = arith.constant 0.000000e+00 : f32
    %35 = vector.broadcast %cst_6 : f32 to vector<1x1x8xf32>
    %36 = arith.cmpf ogt, %34, %35 : vector<1x1x8xf32>
    %cst_7 = arith.constant -1.000000e+09 : f32
    %37 = vector.shape_cast %36 : vector<1x1x8xi1> to vector<1x1x8xi1>
    %38 = vector.broadcast %37 : vector<1x1x8xi1> to vector<4x8x8xi1>
    %39 = vector.broadcast %cst_7 : f32 to vector<4x8x8xf32>
    %40 = arith.select %38, %31, %39 : vector<4x8x8xi1>, vector<4x8x8xf32>
    %cst_8 = arith.constant dense<0xFF800000> : vector<4x8xf32>
    %41 = vector.multi_reduction <maximumf>, %40, %cst_8 [2] : vector<4x8x8xf32> to vector<4x8xf32>
    %42 = vector.shape_cast %41 : vector<4x8xf32> to vector<4x8x1xf32>
    %43 = vector.broadcast %42 : vector<4x8x1xf32> to vector<4x8x8xf32>
    %44 = arith.subf %40, %43 : vector<4x8x8xf32>
    %45 = math.exp %44 : vector<4x8x8xf32>
    %cst_9 = arith.constant dense<0.000000e+00> : vector<4x8xf32>
    %46 = vector.multi_reduction <add>, %45, %cst_9 [2] : vector<4x8x8xf32> to vector<4x8xf32>
    %47 = vector.shape_cast %46 : vector<4x8xf32> to vector<4x8x1xf32>
    %48 = tpu.reciprocal %47 {approx = true} : vector<4x8x1xf32> -> vector<4x8x1xf32>
    %49 = vector.broadcast %48 : vector<4x8x1xf32> to vector<4x8x8xf32>
    %50 = arith.mulf %45, %49 : vector<4x8x8xf32>
    %51 = arith.truncf %50 : vector<4x8x8xf32> to vector<4x8x8xbf16>
    "tpu.trace_start"() <{level = 10 : i32, message = "hqk,hkd->hqd"}> : () -> ()
    %cst_10 = arith.constant dense<0.000000e+00> : vector<4x8x8xf32>
    %52 = tpu.matmul %51, %28, %cst_10 {dimension_numbers = #tpu.dot_dimension_numbers<[2], [1], [1], [2], [0, 0, 0, 1, 1, 2], [0], [0]>} : vector<4x8x8xbf16>, vector<4x8x8xbf16>, vector<4x8x8xf32> -> vector<4x8x8xf32>
    "tpu.trace_stop"() : () -> ()
    %53 = vector.extract_strided_slice %52 {offsets = [0, 0, 0], sizes = [1, 8, 8], strides = [1, 1, 1]} : vector<4x8x8xf32> to vector<1x8x8xf32>
    %54 = vector.shape_cast %53 : vector<1x8x8xf32> to vector<8x8xf32>
    %55 = vector.extract_strided_slice %52 {offsets = [1, 0, 0], sizes = [1, 8, 8], strides = [1, 1, 1]} : vector<4x8x8xf32> to vector<1x8x8xf32>
    %56 = vector.shape_cast %55 : vector<1x8x8xf32> to vector<8x8xf32>
    %57 = vector.extract_strided_slice %52 {offsets = [2, 0, 0], sizes = [1, 8, 8], strides = [1, 1, 1]} : vector<4x8x8xf32> to vector<1x8x8xf32>
    %58 = vector.shape_cast %57 : vector<1x8x8xf32> to vector<8x8xf32>
    %59 = vector.extract_strided_slice %52 {offsets = [3, 0, 0], sizes = [1, 8, 8], strides = [1, 1, 1]} : vector<4x8x8xf32> to vector<1x8x8xf32>
    %60 = vector.shape_cast %59 : vector<1x8x8xf32> to vector<8x8xf32>
    %61 = tpu.concatenate %54, %56, %58, %60 in 1 : vector<8x8xf32>, vector<8x8xf32>, vector<8x8xf32>, vector<8x8xf32> -> vector<8x32xf32>
    %62 = arith.truncf %61 : vector<8x32xf32> to vector<8x32xbf16>
    %c0_11 = arith.constant 0 : index
    %c0_12 = arith.constant 0 : index
    %c0_13 = arith.constant 0 : index
    %63 = vector.load %arg3[%c0_11, %c0_12, %c0_13] : memref<1x8x32xbf16, #tpu.memory_space<vmem>>, vector<1x8x32xbf16>
    %64 = vector.shape_cast %63 : vector<1x8x32xbf16> to vector<8x32xbf16>
    %65 = vector.shape_cast %62 : vector<8x32xbf16> to vector<1x8x32xbf16>
    tpu.vector_store %arg3[%c0_11, %c0_12, %c0_13], %65 {strides = array<i32>} : memref<1x8x32xbf16, #tpu.memory_space<vmem>>, vector<1x8x32xbf16>,
    return
  }
  func.func @transform_0(%arg0: i32) -> (i32, i32, i32) {
    %c0_i32 = arith.constant 0 : i32
    %c0_i32_0 = arith.constant 0 : i32
    %c0_i32_1 = arith.constant 0 : i32
    return %arg0, %c0_i32, %c0_i32_0 : i32, i32, i32
  }
  func.func @transform_1(%arg0: i32) -> (i32, i32, i32) {
    %c0_i32 = arith.constant 0 : i32
    %c0_i32_0 = arith.constant 0 : i32
    %c0_i32_1 = arith.constant 0 : i32
    return %arg0, %c0_i32, %c0_i32_0 : i32, i32, i32
  }
  func.func @transform_2(%arg0: i32) -> (i32, i32, i32) {
    %c0_i32 = arith.constant 0 : i32
    %c0_i32_0 = arith.constant 0 : i32
    %c0_i32_1 = arith.constant 0 : i32
    return %arg0, %c0_i32, %c0_i32_0 : i32, i32, i32
  }
}

module attributes {stable_mosaic.version = 11 : i64} {
  func.func @_residual_linear_kernel(%arg0: i32, %arg1: memref<16x32xbf16, #tpu.memory_space<vmem>>, %arg2: memref<16x32xbf16, #tpu.memory_space<vmem>>, %arg3: memref<32x32xbf16, #tpu.memory_space<vmem>>, %arg4: memref<1x32xf32, #tpu.memory_space<vmem>>, %arg5: memref<16x32xbf16, #tpu.memory_space<vmem>>) attributes {dimension_semantics = [#tpu.dimension_semantics<parallel>], iteration_bounds = array<i64: 1>, scalar_prefetch = 0 : i64, scratch_operands = 0 : i64, tpu.core_type = #tpu.core_type<tc>, window_params = [{transform_indices = @transform_0, window_bounds = array<i64: 16, 32>}, {transform_indices = @transform_1, window_bounds = array<i64: 16, 32>}, {pipeline_mode = #tpu.pipeline_mode<synchronous>, transform_indices = @transform_2, window_bounds = array<i64: 32, 32>}, {pipeline_mode = #tpu.pipeline_mode<synchronous>, transform_indices = @transform_3, window_bounds = array<i64: 1, 32>}, {transform_indices = @transform_4, window_bounds = array<i64: 16, 32>}]} {
    %c0 = arith.constant 0 : index
    %c0_0 = arith.constant 0 : index
    %0 = vector.load %arg1[%c0, %c0_0] : memref<16x32xbf16, #tpu.memory_space<vmem>>, vector<16x32xbf16>
    %c0_1 = arith.constant 0 : index
    %c0_2 = arith.constant 0 : index
    %1 = vector.load %arg3[%c0_1, %c0_2] : memref<32x32xbf16, #tpu.memory_space<vmem>>, vector<32x32xbf16>
    %cst = arith.constant dense<0.000000e+00> : vector<16x32xf32>
    %2 = tpu.matmul %0, %1, %cst {dimension_numbers = #tpu.dot_dimension_numbers<[1], [0], [0], [1], [0, 0, 1, 1], [], []>} : vector<16x32xbf16>, vector<32x32xbf16>, vector<16x32xf32> -> vector<16x32xf32>
    %c0_3 = arith.constant 0 : index
    %c0_4 = arith.constant 0 : index
    %3 = vector.load %arg4[%c0_3, %c0_4] : memref<1x32xf32, #tpu.memory_space<vmem>>, vector<1x32xf32>
    %4 = vector.broadcast %3 : vector<1x32xf32> to vector<16x32xf32>
    %5 = arith.addf %2, %4 : vector<16x32xf32>
    %c0_5 = arith.constant 0 : index
    %c0_6 = arith.constant 0 : index
    %6 = vector.load %arg2[%c0_5, %c0_6] : memref<16x32xbf16, #tpu.memory_space<vmem>>, vector<16x32xbf16>
    %7 = arith.extf %6 : vector<16x32xbf16> to vector<16x32xf32>
    %8 = arith.addf %7, %5 : vector<16x32xf32>
    %9 = arith.truncf %8 : vector<16x32xf32> to vector<16x32xbf16>
    %c0_7 = arith.constant 0 : index
    %c0_8 = arith.constant 0 : index
    %10 = vector.load %arg5[%c0_7, %c0_8] : memref<16x32xbf16, #tpu.memory_space<vmem>>, vector<16x32xbf16>
    tpu.vector_store %arg5[%c0_7, %c0_8], %9 {strides = array<i32>} : memref<16x32xbf16, #tpu.memory_space<vmem>>, vector<16x32xbf16>,
    return
  }
  func.func @transform_0(%arg0: i32) -> (i32, i32) {
    %c0_i32 = arith.constant 0 : i32
    %c0_i32_0 = arith.constant 0 : i32
    return %arg0, %c0_i32 : i32, i32
  }
  func.func @transform_1(%arg0: i32) -> (i32, i32) {
    %c0_i32 = arith.constant 0 : i32
    %c0_i32_0 = arith.constant 0 : i32
    return %arg0, %c0_i32 : i32, i32
  }
  func.func @transform_2(%arg0: i32) -> (i32, i32) {
    %c0_i32 = arith.constant 0 : i32
    %c0_i32_0 = arith.constant 0 : i32
    %c0_i32_1 = arith.constant 0 : i32
    return %c0_i32, %c0_i32_0 : i32, i32
  }
  func.func @transform_3(%arg0: i32) -> (i32, i32) {
    %c0_i32 = arith.constant 0 : i32
    %c0_i32_0 = arith.constant 0 : i32
    %c0_i32_1 = arith.constant 0 : i32
    return %c0_i32, %c0_i32_0 : i32, i32
  }
  func.func @transform_4(%arg0: i32) -> (i32, i32) {
    %c0_i32 = arith.constant 0 : i32
    %c0_i32_0 = arith.constant 0 : i32
    return %arg0, %c0_i32 : i32, i32
  }
}

module attributes {stable_mosaic.version = 11 : i64} {
  func.func @_ln_linear_kernel(%arg0: i32, %arg1: memref<16x32xbf16, #tpu.memory_space<vmem>>, %arg2: memref<1x32xf32, #tpu.memory_space<vmem>>, %arg3: memref<1x32xf32, #tpu.memory_space<vmem>>, %arg4: memref<32x96xbf16, #tpu.memory_space<vmem>>, %arg5: memref<1x96xf32, #tpu.memory_space<vmem>>, %arg6: memref<16x96xbf16, #tpu.memory_space<vmem>>) attributes {dimension_semantics = [#tpu.dimension_semantics<parallel>], iteration_bounds = array<i64: 1>, scalar_prefetch = 0 : i64, scratch_operands = 0 : i64, tpu.core_type = #tpu.core_type<tc>, window_params = [{transform_indices = @transform_0, window_bounds = array<i64: 16, 32>}, {pipeline_mode = #tpu.pipeline_mode<synchronous>, transform_indices = @transform_1, window_bounds = array<i64: 1, 32>}, {pipeline_mode = #tpu.pipeline_mode<synchronous>, transform_indices = @transform_2, window_bounds = array<i64: 1, 32>}, {pipeline_mode = #tpu.pipeline_mode<synchronous>, transform_indices = @transform_3, window_bounds = array<i64: 32, 96>}, {pipeline_mode = #tpu.pipeline_mode<synchronous>, transform_indices = @transform_4, window_bounds = array<i64: 1, 96>}, {transform_indices = @transform_5, window_bounds = array<i64: 16, 96>}]} {
    %c0 = arith.constant 0 : index
    %c0_0 = arith.constant 0 : index
    %0 = vector.load %arg1[%c0, %c0_0] : memref<16x32xbf16, #tpu.memory_space<vmem>>, vector<16x32xbf16>
    %1 = arith.extf %0 : vector<16x32xbf16> to vector<16x32xf32>
    %c0_1 = arith.constant 0 : index
    %c0_2 = arith.constant 0 : index
    %2 = vector.load %arg2[%c0_1, %c0_2] : memref<1x32xf32, #tpu.memory_space<vmem>>, vector<1x32xf32>
    %c0_3 = arith.constant 0 : index
    %c0_4 = arith.constant 0 : index
    %3 = vector.load %arg3[%c0_3, %c0_4] : memref<1x32xf32, #tpu.memory_space<vmem>>, vector<1x32xf32>
    %cst = arith.constant dense<0.000000e+00> : vector<16xf32>
    %4 = vector.multi_reduction <add>, %1, %cst [1] : vector<16x32xf32> to vector<16xf32>
    %5 = vector.shape_cast %4 : vector<16xf32> to vector<16x1xf32>
    %cst_5 = arith.constant 3.200000e+01 : f32
    %6 = vector.broadcast %cst_5 : f32 to vector<16x1xf32>
    %7 = arith.divf %5, %6 : vector<16x1xf32>
    %8 = vector.broadcast %7 : vector<16x1xf32> to vector<16x32xf32>
    %9 = arith.subf %1, %8 : vector<16x32xf32>
    %10 = arith.mulf %9, %9 : vector<16x32xf32>
    %cst_6 = arith.constant dense<0.000000e+00> : vector<16xf32>
    %11 = vector.multi_reduction <add>, %10, %cst_6 [1] : vector<16x32xf32> to vector<16xf32>
    %12 = vector.shape_cast %11 : vector<16xf32> to vector<16x1xf32>
    %cst_7 = arith.constant 3.100000e+01 : f32
    %13 = vector.broadcast %cst_7 : f32 to vector<16x1xf32>
    %14 = arith.divf %12, %13 : vector<16x1xf32>
    %15 = vector.broadcast %7 : vector<16x1xf32> to vector<16x32xf32>
    %16 = arith.subf %1, %15 : vector<16x32xf32>
    %17 = vector.broadcast %2 : vector<1x32xf32> to vector<16x32xf32>
    %18 = arith.mulf %17, %16 : vector<16x32xf32>
    %19 = math.sqrt %14 : vector<16x1xf32>
    %cst_8 = arith.constant 9.99999997E-7 : f32
    %20 = vector.broadcast %cst_8 : f32 to vector<16x1xf32>
    %21 = arith.addf %19, %20 : vector<16x1xf32>
    %22 = vector.broadcast %21 : vector<16x1xf32> to vector<16x32xf32>
    %23 = arith.divf %18, %22 : vector<16x32xf32>
    %24 = vector.broadcast %3 : vector<1x32xf32> to vector<16x32xf32>
    %25 = arith.addf %23, %24 : vector<16x32xf32>
    %26 = arith.truncf %25 : vector<16x32xf32> to vector<16x32xbf16>
    %c0_9 = arith.constant 0 : index
    %c0_10 = arith.constant 0 : index
    %27 = vector.load %arg4[%c0_9, %c0_10] : memref<32x96xbf16, #tpu.memory_space<vmem>>, vector<32x96xbf16>
    %cst_11 = arith.constant dense<0.000000e+00> : vector<16x96xf32>
    %28 = tpu.matmul %26, %27, %cst_11 {dimension_numbers = #tpu.dot_dimension_numbers<[1], [0], [0], [1], [0, 0, 1, 1], [], []>} : vector<16x32xbf16>, vector<32x96xbf16>, vector<16x96xf32> -> vector<16x96xf32>
    %c0_12 = arith.constant 0 : index
    %c0_13 = arith.constant 0 : index
    %29 = vector.load %arg5[%c0_12, %c0_13] : memref<1x96xf32, #tpu.memory_space<vmem>>, vector<1x96xf32>
    %30 = vector.broadcast %29 : vector<1x96xf32> to vector<16x96xf32>
    %31 = arith.addf %28, %30 : vector<16x96xf32>
    %32 = arith.truncf %31 : vector<16x96xf32> to vector<16x96xbf16>
    %c0_14 = arith.constant 0 : index
    %c0_15 = arith.constant 0 : index
    %33 = vector.load %arg6[%c0_14, %c0_15] : memref<16x96xbf16, #tpu.memory_space<vmem>>, vector<16x96xbf16>
    tpu.vector_store %arg6[%c0_14, %c0_15], %32 {strides = array<i32>} : memref<16x96xbf16, #tpu.memory_space<vmem>>, vector<16x96xbf16>,
    return
  }
  func.func @transform_0(%arg0: i32) -> (i32, i32) {
    %c0_i32 = arith.constant 0 : i32
    %c0_i32_0 = arith.constant 0 : i32
    return %arg0, %c0_i32 : i32, i32
  }
  func.func @transform_1(%arg0: i32) -> (i32, i32) {
    %c0_i32 = arith.constant 0 : i32
    %c0_i32_0 = arith.constant 0 : i32
    %c0_i32_1 = arith.constant 0 : i32
    return %c0_i32, %c0_i32_0 : i32, i32
  }
  func.func @transform_2(%arg0: i32) -> (i32, i32) {
    %c0_i32 = arith.constant 0 : i32
    %c0_i32_0 = arith.constant 0 : i32
    %c0_i32_1 = arith.constant 0 : i32
    return %c0_i32, %c0_i32_0 : i32, i32
  }
  func.func @transform_3(%arg0: i32) -> (i32, i32) {
    %c0_i32 = arith.constant 0 : i32
    %c0_i32_0 = arith.constant 0 : i32
    %c0_i32_1 = arith.constant 0 : i32
    return %c0_i32, %c0_i32_0 : i32, i32
  }
  func.func @transform_4(%arg0: i32) -> (i32, i32) {
    %c0_i32 = arith.constant 0 : i32
    %c0_i32_0 = arith.constant 0 : i32
    %c0_i32_1 = arith.constant 0 : i32
    return %c0_i32, %c0_i32_0 : i32, i32
  }
  func.func @transform_5(%arg0: i32) -> (i32, i32) {
    %c0_i32 = arith.constant 0 : i32
    %c0_i32_0 = arith.constant 0 : i32
    return %arg0, %c0_i32 : i32, i32
  }
}

module attributes {stable_mosaic.version = 11 : i64} {
  func.func @_ln_ffn_kernel(%arg0: i32, %arg1: memref<16x32xbf16, #tpu.memory_space<vmem>>, %arg2: memref<1x32xf32, #tpu.memory_space<vmem>>, %arg3: memref<1x32xf32, #tpu.memory_space<vmem>>, %arg4: memref<32x64xbf16, #tpu.memory_space<vmem>>, %arg5: memref<1x64xf32, #tpu.memory_space<vmem>>, %arg6: memref<64x32xbf16, #tpu.memory_space<vmem>>, %arg7: memref<1x32xf32, #tpu.memory_space<vmem>>, %arg8: memref<16x32xbf16, #tpu.memory_space<vmem>>) attributes {dimension_semantics = [#tpu.dimension_semantics<parallel>], iteration_bounds = array<i64: 1>, scalar_prefetch = 0 : i64, scratch_operands = 0 : i64, tpu.core_type = #tpu.core_type<tc>, window_params = [{transform_indices = @transform_0, window_bounds = array<i64: 16, 32>}, {pipeline_mode = #tpu.pipeline_mode<synchronous>, transform_indices = @transform_1, window_bounds = array<i64: 1, 32>}, {pipeline_mode = #tpu.pipeline_mode<synchronous>, transform_indices = @transform_2, window_bounds = array<i64: 1, 32>}, {pipeline_mode = #tpu.pipeline_mode<synchronous>, transform_indices = @transform_3, window_bounds = array<i64: 32, 64>}, {pipeline_mode = #tpu.pipeline_mode<synchronous>, transform_indices = @transform_4, window_bounds = array<i64: 1, 64>}, {pipeline_mode = #tpu.pipeline_mode<synchronous>, transform_indices = @transform_5, window_bounds = array<i64: 64, 32>}, {pipeline_mode = #tpu.pipeline_mode<synchronous>, transform_indices = @transform_6, window_bounds = array<i64: 1, 32>}, {transform_indices = @transform_7, window_bounds = array<i64: 16, 32>}]} {
    %c0 = arith.constant 0 : index
    %c0_0 = arith.constant 0 : index
    %0 = vector.load %arg1[%c0, %c0_0] : memref<16x32xbf16, #tpu.memory_space<vmem>>, vector<16x32xbf16>
    %1 = arith.extf %0 : vector<16x32xbf16> to vector<16x32xf32>
    %c0_1 = arith.constant 0 : index
    %c0_2 = arith.constant 0 : index
    %2 = vector.load %arg2[%c0_1, %c0_2] : memref<1x32xf32, #tpu.memory_space<vmem>>, vector<1x32xf32>
    %c0_3 = arith.constant 0 : index
    %c0_4 = arith.constant 0 : index
    %3 = vector.load %arg3[%c0_3, %c0_4] : memref<1x32xf32, #tpu.memory_space<vmem>>, vector<1x32xf32>
    %cst = arith.constant dense<0.000000e+00> : vector<16xf32>
    %4 = vector.multi_reduction <add>, %1, %cst [1] : vector<16x32xf32> to vector<16xf32>
    %5 = vector.shape_cast %4 : vector<16xf32> to vector<16x1xf32>
    %cst_5 = arith.constant 3.200000e+01 : f32
    %6 = vector.broadcast %cst_5 : f32 to vector<16x1xf32>
    %7 = arith.divf %5, %6 : vector<16x1xf32>
    %8 = vector.broadcast %7 : vector<16x1xf32> to vector<16x32xf32>
    %9 = arith.subf %1, %8 : vector<16x32xf32>
    %10 = arith.mulf %9, %9 : vector<16x32xf32>
    %cst_6 = arith.constant dense<0.000000e+00> : vector<16xf32>
    %11 = vector.multi_reduction <add>, %10, %cst_6 [1] : vector<16x32xf32> to vector<16xf32>
    %12 = vector.shape_cast %11 : vector<16xf32> to vector<16x1xf32>
    %cst_7 = arith.constant 3.100000e+01 : f32
    %13 = vector.broadcast %cst_7 : f32 to vector<16x1xf32>
    %14 = arith.divf %12, %13 : vector<16x1xf32>
    %15 = vector.broadcast %7 : vector<16x1xf32> to vector<16x32xf32>
    %16 = arith.subf %1, %15 : vector<16x32xf32>
    %17 = vector.broadcast %2 : vector<1x32xf32> to vector<16x32xf32>
    %18 = arith.mulf %17, %16 : vector<16x32xf32>
    %19 = math.sqrt %14 : vector<16x1xf32>
    %cst_8 = arith.constant 9.99999997E-7 : f32
    %20 = vector.broadcast %cst_8 : f32 to vector<16x1xf32>
    %21 = arith.addf %19, %20 : vector<16x1xf32>
    %22 = vector.broadcast %21 : vector<16x1xf32> to vector<16x32xf32>
    %23 = arith.divf %18, %22 : vector<16x32xf32>
    %24 = vector.broadcast %3 : vector<1x32xf32> to vector<16x32xf32>
    %25 = arith.addf %23, %24 : vector<16x32xf32>
    %26 = arith.truncf %25 : vector<16x32xf32> to vector<16x32xbf16>
    %c0_9 = arith.constant 0 : index
    %c0_10 = arith.constant 0 : index
    %27 = vector.load %arg4[%c0_9, %c0_10] : memref<32x64xbf16, #tpu.memory_space<vmem>>, vector<32x64xbf16>
    %cst_11 = arith.constant dense<0.000000e+00> : vector<16x64xf32>
    %28 = tpu.matmul %26, %27, %cst_11 {dimension_numbers = #tpu.dot_dimension_numbers<[1], [0], [0], [1], [0, 0, 1, 1], [], []>} : vector<16x32xbf16>, vector<32x64xbf16>, vector<16x64xf32> -> vector<16x64xf32>
    %c0_12 = arith.constant 0 : index
    %c0_13 = arith.constant 0 : index
    %29 = vector.load %arg5[%c0_12, %c0_13] : memref<1x64xf32, #tpu.memory_space<vmem>>, vector<1x64xf32>
    %30 = vector.broadcast %29 : vector<1x64xf32> to vector<16x64xf32>
    %31 = arith.addf %28, %30 : vector<16x64xf32>
    %cst_14 = arith.constant 0.000000e+00 : f32
    %32 = vector.broadcast %cst_14 : f32 to vector<16x64xf32>
    %33 = arith.maximumf %31, %32 : vector<16x64xf32>
    %34 = arith.truncf %33 : vector<16x64xf32> to vector<16x64xbf16>
    %c0_15 = arith.constant 0 : index
    %c0_16 = arith.constant 0 : index
    %35 = vector.load %arg6[%c0_15, %c0_16] : memref<64x32xbf16, #tpu.memory_space<vmem>>, vector<64x32xbf16>
    %cst_17 = arith.constant dense<0.000000e+00> : vector<16x32xf32>
    %36 = tpu.matmul %34, %35, %cst_17 {dimension_numbers = #tpu.dot_dimension_numbers<[1], [0], [0], [1], [0, 0, 1, 1], [], []>} : vector<16x64xbf16>, vector<64x32xbf16>, vector<16x32xf32> -> vector<16x32xf32>
    %c0_18 = arith.constant 0 : index
    %c0_19 = arith.constant 0 : index
    %37 = vector.load %arg7[%c0_18, %c0_19] : memref<1x32xf32, #tpu.memory_space<vmem>>, vector<1x32xf32>
    %38 = vector.broadcast %37 : vector<1x32xf32> to vector<16x32xf32>
    %39 = arith.addf %36, %38 : vector<16x32xf32>
    %40 = arith.addf %1, %39 : vector<16x32xf32>
    %41 = arith.truncf %40 : vector<16x32xf32> to vector<16x32xbf16>
    %c0_20 = arith.constant 0 : index
    %c0_21 = arith.constant 0 : index
    %42 = vector.load %arg8[%c0_20, %c0_21] : memref<16x32xbf16, #tpu.memory_space<vmem>>, vector<16x32xbf16>
    tpu.vector_store %arg8[%c0_20, %c0_21], %41 {strides = array<i32>} : memref<16x32xbf16, #tpu.memory_space<vmem>>, vector<16x32xbf16>,
    return
  }
  func.func @transform_0(%arg0: i32) -> (i32, i32) {
    %c0_i32 = arith.constant 0 : i32
    %c0_i32_0 = arith.constant 0 : i32
    return %arg0, %c0_i32 : i32, i32
  }
  func.func @transform_1(%arg0: i32) -> (i32, i32) {
    %c0_i32 = arith.constant 0 : i32
    %c0_i32_0 = arith.constant 0 : i32
    %c0_i32_1 = arith.constant 0 : i32
    return %c0_i32, %c0_i32_0 : i32, i32
  }
  func.func @transform_2(%arg0: i32) -> (i32, i32) {
    %c0_i32 = arith.constant 0 : i32
    %c0_i32_0 = arith.constant 0 : i32
    %c0_i32_1 = arith.constant 0 : i32
    return %c0_i32, %c0_i32_0 : i32, i32
  }
  func.func @transform_3(%arg0: i32) -> (i32, i32) {
    %c0_i32 = arith.constant 0 : i32
    %c0_i32_0 = arith.constant 0 : i32
    %c0_i32_1 = arith.constant 0 : i32
    return %c0_i32, %c0_i32_0 : i32, i32
  }
  func.func @transform_4(%arg0: i32) -> (i32, i32) {
    %c0_i32 = arith.constant 0 : i32
    %c0_i32_0 = arith.constant 0 : i32
    %c0_i32_1 = arith.constant 0 : i32
    return %c0_i32, %c0_i32_0 : i32, i32
  }
  func.func @transform_5(%arg0: i32) -> (i32, i32) {
    %c0_i32 = arith.constant 0 : i32
    %c0_i32_0 = arith.constant 0 : i32
    %c0_i32_1 = arith.constant 0 : i32
    return %c0_i32, %c0_i32_0 : i32, i32
  }
  func.func @transform_6(%arg0: i32) -> (i32, i32) {
    %c0_i32 = arith.constant 0 : i32
    %c0_i32_0 = arith.constant 0 : i32
    %c0_i32_1 = arith.constant 0 : i32
    return %c0_i32, %c0_i32_0 : i32, i32
  }
  func.func @transform_7(%arg0: i32) -> (i32, i32) {
    %c0_i32 = arith.constant 0 : i32
    %c0_i32_0 = arith.constant 0 : i32
    return %arg0, %c0_i32 : i32, i32
  }
}

module attributes {stable_mosaic.version = 11 : i64} {
  func.func @_layernorm_kernel(%arg0: i32, %arg1: memref<16x32xbf16, #tpu.memory_space<vmem>>, %arg2: memref<1x32xf32, #tpu.memory_space<vmem>>, %arg3: memref<1x32xf32, #tpu.memory_space<vmem>>, %arg4: memref<16x32xbf16, #tpu.memory_space<vmem>>) attributes {dimension_semantics = [#tpu.dimension_semantics<parallel>], iteration_bounds = array<i64: 1>, scalar_prefetch = 0 : i64, scratch_operands = 0 : i64, tpu.core_type = #tpu.core_type<tc>, window_params = [{transform_indices = @transform_0, window_bounds = array<i64: 16, 32>}, {pipeline_mode = #tpu.pipeline_mode<synchronous>, transform_indices = @transform_1, window_bounds = array<i64: 1, 32>}, {pipeline_mode = #tpu.pipeline_mode<synchronous>, transform_indices = @transform_2, window_bounds = array<i64: 1, 32>}, {transform_indices = @transform_3, window_bounds = array<i64: 16, 32>}]} {
    %c0 = arith.constant 0 : index
    %c0_0 = arith.constant 0 : index
    %0 = vector.load %arg1[%c0, %c0_0] : memref<16x32xbf16, #tpu.memory_space<vmem>>, vector<16x32xbf16>
    %1 = arith.extf %0 : vector<16x32xbf16> to vector<16x32xf32>
    %c0_1 = arith.constant 0 : index
    %c0_2 = arith.constant 0 : index
    %2 = vector.load %arg2[%c0_1, %c0_2] : memref<1x32xf32, #tpu.memory_space<vmem>>, vector<1x32xf32>
    %c0_3 = arith.constant 0 : index
    %c0_4 = arith.constant 0 : index
    %3 = vector.load %arg3[%c0_3, %c0_4] : memref<1x32xf32, #tpu.memory_space<vmem>>, vector<1x32xf32>
    %cst = arith.constant dense<0.000000e+00> : vector<16xf32>
    %4 = vector.multi_reduction <add>, %1, %cst [1] : vector<16x32xf32> to vector<16xf32>
    %5 = vector.shape_cast %4 : vector<16xf32> to vector<16x1xf32>
    %cst_5 = arith.constant 3.200000e+01 : f32
    %6 = vector.broadcast %cst_5 : f32 to vector<16x1xf32>
    %7 = arith.divf %5, %6 : vector<16x1xf32>
    %8 = vector.broadcast %7 : vector<16x1xf32> to vector<16x32xf32>
    %9 = arith.subf %1, %8 : vector<16x32xf32>
    %10 = arith.mulf %9, %9 : vector<16x32xf32>
    %cst_6 = arith.constant dense<0.000000e+00> : vector<16xf32>
    %11 = vector.multi_reduction <add>, %10, %cst_6 [1] : vector<16x32xf32> to vector<16xf32>
    %12 = vector.shape_cast %11 : vector<16xf32> to vector<16x1xf32>
    %cst_7 = arith.constant 3.100000e+01 : f32
    %13 = vector.broadcast %cst_7 : f32 to vector<16x1xf32>
    %14 = arith.divf %12, %13 : vector<16x1xf32>
    %15 = vector.broadcast %7 : vector<16x1xf32> to vector<16x32xf32>
    %16 = arith.subf %1, %15 : vector<16x32xf32>
    %17 = vector.broadcast %2 : vector<1x32xf32> to vector<16x32xf32>
    %18 = arith.mulf %17, %16 : vector<16x32xf32>
    %19 = math.sqrt %14 : vector<16x1xf32>
    %cst_8 = arith.constant 9.99999997E-7 : f32
    %20 = vector.broadcast %cst_8 : f32 to vector<16x1xf32>
    %21 = arith.addf %19, %20 : vector<16x1xf32>
    %22 = vector.broadcast %21 : vector<16x1xf32> to vector<16x32xf32>
    %23 = arith.divf %18, %22 : vector<16x32xf32>
    %24 = vector.broadcast %3 : vector<1x32xf32> to vector<16x32xf32>
    %25 = arith.addf %23, %24 : vector<16x32xf32>
    %26 = arith.truncf %25 : vector<16x32xf32> to vector<16x32xbf16>
    %c0_9 = arith.constant 0 : index
    %c0_10 = arith.constant 0 : index
    %27 = vector.load %arg4[%c0_9, %c0_10] : memref<16x32xbf16, #tpu.memory_space<vmem>>, vector<16x32xbf16>
    tpu.vector_store %arg4[%c0_9, %c0_10], %26 {strides = array<i32>} : memref<16x32xbf16, #tpu.memory_space<vmem>>, vector<16x32xbf16>,
    return
  }
  func.func @transform_0(%arg0: i32) -> (i32, i32) {
    %c0_i32 = arith.constant 0 : i32
    %c0_i32_0 = arith.constant 0 : i32
    return %arg0, %c0_i32 : i32, i32
  }
  func.func @transform_1(%arg0: i32) -> (i32, i32) {
    %c0_i32 = arith.constant 0 : i32
    %c0_i32_0 = arith.constant 0 : i32
    %c0_i32_1 = arith.constant 0 : i32
    return %c0_i32, %c0_i32_0 : i32, i32
  }
  func.func @transform_2(%arg0: i32) -> (i32, i32) {
    %c0_i32 = arith.constant 0 : i32
    %c0_i32_0 = arith.constant 0 : i32
    %c0_i32_1 = arith.constant 0 : i32
    return %c0_i32, %c0_i32_0 : i32, i32
  }
  func.func @transform_3(%arg0: i32) -> (i32, i32) {
    %c0_i32 = arith.constant 0 : i32
    %c0_i32_0 = arith.constant 0 : i32
    return %arg0, %c0_i32 : i32, i32
  }
}

module attributes {stable_mosaic.version = 11 : i64} {
  func.func @_linear_kernel(%arg0: i32, %arg1: memref<16x32xbf16, #tpu.memory_space<vmem>>, %arg2: memref<32x64xbf16, #tpu.memory_space<vmem>>, %arg3: memref<1x64xf32, #tpu.memory_space<vmem>>, %arg4: memref<16x64xbf16, #tpu.memory_space<vmem>>) attributes {dimension_semantics = [#tpu.dimension_semantics<parallel>], iteration_bounds = array<i64: 1>, scalar_prefetch = 0 : i64, scratch_operands = 0 : i64, tpu.core_type = #tpu.core_type<tc>, window_params = [{transform_indices = @transform_0, window_bounds = array<i64: 16, 32>}, {pipeline_mode = #tpu.pipeline_mode<synchronous>, transform_indices = @transform_1, window_bounds = array<i64: 32, 64>}, {pipeline_mode = #tpu.pipeline_mode<synchronous>, transform_indices = @transform_2, window_bounds = array<i64: 1, 64>}, {transform_indices = @transform_3, window_bounds = array<i64: 16, 64>}]} {
    %c0 = arith.constant 0 : index
    %c0_0 = arith.constant 0 : index
    %0 = vector.load %arg1[%c0, %c0_0] : memref<16x32xbf16, #tpu.memory_space<vmem>>, vector<16x32xbf16>
    %c0_1 = arith.constant 0 : index
    %c0_2 = arith.constant 0 : index
    %1 = vector.load %arg2[%c0_1, %c0_2] : memref<32x64xbf16, #tpu.memory_space<vmem>>, vector<32x64xbf16>
    %cst = arith.constant dense<0.000000e+00> : vector<16x64xf32>
    %2 = tpu.matmul %0, %1, %cst {dimension_numbers = #tpu.dot_dimension_numbers<[1], [0], [0], [1], [0, 0, 1, 1], [], []>} : vector<16x32xbf16>, vector<32x64xbf16>, vector<16x64xf32> -> vector<16x64xf32>
    %c0_3 = arith.constant 0 : index
    %c0_4 = arith.constant 0 : index
    %3 = vector.load %arg3[%c0_3, %c0_4] : memref<1x64xf32, #tpu.memory_space<vmem>>, vector<1x64xf32>
    %4 = vector.broadcast %3 : vector<1x64xf32> to vector<16x64xf32>
    %5 = arith.addf %2, %4 : vector<16x64xf32>
    %6 = arith.truncf %5 : vector<16x64xf32> to vector<16x64xbf16>
    %c0_5 = arith.constant 0 : index
    %c0_6 = arith.constant 0 : index
    %7 = vector.load %arg4[%c0_5, %c0_6] : memref<16x64xbf16, #tpu.memory_space<vmem>>, vector<16x64xbf16>
    tpu.vector_store %arg4[%c0_5, %c0_6], %6 {strides = array<i32>} : memref<16x64xbf16, #tpu.memory_space<vmem>>, vector<16x64xbf16>,
    return
  }
  func.func @transform_0(%arg0: i32) -> (i32, i32) {
    %c0_i32 = arith.constant 0 : i32
    %c0_i32_0 = arith.constant 0 : i32
    return %arg0, %c0_i32 : i32, i32
  }
  func.func @transform_1(%arg0: i32) -> (i32, i32) {
    %c0_i32 = arith.constant 0 : i32
    %c0_i32_0 = arith.constant 0 : i32
    %c0_i32_1 = arith.constant 0 : i32
    return %c0_i32, %c0_i32_0 : i32, i32
  }
  func.func @transform_2(%arg0: i32) -> (i32, i32) {
    %c0_i32 = arith.constant 0 : i32
    %c0_i32_0 = arith.constant 0 : i32
    %c0_i32_1 = arith.constant 0 : i32
    return %c0_i32, %c0_i32_0 : i32, i32
  }
  func.func @transform_3(%arg0: i32) -> (i32, i32) {
    %c0_i32 = arith.constant 0 : i32
    %c0_i32_0 = arith.constant 0 : i32
    return %arg0, %c0_i32 : i32, i32
  }
}

module attributes {stable_mosaic.version = 11 : i64} {
  func.func @_linear_kernel(%arg0: i32, %arg1: memref<16x32xbf16, #tpu.memory_space<vmem>>, %arg2: memref<32x64xbf16, #tpu.memory_space<vmem>>, %arg3: memref<1x64xf32, #tpu.memory_space<vmem>>, %arg4: memref<16x64xbf16, #tpu.memory_space<vmem>>) attributes {dimension_semantics = [#tpu.dimension_semantics<parallel>], iteration_bounds = array<i64: 1>, scalar_prefetch = 0 : i64, scratch_operands = 0 : i64, tpu.core_type = #tpu.core_type<tc>, window_params = [{transform_indices = @transform_0, window_bounds = array<i64: 16, 32>}, {pipeline_mode = #tpu.pipeline_mode<synchronous>, transform_indices = @transform_1, window_bounds = array<i64: 32, 64>}, {pipeline_mode = #tpu.pipeline_mode<synchronous>, transform_indices = @transform_2, window_bounds = array<i64: 1, 64>}, {transform_indices = @transform_3, window_bounds = array<i64: 16, 64>}]} {
    %c0 = arith.constant 0 : index
    %c0_0 = arith.constant 0 : index
    %0 = vector.load %arg1[%c0, %c0_0] : memref<16x32xbf16, #tpu.memory_space<vmem>>, vector<16x32xbf16>
    %c0_1 = arith.constant 0 : index
    %c0_2 = arith.constant 0 : index
    %1 = vector.load %arg2[%c0_1, %c0_2] : memref<32x64xbf16, #tpu.memory_space<vmem>>, vector<32x64xbf16>
    %cst = arith.constant dense<0.000000e+00> : vector<16x64xf32>
    %2 = tpu.matmul %0, %1, %cst {dimension_numbers = #tpu.dot_dimension_numbers<[1], [0], [0], [1], [0, 0, 1, 1], [], []>} : vector<16x32xbf16>, vector<32x64xbf16>, vector<16x64xf32> -> vector<16x64xf32>
    %c0_3 = arith.constant 0 : index
    %c0_4 = arith.constant 0 : index
    %3 = vector.load %arg3[%c0_3, %c0_4] : memref<1x64xf32, #tpu.memory_space<vmem>>, vector<1x64xf32>
    %4 = vector.broadcast %3 : vector<1x64xf32> to vector<16x64xf32>
    %5 = arith.addf %2, %4 : vector<16x64xf32>
    %6 = arith.truncf %5 : vector<16x64xf32> to vector<16x64xbf16>
    %c0_5 = arith.constant 0 : index
    %c0_6 = arith.constant 0 : index
    %7 = vector.load %arg4[%c0_5, %c0_6] : memref<16x64xbf16, #tpu.memory_space<vmem>>, vector<16x64xbf16>
    tpu.vector_store %arg4[%c0_5, %c0_6], %6 {strides = array<i32>} : memref<16x64xbf16, #tpu.memory_space<vmem>>, vector<16x64xbf16>,
    return
  }
  func.func @transform_0(%arg0: i32) -> (i32, i32) {
    %c0_i32 = arith.constant 0 : i32
    %c0_i32_0 = arith.constant 0 : i32
    return %arg0, %c0_i32 : i32, i32
  }
  func.func @transform_1(%arg0: i32) -> (i32, i32) {
    %c0_i32 = arith.constant 0 : i32
    %c0_i32_0 = arith.constant 0 : i32
    %c0_i32_1 = arith.constant 0 : i32
    return %c0_i32, %c0_i32_0 : i32, i32
  }
  func.func @transform_2(%arg0: i32) -> (i32, i32) {
    %c0_i32 = arith.constant 0 : i32
    %c0_i32_0 = arith.constant 0 : i32
    %c0_i32_1 = arith.constant 0 : i32
    return %c0_i32, %c0_i32_0 : i32, i32
  }
  func.func @transform_3(%arg0: i32) -> (i32, i32) {
    %c0_i32 = arith.constant 0 : i32
    %c0_i32_0 = arith.constant 0 : i32
    return %arg0, %c0_i32 : i32, i32
  }
}

module attributes {stable_mosaic.version = 11 : i64} {
  func.func @_ln_generator_kernel(%arg0: i32, %arg1: memref<2x32xbf16, #tpu.memory_space<vmem>>, %arg2: memref<1x32xf32, #tpu.memory_space<vmem>>, %arg3: memref<1x32xf32, #tpu.memory_space<vmem>>, %arg4: memref<32x16xbf16, #tpu.memory_space<vmem>>, %arg5: memref<1x16xf32, #tpu.memory_space<vmem>>, %arg6: memref<2x16xf32, #tpu.memory_space<vmem>>) attributes {dimension_semantics = [#tpu.dimension_semantics<parallel>], iteration_bounds = array<i64: 1>, scalar_prefetch = 0 : i64, scratch_operands = 0 : i64, tpu.core_type = #tpu.core_type<tc>, window_params = [{transform_indices = @transform_0, window_bounds = array<i64: 2, 32>}, {pipeline_mode = #tpu.pipeline_mode<synchronous>, transform_indices = @transform_1, window_bounds = array<i64: 1, 32>}, {pipeline_mode = #tpu.pipeline_mode<synchronous>, transform_indices = @transform_2, window_bounds = array<i64: 1, 32>}, {pipeline_mode = #tpu.pipeline_mode<synchronous>, transform_indices = @transform_3, window_bounds = array<i64: 32, 16>}, {pipeline_mode = #tpu.pipeline_mode<synchronous>, transform_indices = @transform_4, window_bounds = array<i64: 1, 16>}, {transform_indices = @transform_5, window_bounds = array<i64: 2, 16>}]} {
    %c0 = arith.constant 0 : index
    %c0_0 = arith.constant 0 : index
    %0 = vector.load %arg1[%c0, %c0_0] : memref<2x32xbf16, #tpu.memory_space<vmem>>, vector<2x32xbf16>
    %1 = arith.extf %0 : vector<2x32xbf16> to vector<2x32xf32>
    %c0_1 = arith.constant 0 : index
    %c0_2 = arith.constant 0 : index
    %2 = vector.load %arg2[%c0_1, %c0_2] : memref<1x32xf32, #tpu.memory_space<vmem>>, vector<1x32xf32>
    %c0_3 = arith.constant 0 : index
    %c0_4 = arith.constant 0 : index
    %3 = vector.load %arg3[%c0_3, %c0_4] : memref<1x32xf32, #tpu.memory_space<vmem>>, vector<1x32xf32>
    %cst = arith.constant dense<0.000000e+00> : vector<2xf32>
    %4 = vector.multi_reduction <add>, %1, %cst [1] : vector<2x32xf32> to vector<2xf32>
    %5 = vector.shape_cast %4 : vector<2xf32> to vector<2x1xf32>
    %cst_5 = arith.constant 3.200000e+01 : f32
    %6 = vector.broadcast %cst_5 : f32 to vector<2x1xf32>
    %7 = arith.divf %5, %6 : vector<2x1xf32>
    %8 = vector.broadcast %7 : vector<2x1xf32> to vector<2x32xf32>
    %9 = arith.subf %1, %8 : vector<2x32xf32>
    %10 = arith.mulf %9, %9 : vector<2x32xf32>
    %cst_6 = arith.constant dense<0.000000e+00> : vector<2xf32>
    %11 = vector.multi_reduction <add>, %10, %cst_6 [1] : vector<2x32xf32> to vector<2xf32>
    %12 = vector.shape_cast %11 : vector<2xf32> to vector<2x1xf32>
    %cst_7 = arith.constant 3.100000e+01 : f32
    %13 = vector.broadcast %cst_7 : f32 to vector<2x1xf32>
    %14 = arith.divf %12, %13 : vector<2x1xf32>
    %15 = vector.broadcast %7 : vector<2x1xf32> to vector<2x32xf32>
    %16 = arith.subf %1, %15 : vector<2x32xf32>
    %17 = vector.broadcast %2 : vector<1x32xf32> to vector<2x32xf32>
    %18 = arith.mulf %17, %16 : vector<2x32xf32>
    %19 = math.sqrt %14 : vector<2x1xf32>
    %cst_8 = arith.constant 9.99999997E-7 : f32
    %20 = vector.broadcast %cst_8 : f32 to vector<2x1xf32>
    %21 = arith.addf %19, %20 : vector<2x1xf32>
    %22 = vector.broadcast %21 : vector<2x1xf32> to vector<2x32xf32>
    %23 = arith.divf %18, %22 : vector<2x32xf32>
    %24 = vector.broadcast %3 : vector<1x32xf32> to vector<2x32xf32>
    %25 = arith.addf %23, %24 : vector<2x32xf32>
    %26 = arith.truncf %25 : vector<2x32xf32> to vector<2x32xbf16>
    %c0_9 = arith.constant 0 : index
    %c0_10 = arith.constant 0 : index
    %27 = vector.load %arg4[%c0_9, %c0_10] : memref<32x16xbf16, #tpu.memory_space<vmem>>, vector<32x16xbf16>
    %cst_11 = arith.constant dense<0.000000e+00> : vector<2x16xf32>
    %28 = tpu.matmul %26, %27, %cst_11 {dimension_numbers = #tpu.dot_dimension_numbers<[1], [0], [0], [1], [0, 0, 1, 1], [], []>} : vector<2x32xbf16>, vector<32x16xbf16>, vector<2x16xf32> -> vector<2x16xf32>
    %c0_12 = arith.constant 0 : index
    %c0_13 = arith.constant 0 : index
    %29 = vector.load %arg5[%c0_12, %c0_13] : memref<1x16xf32, #tpu.memory_space<vmem>>, vector<1x16xf32>
    %30 = vector.broadcast %29 : vector<1x16xf32> to vector<2x16xf32>
    %31 = arith.addf %28, %30 : vector<2x16xf32>
    %cst_14 = arith.constant dense<0xFF800000> : vector<2xf32>
    %32 = vector.multi_reduction <maximumf>, %31, %cst_14 [1] : vector<2x16xf32> to vector<2xf32>
    %33 = vector.shape_cast %32 : vector<2xf32> to vector<2x1xf32>
    %34 = vector.broadcast %33 : vector<2x1xf32> to vector<2x16xf32>
    %35 = arith.subf %31, %34 : vector<2x16xf32>
    %36 = math.exp %35 : vector<2x16xf32>
    %cst_15 = arith.constant dense<0.000000e+00> : vector<2xf32>
    %37 = vector.multi_reduction <add>, %36, %cst_15 [1] : vector<2x16xf32> to vector<2xf32>
    %38 = vector.shape_cast %37 : vector<2xf32> to vector<2x1xf32>
    %39 = math.log %38 : vector<2x1xf32>
    %40 = vector.broadcast %39 : vector<2x1xf32> to vector<2x16xf32>
    %41 = arith.subf %35, %40 : vector<2x16xf32>
    %c0_16 = arith.constant 0 : index
    %c0_17 = arith.constant 0 : index
    %42 = vector.load %arg6[%c0_16, %c0_17] : memref<2x16xf32, #tpu.memory_space<vmem>>, vector<2x16xf32>
    tpu.vector_store %arg6[%c0_16, %c0_17], %41 {strides = array<i32>} : memref<2x16xf32, #tpu.memory_space<vmem>>, vector<2x16xf32>,
    return
  }
  func.func @transform_0(%arg0: i32) -> (i32, i32) {
    %c0_i32 = arith.constant 0 : i32
    %c0_i32_0 = arith.constant 0 : i32
    return %arg0, %c0_i32 : i32, i32
  }
  func.func @transform_1(%arg0: i32) -> (i32, i32) {
    %c0_i32 = arith.constant 0 : i32
    %c0_i32_0 = arith.constant 0 : i32
    %c0_i32_1 = arith.constant 0 : i32
    return %c0_i32, %c0_i32_0 : i32, i32
  }
  func.func @transform_2(%arg0: i32) -> (i32, i32) {
    %c0_i32 = arith.constant 0 : i32
    %c0_i32_0 = arith.constant 0 : i32
    %c0_i32_1 = arith.constant 0 : i32
    return %c0_i32, %c0_i32_0 : i32, i32
  }
  func.func @transform_3(%arg0: i32) -> (i32, i32) {
    %c0_i32 = arith.constant 0 : i32
    %c0_i32_0 = arith.constant 0 : i32
    %c0_i32_1 = arith.constant 0 : i32
    return %c0_i32, %c0_i32_0 : i32, i32
  }
  func.func @transform_4(%arg0: i32) -> (i32, i32) {
    %c0_i32 = arith.constant 0 : i32
    %c0_i32_0 = arith.constant 0 : i32
    %c0_i32_1 = arith.constant 0 : i32
    return %c0_i32, %c0_i32_0 : i32, i32
  }
  func.func @transform_5(%arg0: i32) -> (i32, i32) {
    %c0_i32 = arith.constant 0 : i32
    %c0_i32_0 = arith.constant 0 : i32
    return %arg0, %c0_i32 : i32, i32
  }
}

module attributes {stable_mosaic.version = 11 : i64} {
  func.func @_decode_self_attn_kernel(%arg0: memref<2x32xbf16, #tpu.memory_space<vmem>>, %arg1: memref<2x6x32xbf16, #tpu.memory_space<vmem>>, %arg2: memref<2x6x32xbf16, #tpu.memory_space<vmem>>, %arg3: memref<1x6xf32, #tpu.memory_space<vmem>>, %arg4: memref<1x32xf32, #tpu.memory_space<vmem>>, %arg5: memref<1x32xf32, #tpu.memory_space<vmem>>, %arg6: memref<32x96xbf16, #tpu.memory_space<vmem>>, %arg7: memref<1x96xf32, #tpu.memory_space<vmem>>, %arg8: memref<32x32xbf16, #tpu.memory_space<vmem>>, %arg9: memref<1x32xf32, #tpu.memory_space<vmem>>, %arg10: memref<2x32xbf16, #tpu.memory_space<vmem>>, %arg11: memref<2x32xbf16, #tpu.memory_space<vmem>>, %arg12: memref<2x32xbf16, #tpu.memory_space<vmem>>) attributes {dimension_semantics = [], scalar_prefetch = 0 : i64, scratch_operands = 0 : i64, tpu.core_type = #tpu.core_type<tc>} {
    %c0 = arith.constant 0 : index
    %c0_0 = arith.constant 0 : index
    %0 = vector.load %arg0[%c0, %c0_0] : memref<2x32xbf16, #tpu.memory_space<vmem>>, vector<2x32xbf16>
    %1 = arith.extf %0 : vector<2x32xbf16> to vector<2x32xf32>
    %c0_1 = arith.constant 0 : index
    %c0_2 = arith.constant 0 : index
    %2 = vector.load %arg4[%c0_1, %c0_2] : memref<1x32xf32, #tpu.memory_space<vmem>>, vector<1x32xf32>
    %c0_3 = arith.constant 0 : index
    %c0_4 = arith.constant 0 : index
    %3 = vector.load %arg5[%c0_3, %c0_4] : memref<1x32xf32, #tpu.memory_space<vmem>>, vector<1x32xf32>
    %cst = arith.constant dense<0.000000e+00> : vector<2xf32>
    %4 = vector.multi_reduction <add>, %1, %cst [1] : vector<2x32xf32> to vector<2xf32>
    %5 = vector.shape_cast %4 : vector<2xf32> to vector<2x1xf32>
    %cst_5 = arith.constant 3.200000e+01 : f32
    %6 = vector.broadcast %cst_5 : f32 to vector<2x1xf32>
    %7 = arith.divf %5, %6 : vector<2x1xf32>
    %8 = vector.broadcast %7 : vector<2x1xf32> to vector<2x32xf32>
    %9 = arith.subf %1, %8 : vector<2x32xf32>
    %10 = arith.mulf %9, %9 : vector<2x32xf32>
    %cst_6 = arith.constant dense<0.000000e+00> : vector<2xf32>
    %11 = vector.multi_reduction <add>, %10, %cst_6 [1] : vector<2x32xf32> to vector<2xf32>
    %12 = vector.shape_cast %11 : vector<2xf32> to vector<2x1xf32>
    %cst_7 = arith.constant 3.100000e+01 : f32
    %13 = vector.broadcast %cst_7 : f32 to vector<2x1xf32>
    %14 = arith.divf %12, %13 : vector<2x1xf32>
    %15 = vector.broadcast %7 : vector<2x1xf32> to vector<2x32xf32>
    %16 = arith.subf %1, %15 : vector<2x32xf32>
    %17 = vector.broadcast %2 : vector<1x32xf32> to vector<2x32xf32>
    %18 = arith.mulf %17, %16 : vector<2x32xf32>
    %19 = math.sqrt %14 : vector<2x1xf32>
    %cst_8 = arith.constant 9.99999997E-7 : f32
    %20 = vector.broadcast %cst_8 : f32 to vector<2x1xf32>
    %21 = arith.addf %19, %20 : vector<2x1xf32>
    %22 = vector.broadcast %21 : vector<2x1xf32> to vector<2x32xf32>
    %23 = arith.divf %18, %22 : vector<2x32xf32>
    %24 = vector.broadcast %3 : vector<1x32xf32> to vector<2x32xf32>
    %25 = arith.addf %23, %24 : vector<2x32xf32>
    %26 = arith.truncf %25 : vector<2x32xf32> to vector<2x32xbf16>
    %c0_9 = arith.constant 0 : index
    %c0_10 = arith.constant 0 : index
    %27 = vector.load %arg6[%c0_9, %c0_10] : memref<32x96xbf16, #tpu.memory_space<vmem>>, vector<32x96xbf16>
    %cst_11 = arith.constant dense<0.000000e+00> : vector<2x96xf32>
    %28 = tpu.matmul %26, %27, %cst_11 {dimension_numbers = #tpu.dot_dimension_numbers<[1], [0], [0], [1], [0, 0, 1, 1], [], []>} : vector<2x32xbf16>, vector<32x96xbf16>, vector<2x96xf32> -> vector<2x96xf32>
    %c0_12 = arith.constant 0 : index
    %c0_13 = arith.constant 0 : index
    %29 = vector.load %arg7[%c0_12, %c0_13] : memref<1x96xf32, #tpu.memory_space<vmem>>, vector<1x96xf32>
    %30 = vector.broadcast %29 : vector<1x96xf32> to vector<2x96xf32>
    %31 = arith.addf %28, %30 : vector<2x96xf32>
    %32 = vector.extract_strided_slice %31 {offsets = [0, 0], sizes = [2, 32], strides = [1, 1]} : vector<2x96xf32> to vector<2x32xf32>
    %33 = vector.extract_strided_slice %31 {offsets = [0, 32], sizes = [2, 32], strides = [1, 1]} : vector<2x96xf32> to vector<2x32xf32>
    %34 = vector.extract_strided_slice %31 {offsets = [0, 64], sizes = [2, 32], strides = [1, 1]} : vector<2x96xf32> to vector<2x32xf32>
    %35 = arith.truncf %33 : vector<2x32xf32> to vector<2x32xbf16>
    %c0_14 = arith.constant 0 : index
    %c0_15 = arith.constant 0 : index
    %36 = vector.load %arg11[%c0_14, %c0_15] : memref<2x32xbf16, #tpu.memory_space<vmem>>, vector<2x32xbf16>
    tpu.vector_store %arg11[%c0_14, %c0_15], %35 {strides = array<i32>} : memref<2x32xbf16, #tpu.memory_space<vmem>>, vector<2x32xbf16>,
    %37 = arith.truncf %34 : vector<2x32xf32> to vector<2x32xbf16>
    %c0_16 = arith.constant 0 : index
    %c0_17 = arith.constant 0 : index
    %38 = vector.load %arg12[%c0_16, %c0_17] : memref<2x32xbf16, #tpu.memory_space<vmem>>, vector<2x32xbf16>
    tpu.vector_store %arg12[%c0_16, %c0_17], %37 {strides = array<i32>} : memref<2x32xbf16, #tpu.memory_space<vmem>>, vector<2x32xbf16>,
    %c0_18 = arith.constant 0 : index
    %c0_19 = arith.constant 0 : index
    %c0_20 = arith.constant 0 : index
    %39 = vector.load %arg1[%c0_18, %c0_19, %c0_20] : memref<2x6x32xbf16, #tpu.memory_space<vmem>>, vector<2x6x32xbf16>
    %c0_21 = arith.constant 0 : index
    %c0_22 = arith.constant 0 : index
    %c0_23 = arith.constant 0 : index
    %40 = vector.load %arg2[%c0_21, %c0_22, %c0_23] : memref<2x6x32xbf16, #tpu.memory_space<vmem>>, vector<2x6x32xbf16>
    %c0_24 = arith.constant 0 : index
    %c0_25 = arith.constant 0 : index
    %41 = vector.load %arg3[%c0_24, %c0_25] : memref<1x6xf32, #tpu.memory_space<vmem>>, vector<1x6xf32>
    %42 = vector.extract_strided_slice %32 {offsets = [0, 0], sizes = [2, 8], strides = [1, 1]} : vector<2x32xf32> to vector<2x8xf32>
    %43 = vector.shape_cast %42 : vector<2x8xf32> to vector<2x1x8xf32>
    %44 = vector.extract_strided_slice %33 {offsets = [0, 0], sizes = [2, 8], strides = [1, 1]} : vector<2x32xf32> to vector<2x8xf32>
    %45 = vector.shape_cast %44 : vector<2x8xf32> to vector<2x1x8xf32>
    %46 = vector.extract_strided_slice %34 {offsets = [0, 0], sizes = [2, 8], strides = [1, 1]} : vector<2x32xf32> to vector<2x8xf32>
    %47 = vector.shape_cast %46 : vector<2x8xf32> to vector<2x1x8xf32>
    %48 = vector.extract_strided_slice %39 {offsets = [0, 0, 0], sizes = [2, 6, 8], strides = [1, 1, 1]} : vector<2x6x32xbf16> to vector<2x6x8xbf16>
    %49 = vector.extract_strided_slice %40 {offsets = [0, 0, 0], sizes = [2, 6, 8], strides = [1, 1, 1]} : vector<2x6x32xbf16> to vector<2x6x8xbf16>
    %50 = arith.truncf %43 : vector<2x1x8xf32> to vector<2x1x8xbf16>
    "tpu.trace_start"() <{level = 10 : i32, message = "bqd,bkd->bqk"}> : () -> ()
    %cst_26 = arith.constant dense<0.000000e+00> : vector<2x1x6xf32>
    %51 = tpu.matmul %50, %48, %cst_26 {dimension_numbers = #tpu.dot_dimension_numbers<[2], [2], [1], [1], [0, 0, 0, 1, 1, 1], [0], [0]>} : vector<2x1x8xbf16>, vector<2x6x8xbf16>, vector<2x1x6xf32> -> vector<2x1x6xf32>
    "tpu.trace_stop"() : () -> ()
    %cst_27 = arith.constant 0.353553385 : f32
    %52 = vector.broadcast %cst_27 : f32 to vector<2x1x6xf32>
    %53 = arith.mulf %51, %52 : vector<2x1x6xf32>
    %54 = vector.shape_cast %41 : vector<1x6xf32> to vector<1x1x6xf32>
    %cst_28 = arith.constant 0.000000e+00 : f32
    %55 = vector.broadcast %cst_28 : f32 to vector<1x1x6xf32>
    %56 = arith.cmpf ogt, %54, %55 : vector<1x1x6xf32>
    %cst_29 = arith.constant -1.000000e+09 : f32
    %57 = vector.shape_cast %56 : vector<1x1x6xi1> to vector<1x1x6xi1>
    %58 = vector.broadcast %57 : vector<1x1x6xi1> to vector<2x1x6xi1>
    %59 = vector.broadcast %cst_29 : f32 to vector<2x1x6xf32>
    %60 = arith.select %58, %53, %59 : vector<2x1x6xi1>, vector<2x1x6xf32>
    %61 = arith.mulf %43, %45 : vector<2x1x8xf32>
    %cst_30 = arith.constant dense<0.000000e+00> : vector<2x1xf32>
    %62 = vector.multi_reduction <add>, %61, %cst_30 [2] : vector<2x1x8xf32> to vector<2x1xf32>
    %63 = vector.shape_cast %62 : vector<2x1xf32> to vector<2x1x1xf32>
    %cst_31 = arith.constant 0.353553385 : f32
    %64 = vector.broadcast %cst_31 : f32 to vector<2x1x1xf32>
    %65 = arith.mulf %63, %64 : vector<2x1x1xf32>
    %cst_32 = arith.constant dense<0xFF800000> : vector<2x1xf32>
    %66 = vector.multi_reduction <maximumf>, %60, %cst_32 [2] : vector<2x1x6xf32> to vector<2x1xf32>
    %67 = vector.shape_cast %66 : vector<2x1xf32> to vector<2x1x1xf32>
    %68 = arith.maximumf %67, %65 : vector<2x1x1xf32>
    %69 = vector.broadcast %68 : vector<2x1x1xf32> to vector<2x1x6xf32>
    %70 = arith.subf %60, %69 : vector<2x1x6xf32>
    %71 = math.exp %70 : vector<2x1x6xf32>
    %72 = arith.subf %65, %68 : vector<2x1x1xf32>
    %73 = math.exp %72 : vector<2x1x1xf32>
    %cst_33 = arith.constant dense<0.000000e+00> : vector<2x1xf32>
    %74 = vector.multi_reduction <add>, %71, %cst_33 [2] : vector<2x1x6xf32> to vector<2x1xf32>
    %75 = vector.shape_cast %74 : vector<2x1xf32> to vector<2x1x1xf32>
    %76 = arith.addf %75, %73 : vector<2x1x1xf32>
    %77 = tpu.reciprocal %76 {approx = true} : vector<2x1x1xf32> -> vector<2x1x1xf32>
    %78 = arith.truncf %71 : vector<2x1x6xf32> to vector<2x1x6xbf16>
    "tpu.trace_start"() <{level = 10 : i32, message = "bqk,bkd->bqd"}> : () -> ()
    %cst_34 = arith.constant dense<0.000000e+00> : vector<2x1x8xf32>
    %79 = tpu.matmul %78, %49, %cst_34 {dimension_numbers = #tpu.dot_dimension_numbers<[2], [1], [1], [2], [0, 0, 0, 1, 1, 2], [0], [0]>} : vector<2x1x6xbf16>, vector<2x6x8xbf16>, vector<2x1x8xf32> -> vector<2x1x8xf32>
    "tpu.trace_stop"() : () -> ()
    %80 = vector.broadcast %73 : vector<2x1x1xf32> to vector<2x1x8xf32>
    %81 = arith.mulf %80, %47 : vector<2x1x8xf32>
    %82 = arith.addf %79, %81 : vector<2x1x8xf32>
    %83 = vector.broadcast %77 : vector<2x1x1xf32> to vector<2x1x8xf32>
    %84 = arith.mulf %82, %83 : vector<2x1x8xf32>
    %85 = vector.shape_cast %84 : vector<2x1x8xf32> to vector<2x8xf32>
    %86 = vector.extract_strided_slice %32 {offsets = [0, 8], sizes = [2, 8], strides = [1, 1]} : vector<2x32xf32> to vector<2x8xf32>
    %87 = vector.shape_cast %86 : vector<2x8xf32> to vector<2x1x8xf32>
    %88 = vector.extract_strided_slice %33 {offsets = [0, 8], sizes = [2, 8], strides = [1, 1]} : vector<2x32xf32> to vector<2x8xf32>
    %89 = vector.shape_cast %88 : vector<2x8xf32> to vector<2x1x8xf32>
    %90 = vector.extract_strided_slice %34 {offsets = [0, 8], sizes = [2, 8], strides = [1, 1]} : vector<2x32xf32> to vector<2x8xf32>
    %91 = vector.shape_cast %90 : vector<2x8xf32> to vector<2x1x8xf32>
    %92 = vector.extract_strided_slice %39 {offsets = [0, 0, 8], sizes = [2, 6, 8], strides = [1, 1, 1]} : vector<2x6x32xbf16> to vector<2x6x8xbf16>
    %93 = vector.extract_strided_slice %40 {offsets = [0, 0, 8], sizes = [2, 6, 8], strides = [1, 1, 1]} : vector<2x6x32xbf16> to vector<2x6x8xbf16>
    %94 = arith.truncf %87 : vector<2x1x8xf32> to vector<2x1x8xbf16>
    "tpu.trace_start"() <{level = 10 : i32, message = "bqd,bkd->bqk"}> : () -> ()
    %cst_35 = arith.constant dense<0.000000e+00> : vector<2x1x6xf32>
    %95 = tpu.matmul %94, %92, %cst_35 {dimension_numbers = #tpu.dot_dimension_numbers<[2], [2], [1], [1], [0, 0, 0, 1, 1, 1], [0], [0]>} : vector<2x1x8xbf16>, vector<2x6x8xbf16>, vector<2x1x6xf32> -> vector<2x1x6xf32>
    "tpu.trace_stop"() : () -> ()
    %cst_36 = arith.constant 0.353553385 : f32
    %96 = vector.broadcast %cst_36 : f32 to vector<2x1x6xf32>
    %97 = arith.mulf %95, %96 : vector<2x1x6xf32>
    %98 = vector.shape_cast %41 : vector<1x6xf32> to vector<1x1x6xf32>
    %cst_37 = arith.constant 0.000000e+00 : f32
    %99 = vector.broadcast %cst_37 : f32 to vector<1x1x6xf32>
    %100 = arith.cmpf ogt, %98, %99 : vector<1x1x6xf32>
    %cst_38 = arith.constant -1.000000e+09 : f32
    %101 = vector.shape_cast %100 : vector<1x1x6xi1> to vector<1x1x6xi1>
    %102 = vector.broadcast %101 : vector<1x1x6xi1> to vector<2x1x6xi1>
    %103 = vector.broadcast %cst_38 : f32 to vector<2x1x6xf32>
    %104 = arith.select %102, %97, %103 : vector<2x1x6xi1>, vector<2x1x6xf32>
    %105 = arith.mulf %87, %89 : vector<2x1x8xf32>
    %cst_39 = arith.constant dense<0.000000e+00> : vector<2x1xf32>
    %106 = vector.multi_reduction <add>, %105, %cst_39 [2] : vector<2x1x8xf32> to vector<2x1xf32>
    %107 = vector.shape_cast %106 : vector<2x1xf32> to vector<2x1x1xf32>
    %cst_40 = arith.constant 0.353553385 : f32
    %108 = vector.broadcast %cst_40 : f32 to vector<2x1x1xf32>
    %109 = arith.mulf %107, %108 : vector<2x1x1xf32>
    %cst_41 = arith.constant dense<0xFF800000> : vector<2x1xf32>
    %110 = vector.multi_reduction <maximumf>, %104, %cst_41 [2] : vector<2x1x6xf32> to vector<2x1xf32>
    %111 = vector.shape_cast %110 : vector<2x1xf32> to vector<2x1x1xf32>
    %112 = arith.maximumf %111, %109 : vector<2x1x1xf32>
    %113 = vector.broadcast %112 : vector<2x1x1xf32> to vector<2x1x6xf32>
    %114 = arith.subf %104, %113 : vector<2x1x6xf32>
    %115 = math.exp %114 : vector<2x1x6xf32>
    %116 = arith.subf %109, %112 : vector<2x1x1xf32>
    %117 = math.exp %116 : vector<2x1x1xf32>
    %cst_42 = arith.constant dense<0.000000e+00> : vector<2x1xf32>
    %118 = vector.multi_reduction <add>, %115, %cst_42 [2] : vector<2x1x6xf32> to vector<2x1xf32>
    %119 = vector.shape_cast %118 : vector<2x1xf32> to vector<2x1x1xf32>
    %120 = arith.addf %119, %117 : vector<2x1x1xf32>
    %121 = tpu.reciprocal %120 {approx = true} : vector<2x1x1xf32> -> vector<2x1x1xf32>
    %122 = arith.truncf %115 : vector<2x1x6xf32> to vector<2x1x6xbf16>
    "tpu.trace_start"() <{level = 10 : i32, message = "bqk,bkd->bqd"}> : () -> ()
    %cst_43 = arith.constant dense<0.000000e+00> : vector<2x1x8xf32>
    %123 = tpu.matmul %122, %93, %cst_43 {dimension_numbers = #tpu.dot_dimension_numbers<[2], [1], [1], [2], [0, 0, 0, 1, 1, 2], [0], [0]>} : vector<2x1x6xbf16>, vector<2x6x8xbf16>, vector<2x1x8xf32> -> vector<2x1x8xf32>
    "tpu.trace_stop"() : () -> ()
    %124 = vector.broadcast %117 : vector<2x1x1xf32> to vector<2x1x8xf32>
    %125 = arith.mulf %124, %91 : vector<2x1x8xf32>
    %126 = arith.addf %123, %125 : vector<2x1x8xf32>
    %127 = vector.broadcast %121 : vector<2x1x1xf32> to vector<2x1x8xf32>
    %128 = arith.mulf %126, %127 : vector<2x1x8xf32>
    %129 = vector.shape_cast %128 : vector<2x1x8xf32> to vector<2x8xf32>
    %130 = vector.extract_strided_slice %32 {offsets = [0, 16], sizes = [2, 8], strides = [1, 1]} : vector<2x32xf32> to vector<2x8xf32>
    %131 = vector.shape_cast %130 : vector<2x8xf32> to vector<2x1x8xf32>
    %132 = vector.extract_strided_slice %33 {offsets = [0, 16], sizes = [2, 8], strides = [1, 1]} : vector<2x32xf32> to vector<2x8xf32>
    %133 = vector.shape_cast %132 : vector<2x8xf32> to vector<2x1x8xf32>
    %134 = vector.extract_strided_slice %34 {offsets = [0, 16], sizes = [2, 8], strides = [1, 1]} : vector<2x32xf32> to vector<2x8xf32>
    %135 = vector.shape_cast %134 : vector<2x8xf32> to vector<2x1x8xf32>
    %136 = vector.extract_strided_slice %39 {offsets = [0, 0, 16], sizes = [2, 6, 8], strides = [1, 1, 1]} : vector<2x6x32xbf16> to vector<2x6x8xbf16>
    %137 = vector.extract_strided_slice %40 {offsets = [0, 0, 16], sizes = [2, 6, 8], strides = [1, 1, 1]} : vector<2x6x32xbf16> to vector<2x6x8xbf16>
    %138 = arith.truncf %131 : vector<2x1x8xf32> to vector<2x1x8xbf16>
    "tpu.trace_start"() <{level = 10 : i32, message = "bqd,bkd->bqk"}> : () -> ()
    %cst_44 = arith.constant dense<0.000000e+00> : vector<2x1x6xf32>
    %139 = tpu.matmul %138, %136, %cst_44 {dimension_numbers = #tpu.dot_dimension_numbers<[2], [2], [1], [1], [0, 0, 0, 1, 1, 1], [0], [0]>} : vector<2x1x8xbf16>, vector<2x6x8xbf16>, vector<2x1x6xf32> -> vector<2x1x6xf32>
    "tpu.trace_stop"() : () -> ()
    %cst_45 = arith.constant 0.353553385 : f32
    %140 = vector.broadcast %cst_45 : f32 to vector<2x1x6xf32>
    %141 = arith.mulf %139, %140 : vector<2x1x6xf32>
    %142 = vector.shape_cast %41 : vector<1x6xf32> to vector<1x1x6xf32>
    %cst_46 = arith.constant 0.000000e+00 : f32
    %143 = vector.broadcast %cst_46 : f32 to vector<1x1x6xf32>
    %144 = arith.cmpf ogt, %142, %143 : vector<1x1x6xf32>
    %cst_47 = arith.constant -1.000000e+09 : f32
    %145 = vector.shape_cast %144 : vector<1x1x6xi1> to vector<1x1x6xi1>
    %146 = vector.broadcast %145 : vector<1x1x6xi1> to vector<2x1x6xi1>
    %147 = vector.broadcast %cst_47 : f32 to vector<2x1x6xf32>
    %148 = arith.select %146, %141, %147 : vector<2x1x6xi1>, vector<2x1x6xf32>
    %149 = arith.mulf %131, %133 : vector<2x1x8xf32>
    %cst_48 = arith.constant dense<0.000000e+00> : vector<2x1xf32>
    %150 = vector.multi_reduction <add>, %149, %cst_48 [2] : vector<2x1x8xf32> to vector<2x1xf32>
    %151 = vector.shape_cast %150 : vector<2x1xf32> to vector<2x1x1xf32>
    %cst_49 = arith.constant 0.353553385 : f32
    %152 = vector.broadcast %cst_49 : f32 to vector<2x1x1xf32>
    %153 = arith.mulf %151, %152 : vector<2x1x1xf32>
    %cst_50 = arith.constant dense<0xFF800000> : vector<2x1xf32>
    %154 = vector.multi_reduction <maximumf>, %148, %cst_50 [2] : vector<2x1x6xf32> to vector<2x1xf32>
    %155 = vector.shape_cast %154 : vector<2x1xf32> to vector<2x1x1xf32>
    %156 = arith.maximumf %155, %153 : vector<2x1x1xf32>
    %157 = vector.broadcast %156 : vector<2x1x1xf32> to vector<2x1x6xf32>
    %158 = arith.subf %148, %157 : vector<2x1x6xf32>
    %159 = math.exp %158 : vector<2x1x6xf32>
    %160 = arith.subf %153, %156 : vector<2x1x1xf32>
    %161 = math.exp %160 : vector<2x1x1xf32>
    %cst_51 = arith.constant dense<0.000000e+00> : vector<2x1xf32>
    %162 = vector.multi_reduction <add>, %159, %cst_51 [2] : vector<2x1x6xf32> to vector<2x1xf32>
    %163 = vector.shape_cast %162 : vector<2x1xf32> to vector<2x1x1xf32>
    %164 = arith.addf %163, %161 : vector<2x1x1xf32>
    %165 = tpu.reciprocal %164 {approx = true} : vector<2x1x1xf32> -> vector<2x1x1xf32>
    %166 = arith.truncf %159 : vector<2x1x6xf32> to vector<2x1x6xbf16>
    "tpu.trace_start"() <{level = 10 : i32, message = "bqk,bkd->bqd"}> : () -> ()
    %cst_52 = arith.constant dense<0.000000e+00> : vector<2x1x8xf32>
    %167 = tpu.matmul %166, %137, %cst_52 {dimension_numbers = #tpu.dot_dimension_numbers<[2], [1], [1], [2], [0, 0, 0, 1, 1, 2], [0], [0]>} : vector<2x1x6xbf16>, vector<2x6x8xbf16>, vector<2x1x8xf32> -> vector<2x1x8xf32>
    "tpu.trace_stop"() : () -> ()
    %168 = vector.broadcast %161 : vector<2x1x1xf32> to vector<2x1x8xf32>
    %169 = arith.mulf %168, %135 : vector<2x1x8xf32>
    %170 = arith.addf %167, %169 : vector<2x1x8xf32>
    %171 = vector.broadcast %165 : vector<2x1x1xf32> to vector<2x1x8xf32>
    %172 = arith.mulf %170, %171 : vector<2x1x8xf32>
    %173 = vector.shape_cast %172 : vector<2x1x8xf32> to vector<2x8xf32>
    %174 = vector.extract_strided_slice %32 {offsets = [0, 24], sizes = [2, 8], strides = [1, 1]} : vector<2x32xf32> to vector<2x8xf32>
    %175 = vector.shape_cast %174 : vector<2x8xf32> to vector<2x1x8xf32>
    %176 = vector.extract_strided_slice %33 {offsets = [0, 24], sizes = [2, 8], strides = [1, 1]} : vector<2x32xf32> to vector<2x8xf32>
    %177 = vector.shape_cast %176 : vector<2x8xf32> to vector<2x1x8xf32>
    %178 = vector.extract_strided_slice %34 {offsets = [0, 24], sizes = [2, 8], strides = [1, 1]} : vector<2x32xf32> to vector<2x8xf32>
    %179 = vector.shape_cast %178 : vector<2x8xf32> to vector<2x1x8xf32>
    %180 = vector.extract_strided_slice %39 {offsets = [0, 0, 24], sizes = [2, 6, 8], strides = [1, 1, 1]} : vector<2x6x32xbf16> to vector<2x6x8xbf16>
    %181 = vector.extract_strided_slice %40 {offsets = [0, 0, 24], sizes = [2, 6, 8], strides = [1, 1, 1]} : vector<2x6x32xbf16> to vector<2x6x8xbf16>
    %182 = arith.truncf %175 : vector<2x1x8xf32> to vector<2x1x8xbf16>
    "tpu.trace_start"() <{level = 10 : i32, message = "bqd,bkd->bqk"}> : () -> ()
    %cst_53 = arith.constant dense<0.000000e+00> : vector<2x1x6xf32>
    %183 = tpu.matmul %182, %180, %cst_53 {dimension_numbers = #tpu.dot_dimension_numbers<[2], [2], [1], [1], [0, 0, 0, 1, 1, 1], [0], [0]>} : vector<2x1x8xbf16>, vector<2x6x8xbf16>, vector<2x1x6xf32> -> vector<2x1x6xf32>
    "tpu.trace_stop"() : () -> ()
    %cst_54 = arith.constant 0.353553385 : f32
    %184 = vector.broadcast %cst_54 : f32 to vector<2x1x6xf32>
    %185 = arith.mulf %183, %184 : vector<2x1x6xf32>
    %186 = vector.shape_cast %41 : vector<1x6xf32> to vector<1x1x6xf32>
    %cst_55 = arith.constant 0.000000e+00 : f32
    %187 = vector.broadcast %cst_55 : f32 to vector<1x1x6xf32>
    %188 = arith.cmpf ogt, %186, %187 : vector<1x1x6xf32>
    %cst_56 = arith.constant -1.000000e+09 : f32
    %189 = vector.shape_cast %188 : vector<1x1x6xi1> to vector<1x1x6xi1>
    %190 = vector.broadcast %189 : vector<1x1x6xi1> to vector<2x1x6xi1>
    %191 = vector.broadcast %cst_56 : f32 to vector<2x1x6xf32>
    %192 = arith.select %190, %185, %191 : vector<2x1x6xi1>, vector<2x1x6xf32>
    %193 = arith.mulf %175, %177 : vector<2x1x8xf32>
    %cst_57 = arith.constant dense<0.000000e+00> : vector<2x1xf32>
    %194 = vector.multi_reduction <add>, %193, %cst_57 [2] : vector<2x1x8xf32> to vector<2x1xf32>
    %195 = vector.shape_cast %194 : vector<2x1xf32> to vector<2x1x1xf32>
    %cst_58 = arith.constant 0.353553385 : f32
    %196 = vector.broadcast %cst_58 : f32 to vector<2x1x1xf32>
    %197 = arith.mulf %195, %196 : vector<2x1x1xf32>
    %cst_59 = arith.constant dense<0xFF800000> : vector<2x1xf32>
    %198 = vector.multi_reduction <maximumf>, %192, %cst_59 [2] : vector<2x1x6xf32> to vector<2x1xf32>
    %199 = vector.shape_cast %198 : vector<2x1xf32> to vector<2x1x1xf32>
    %200 = arith.maximumf %199, %197 : vector<2x1x1xf32>
    %201 = vector.broadcast %200 : vector<2x1x1xf32> to vector<2x1x6xf32>
    %202 = arith.subf %192, %201 : vector<2x1x6xf32>
    %203 = math.exp %202 : vector<2x1x6xf32>
    %204 = arith.subf %197, %200 : vector<2x1x1xf32>
    %205 = math.exp %204 : vector<2x1x1xf32>
    %cst_60 = arith.constant dense<0.000000e+00> : vector<2x1xf32>
    %206 = vector.multi_reduction <add>, %203, %cst_60 [2] : vector<2x1x6xf32> to vector<2x1xf32>
    %207 = vector.shape_cast %206 : vector<2x1xf32> to vector<2x1x1xf32>
    %208 = arith.addf %207, %205 : vector<2x1x1xf32>
    %209 = tpu.reciprocal %208 {approx = true} : vector<2x1x1xf32> -> vector<2x1x1xf32>
    %210 = arith.truncf %203 : vector<2x1x6xf32> to vector<2x1x6xbf16>
    "tpu.trace_start"() <{level = 10 : i32, message = "bqk,bkd->bqd"}> : () -> ()
    %cst_61 = arith.constant dense<0.000000e+00> : vector<2x1x8xf32>
    %211 = tpu.matmul %210, %181, %cst_61 {dimension_numbers = #tpu.dot_dimension_numbers<[2], [1], [1], [2], [0, 0, 0, 1, 1, 2], [0], [0]>} : vector<2x1x6xbf16>, vector<2x6x8xbf16>, vector<2x1x8xf32> -> vector<2x1x8xf32>
    "tpu.trace_stop"() : () -> ()
    %212 = vector.broadcast %205 : vector<2x1x1xf32> to vector<2x1x8xf32>
    %213 = arith.mulf %212, %179 : vector<2x1x8xf32>
    %214 = arith.addf %211, %213 : vector<2x1x8xf32>
    %215 = vector.broadcast %209 : vector<2x1x1xf32> to vector<2x1x8xf32>
    %216 = arith.mulf %214, %215 : vector<2x1x8xf32>
    %217 = vector.shape_cast %216 : vector<2x1x8xf32> to vector<2x8xf32>
    %218 = tpu.concatenate %85, %129, %173, %217 in 1 : vector<2x8xf32>, vector<2x8xf32>, vector<2x8xf32>, vector<2x8xf32> -> vector<2x32xf32>
    %219 = arith.truncf %218 : vector<2x32xf32> to vector<2x32xbf16>
    %c0_62 = arith.constant 0 : index
    %c0_63 = arith.constant 0 : index
    %220 = vector.load %arg8[%c0_62, %c0_63] : memref<32x32xbf16, #tpu.memory_space<vmem>>, vector<32x32xbf16>
    %cst_64 = arith.constant dense<0.000000e+00> : vector<2x32xf32>
    %221 = tpu.matmul %219, %220, %cst_64 {dimension_numbers = #tpu.dot_dimension_numbers<[1], [0], [0], [1], [0, 0, 1, 1], [], []>} : vector<2x32xbf16>, vector<32x32xbf16>, vector<2x32xf32> -> vector<2x32xf32>
    %c0_65 = arith.constant 0 : index
    %c0_66 = arith.constant 0 : index
    %222 = vector.load %arg9[%c0_65, %c0_66] : memref<1x32xf32, #tpu.memory_space<vmem>>, vector<1x32xf32>
    %223 = vector.broadcast %222 : vector<1x32xf32> to vector<2x32xf32>
    %224 = arith.addf %221, %223 : vector<2x32xf32>
    %225 = arith.addf %1, %224 : vector<2x32xf32>
    %226 = arith.truncf %225 : vector<2x32xf32> to vector<2x32xbf16>
    %c0_67 = arith.constant 0 : index
    %c0_68 = arith.constant 0 : index
    %227 = vector.load %arg10[%c0_67, %c0_68] : memref<2x32xbf16, #tpu.memory_space<vmem>>, vector<2x32xbf16>
    tpu.vector_store %arg10[%c0_67, %c0_68], %226 {strides = array<i32>} : memref<2x32xbf16, #tpu.memory_space<vmem>>, vector<2x32xbf16>,
    return
  }
}

module attributes {stable_mosaic.version = 11 : i64} {
  func.func @_decode_cross_ffn_kernel(%arg0: memref<2x32xbf16, #tpu.memory_space<vmem>>, %arg1: memref<2x8x64xbf16, #tpu.memory_space<vmem>>, %arg2: memref<2x1x8xf32, #tpu.memory_space<vmem>>, %arg3: memref<1x32xf32, #tpu.memory_space<vmem>>, %arg4: memref<1x32xf32, #tpu.memory_space<vmem>>, %arg5: memref<32x32xbf16, #tpu.memory_space<vmem>>, %arg6: memref<1x32xf32, #tpu.memory_space<vmem>>, %arg7: memref<32x32xbf16, #tpu.memory_space<vmem>>, %arg8: memref<1x32xf32, #tpu.memory_space<vmem>>, %arg9: memref<1x32xf32, #tpu.memory_space<vmem>>, %arg10: memref<1x32xf32, #tpu.memory_space<vmem>>, %arg11: memref<32x64xbf16, #tpu.memory_space<vmem>>, %arg12: memref<1x64xf32, #tpu.memory_space<vmem>>, %arg13: memref<64x32xbf16, #tpu.memory_space<vmem>>, %arg14: memref<1x32xf32, #tpu.memory_space<vmem>>, %arg15: memref<2x32xbf16, #tpu.memory_space<vmem>>) attributes {dimension_semantics = [], scalar_prefetch = 0 : i64, scratch_operands = 0 : i64, tpu.core_type = #tpu.core_type<tc>} {
    %c0 = arith.constant 0 : index
    %c0_0 = arith.constant 0 : index
    %0 = vector.load %arg0[%c0, %c0_0] : memref<2x32xbf16, #tpu.memory_space<vmem>>, vector<2x32xbf16>
    %1 = arith.extf %0 : vector<2x32xbf16> to vector<2x32xf32>
    %c0_1 = arith.constant 0 : index
    %c0_2 = arith.constant 0 : index
    %2 = vector.load %arg3[%c0_1, %c0_2] : memref<1x32xf32, #tpu.memory_space<vmem>>, vector<1x32xf32>
    %c0_3 = arith.constant 0 : index
    %c0_4 = arith.constant 0 : index
    %3 = vector.load %arg4[%c0_3, %c0_4] : memref<1x32xf32, #tpu.memory_space<vmem>>, vector<1x32xf32>
    %cst = arith.constant dense<0.000000e+00> : vector<2xf32>
    %4 = vector.multi_reduction <add>, %1, %cst [1] : vector<2x32xf32> to vector<2xf32>
    %5 = vector.shape_cast %4 : vector<2xf32> to vector<2x1xf32>
    %cst_5 = arith.constant 3.200000e+01 : f32
    %6 = vector.broadcast %cst_5 : f32 to vector<2x1xf32>
    %7 = arith.divf %5, %6 : vector<2x1xf32>
    %8 = vector.broadcast %7 : vector<2x1xf32> to vector<2x32xf32>
    %9 = arith.subf %1, %8 : vector<2x32xf32>
    %10 = arith.mulf %9, %9 : vector<2x32xf32>
    %cst_6 = arith.constant dense<0.000000e+00> : vector<2xf32>
    %11 = vector.multi_reduction <add>, %10, %cst_6 [1] : vector<2x32xf32> to vector<2xf32>
    %12 = vector.shape_cast %11 : vector<2xf32> to vector<2x1xf32>
    %cst_7 = arith.constant 3.100000e+01 : f32
    %13 = vector.broadcast %cst_7 : f32 to vector<2x1xf32>
    %14 = arith.divf %12, %13 : vector<2x1xf32>
    %15 = vector.broadcast %7 : vector<2x1xf32> to vector<2x32xf32>
    %16 = arith.subf %1, %15 : vector<2x32xf32>
    %17 = vector.broadcast %2 : vector<1x32xf32> to vector<2x32xf32>
    %18 = arith.mulf %17, %16 : vector<2x32xf32>
    %19 = math.sqrt %14 : vector<2x1xf32>
    %cst_8 = arith.constant 9.99999997E-7 : f32
    %20 = vector.broadcast %cst_8 : f32 to vector<2x1xf32>
    %21 = arith.addf %19, %20 : vector<2x1xf32>
    %22 = vector.broadcast %21 : vector<2x1xf32> to vector<2x32xf32>
    %23 = arith.divf %18, %22 : vector<2x32xf32>
    %24 = vector.broadcast %3 : vector<1x32xf32> to vector<2x32xf32>
    %25 = arith.addf %23, %24 : vector<2x32xf32>
    %26 = arith.truncf %25 : vector<2x32xf32> to vector<2x32xbf16>
    %c0_9 = arith.constant 0 : index
    %c0_10 = arith.constant 0 : index
    %27 = vector.load %arg5[%c0_9, %c0_10] : memref<32x32xbf16, #tpu.memory_space<vmem>>, vector<32x32xbf16>
    %cst_11 = arith.constant dense<0.000000e+00> : vector<2x32xf32>
    %28 = tpu.matmul %26, %27, %cst_11 {dimension_numbers = #tpu.dot_dimension_numbers<[1], [0], [0], [1], [0, 0, 1, 1], [], []>} : vector<2x32xbf16>, vector<32x32xbf16>, vector<2x32xf32> -> vector<2x32xf32>
    %c0_12 = arith.constant 0 : index
    %c0_13 = arith.constant 0 : index
    %29 = vector.load %arg6[%c0_12, %c0_13] : memref<1x32xf32, #tpu.memory_space<vmem>>, vector<1x32xf32>
    %30 = vector.broadcast %29 : vector<1x32xf32> to vector<2x32xf32>
    %31 = arith.addf %28, %30 : vector<2x32xf32>
    %c0_14 = arith.constant 0 : index
    %c0_15 = arith.constant 0 : index
    %c0_16 = arith.constant 0 : index
    %32 = vector.load %arg1[%c0_14, %c0_15, %c0_16] : memref<2x8x64xbf16, #tpu.memory_space<vmem>>, vector<2x8x64xbf16>
    %c0_17 = arith.constant 0 : index
    %c0_18 = arith.constant 0 : index
    %c0_19 = arith.constant 0 : index
    %33 = vector.load %arg2[%c0_17, %c0_18, %c0_19] : memref<2x1x8xf32, #tpu.memory_space<vmem>>, vector<2x1x8xf32>
    %34 = vector.extract_strided_slice %31 {offsets = [0, 0], sizes = [2, 8], strides = [1, 1]} : vector<2x32xf32> to vector<2x8xf32>
    %35 = vector.shape_cast %34 : vector<2x8xf32> to vector<2x1x8xf32>
    %36 = arith.truncf %35 : vector<2x1x8xf32> to vector<2x1x8xbf16>
    %37 = vector.extract_strided_slice %32 {offsets = [0, 0, 0], sizes = [2, 8, 8], strides = [1, 1, 1]} : vector<2x8x64xbf16> to vector<2x8x8xbf16>
    %38 = vector.extract_strided_slice %32 {offsets = [0, 0, 32], sizes = [2, 8, 8], strides = [1, 1, 1]} : vector<2x8x64xbf16> to vector<2x8x8xbf16>
    "tpu.trace_start"() <{level = 10 : i32, message = "bqd,bkd->bqk"}> : () -> ()
    %cst_20 = arith.constant dense<0.000000e+00> : vector<2x1x8xf32>
    %39 = tpu.matmul %36, %37, %cst_20 {dimension_numbers = #tpu.dot_dimension_numbers<[2], [2], [1], [1], [0, 0, 0, 1, 1, 1], [0], [0]>} : vector<2x1x8xbf16>, vector<2x8x8xbf16>, vector<2x1x8xf32> -> vector<2x1x8xf32>
    "tpu.trace_stop"() : () -> ()
    %cst_21 = arith.constant 0.353553385 : f32
    %40 = vector.broadcast %cst_21 : f32 to vector<2x1x8xf32>
    %41 = arith.mulf %39, %40 : vector<2x1x8xf32>
    %cst_22 = arith.constant 0.000000e+00 : f32
    %42 = vector.broadcast %cst_22 : f32 to vector<2x1x8xf32>
    %43 = arith.cmpf ogt, %33, %42 : vector<2x1x8xf32>
    %cst_23 = arith.constant -1.000000e+09 : f32
    %44 = vector.broadcast %cst_23 : f32 to vector<2x1x8xf32>
    %45 = arith.select %43, %41, %44 : vector<2x1x8xi1>, vector<2x1x8xf32>
    %cst_24 = arith.constant dense<0xFF800000> : vector<2x1xf32>
    %46 = vector.multi_reduction <maximumf>, %45, %cst_24 [2] : vector<2x1x8xf32> to vector<2x1xf32>
    %47 = vector.shape_cast %46 : vector<2x1xf32> to vector<2x1x1xf32>
    %48 = vector.broadcast %47 : vector<2x1x1xf32> to vector<2x1x8xf32>
    %49 = arith.subf %45, %48 : vector<2x1x8xf32>
    %50 = math.exp %49 : vector<2x1x8xf32>
    %cst_25 = arith.constant dense<0.000000e+00> : vector<2x1xf32>
    %51 = vector.multi_reduction <add>, %50, %cst_25 [2] : vector<2x1x8xf32> to vector<2x1xf32>
    %52 = vector.shape_cast %51 : vector<2x1xf32> to vector<2x1x1xf32>
    %53 = tpu.reciprocal %52 {approx = true} : vector<2x1x1xf32> -> vector<2x1x1xf32>
    %54 = vector.broadcast %53 : vector<2x1x1xf32> to vector<2x1x8xf32>
    %55 = arith.mulf %50, %54 : vector<2x1x8xf32>
    %56 = arith.truncf %55 : vector<2x1x8xf32> to vector<2x1x8xbf16>
    "tpu.trace_start"() <{level = 10 : i32, message = "bqk,bkd->bqd"}> : () -> ()
    %cst_26 = arith.constant dense<0.000000e+00> : vector<2x1x8xf32>
    %57 = tpu.matmul %56, %38, %cst_26 {dimension_numbers = #tpu.dot_dimension_numbers<[2], [1], [1], [2], [0, 0, 0, 1, 1, 2], [0], [0]>} : vector<2x1x8xbf16>, vector<2x8x8xbf16>, vector<2x1x8xf32> -> vector<2x1x8xf32>
    "tpu.trace_stop"() : () -> ()
    %58 = vector.shape_cast %57 : vector<2x1x8xf32> to vector<2x8xf32>
    %59 = vector.extract_strided_slice %31 {offsets = [0, 8], sizes = [2, 8], strides = [1, 1]} : vector<2x32xf32> to vector<2x8xf32>
    %60 = vector.shape_cast %59 : vector<2x8xf32> to vector<2x1x8xf32>
    %61 = arith.truncf %60 : vector<2x1x8xf32> to vector<2x1x8xbf16>
    %62 = vector.extract_strided_slice %32 {offsets = [0, 0, 8], sizes = [2, 8, 8], strides = [1, 1, 1]} : vector<2x8x64xbf16> to vector<2x8x8xbf16>
    %63 = vector.extract_strided_slice %32 {offsets = [0, 0, 40], sizes = [2, 8, 8], strides = [1, 1, 1]} : vector<2x8x64xbf16> to vector<2x8x8xbf16>
    "tpu.trace_start"() <{level = 10 : i32, message = "bqd,bkd->bqk"}> : () -> ()
    %cst_27 = arith.constant dense<0.000000e+00> : vector<2x1x8xf32>
    %64 = tpu.matmul %61, %62, %cst_27 {dimension_numbers = #tpu.dot_dimension_numbers<[2], [2], [1], [1], [0, 0, 0, 1, 1, 1], [0], [0]>} : vector<2x1x8xbf16>, vector<2x8x8xbf16>, vector<2x1x8xf32> -> vector<2x1x8xf32>
    "tpu.trace_stop"() : () -> ()
    %cst_28 = arith.constant 0.353553385 : f32
    %65 = vector.broadcast %cst_28 : f32 to vector<2x1x8xf32>
    %66 = arith.mulf %64, %65 : vector<2x1x8xf32>
    %cst_29 = arith.constant 0.000000e+00 : f32
    %67 = vector.broadcast %cst_29 : f32 to vector<2x1x8xf32>
    %68 = arith.cmpf ogt, %33, %67 : vector<2x1x8xf32>
    %cst_30 = arith.constant -1.000000e+09 : f32
    %69 = vector.broadcast %cst_30 : f32 to vector<2x1x8xf32>
    %70 = arith.select %68, %66, %69 : vector<2x1x8xi1>, vector<2x1x8xf32>
    %cst_31 = arith.constant dense<0xFF800000> : vector<2x1xf32>
    %71 = vector.multi_reduction <maximumf>, %70, %cst_31 [2] : vector<2x1x8xf32> to vector<2x1xf32>
    %72 = vector.shape_cast %71 : vector<2x1xf32> to vector<2x1x1xf32>
    %73 = vector.broadcast %72 : vector<2x1x1xf32> to vector<2x1x8xf32>
    %74 = arith.subf %70, %73 : vector<2x1x8xf32>
    %75 = math.exp %74 : vector<2x1x8xf32>
    %cst_32 = arith.constant dense<0.000000e+00> : vector<2x1xf32>
    %76 = vector.multi_reduction <add>, %75, %cst_32 [2] : vector<2x1x8xf32> to vector<2x1xf32>
    %77 = vector.shape_cast %76 : vector<2x1xf32> to vector<2x1x1xf32>
    %78 = tpu.reciprocal %77 {approx = true} : vector<2x1x1xf32> -> vector<2x1x1xf32>
    %79 = vector.broadcast %78 : vector<2x1x1xf32> to vector<2x1x8xf32>
    %80 = arith.mulf %75, %79 : vector<2x1x8xf32>
    %81 = arith.truncf %80 : vector<2x1x8xf32> to vector<2x1x8xbf16>
    "tpu.trace_start"() <{level = 10 : i32, message = "bqk,bkd->bqd"}> : () -> ()
    %cst_33 = arith.constant dense<0.000000e+00> : vector<2x1x8xf32>
    %82 = tpu.matmul %81, %63, %cst_33 {dimension_numbers = #tpu.dot_dimension_numbers<[2], [1], [1], [2], [0, 0, 0, 1, 1, 2], [0], [0]>} : vector<2x1x8xbf16>, vector<2x8x8xbf16>, vector<2x1x8xf32> -> vector<2x1x8xf32>
    "tpu.trace_stop"() : () -> ()
    %83 = vector.shape_cast %82 : vector<2x1x8xf32> to vector<2x8xf32>
    %84 = vector.extract_strided_slice %31 {offsets = [0, 16], sizes = [2, 8], strides = [1, 1]} : vector<2x32xf32> to vector<2x8xf32>
    %85 = vector.shape_cast %84 : vector<2x8xf32> to vector<2x1x8xf32>
    %86 = arith.truncf %85 : vector<2x1x8xf32> to vector<2x1x8xbf16>
    %87 = vector.extract_strided_slice %32 {offsets = [0, 0, 16], sizes = [2, 8, 8], strides = [1, 1, 1]} : vector<2x8x64xbf16> to vector<2x8x8xbf16>
    %88 = vector.extract_strided_slice %32 {offsets = [0, 0, 48], sizes = [2, 8, 8], strides = [1, 1, 1]} : vector<2x8x64xbf16> to vector<2x8x8xbf16>
    "tpu.trace_start"() <{level = 10 : i32, message = "bqd,bkd->bqk"}> : () -> ()
    %cst_34 = arith.constant dense<0.000000e+00> : vector<2x1x8xf32>
    %89 = tpu.matmul %86, %87, %cst_34 {dimension_numbers = #tpu.dot_dimension_numbers<[2], [2], [1], [1], [0, 0, 0, 1, 1, 1], [0], [0]>} : vector<2x1x8xbf16>, vector<2x8x8xbf16>, vector<2x1x8xf32> -> vector<2x1x8xf32>
    "tpu.trace_stop"() : () -> ()
    %cst_35 = arith.constant 0.353553385 : f32
    %90 = vector.broadcast %cst_35 : f32 to vector<2x1x8xf32>
    %91 = arith.mulf %89, %90 : vector<2x1x8xf32>
    %cst_36 = arith.constant 0.000000e+00 : f32
    %92 = vector.broadcast %cst_36 : f32 to vector<2x1x8xf32>
    %93 = arith.cmpf ogt, %33, %92 : vector<2x1x8xf32>
    %cst_37 = arith.constant -1.000000e+09 : f32
    %94 = vector.broadcast %cst_37 : f32 to vector<2x1x8xf32>
    %95 = arith.select %93, %91, %94 : vector<2x1x8xi1>, vector<2x1x8xf32>
    %cst_38 = arith.constant dense<0xFF800000> : vector<2x1xf32>
    %96 = vector.multi_reduction <maximumf>, %95, %cst_38 [2] : vector<2x1x8xf32> to vector<2x1xf32>
    %97 = vector.shape_cast %96 : vector<2x1xf32> to vector<2x1x1xf32>
    %98 = vector.broadcast %97 : vector<2x1x1xf32> to vector<2x1x8xf32>
    %99 = arith.subf %95, %98 : vector<2x1x8xf32>
    %100 = math.exp %99 : vector<2x1x8xf32>
    %cst_39 = arith.constant dense<0.000000e+00> : vector<2x1xf32>
    %101 = vector.multi_reduction <add>, %100, %cst_39 [2] : vector<2x1x8xf32> to vector<2x1xf32>
    %102 = vector.shape_cast %101 : vector<2x1xf32> to vector<2x1x1xf32>
    %103 = tpu.reciprocal %102 {approx = true} : vector<2x1x1xf32> -> vector<2x1x1xf32>
    %104 = vector.broadcast %103 : vector<2x1x1xf32> to vector<2x1x8xf32>
    %105 = arith.mulf %100, %104 : vector<2x1x8xf32>
    %106 = arith.truncf %105 : vector<2x1x8xf32> to vector<2x1x8xbf16>
    "tpu.trace_start"() <{level = 10 : i32, message = "bqk,bkd->bqd"}> : () -> ()
    %cst_40 = arith.constant dense<0.000000e+00> : vector<2x1x8xf32>
    %107 = tpu.matmul %106, %88, %cst_40 {dimension_numbers = #tpu.dot_dimension_numbers<[2], [1], [1], [2], [0, 0, 0, 1, 1, 2], [0], [0]>} : vector<2x1x8xbf16>, vector<2x8x8xbf16>, vector<2x1x8xf32> -> vector<2x1x8xf32>
    "tpu.trace_stop"() : () -> ()
    %108 = vector.shape_cast %107 : vector<2x1x8xf32> to vector<2x8xf32>
    %109 = vector.extract_strided_slice %31 {offsets = [0, 24], sizes = [2, 8], strides = [1, 1]} : vector<2x32xf32> to vector<2x8xf32>
    %110 = vector.shape_cast %109 : vector<2x8xf32> to vector<2x1x8xf32>
    %111 = arith.truncf %110 : vector<2x1x8xf32> to vector<2x1x8xbf16>
    %112 = vector.extract_strided_slice %32 {offsets = [0, 0, 24], sizes = [2, 8, 8], strides = [1, 1, 1]} : vector<2x8x64xbf16> to vector<2x8x8xbf16>
    %113 = vector.extract_strided_slice %32 {offsets = [0, 0, 56], sizes = [2, 8, 8], strides = [1, 1, 1]} : vector<2x8x64xbf16> to vector<2x8x8xbf16>
    "tpu.trace_start"() <{level = 10 : i32, message = "bqd,bkd->bqk"}> : () -> ()
    %cst_41 = arith.constant dense<0.000000e+00> : vector<2x1x8xf32>
    %114 = tpu.matmul %111, %112, %cst_41 {dimension_numbers = #tpu.dot_dimension_numbers<[2], [2], [1], [1], [0, 0, 0, 1, 1, 1], [0], [0]>} : vector<2x1x8xbf16>, vector<2x8x8xbf16>, vector<2x1x8xf32> -> vector<2x1x8xf32>
    "tpu.trace_stop"() : () -> ()
    %cst_42 = arith.constant 0.353553385 : f32
    %115 = vector.broadcast %cst_42 : f32 to vector<2x1x8xf32>
    %116 = arith.mulf %114, %115 : vector<2x1x8xf32>
    %cst_43 = arith.constant 0.000000e+00 : f32
    %117 = vector.broadcast %cst_43 : f32 to vector<2x1x8xf32>
    %118 = arith.cmpf ogt, %33, %117 : vector<2x1x8xf32>
    %cst_44 = arith.constant -1.000000e+09 : f32
    %119 = vector.broadcast %cst_44 : f32 to vector<2x1x8xf32>
    %120 = arith.select %118, %116, %119 : vector<2x1x8xi1>, vector<2x1x8xf32>
    %cst_45 = arith.constant dense<0xFF800000> : vector<2x1xf32>
    %121 = vector.multi_reduction <maximumf>, %120, %cst_45 [2] : vector<2x1x8xf32> to vector<2x1xf32>
    %122 = vector.shape_cast %121 : vector<2x1xf32> to vector<2x1x1xf32>
    %123 = vector.broadcast %122 : vector<2x1x1xf32> to vector<2x1x8xf32>
    %124 = arith.subf %120, %123 : vector<2x1x8xf32>
    %125 = math.exp %124 : vector<2x1x8xf32>
    %cst_46 = arith.constant dense<0.000000e+00> : vector<2x1xf32>
    %126 = vector.multi_reduction <add>, %125, %cst_46 [2] : vector<2x1x8xf32> to vector<2x1xf32>
    %127 = vector.shape_cast %126 : vector<2x1xf32> to vector<2x1x1xf32>
    %128 = tpu.reciprocal %127 {approx = true} : vector<2x1x1xf32> -> vector<2x1x1xf32>
    %129 = vector.broadcast %128 : vector<2x1x1xf32> to vector<2x1x8xf32>
    %130 = arith.mulf %125, %129 : vector<2x1x8xf32>
    %131 = arith.truncf %130 : vector<2x1x8xf32> to vector<2x1x8xbf16>
    "tpu.trace_start"() <{level = 10 : i32, message = "bqk,bkd->bqd"}> : () -> ()
    %cst_47 = arith.constant dense<0.000000e+00> : vector<2x1x8xf32>
    %132 = tpu.matmul %131, %113, %cst_47 {dimension_numbers = #tpu.dot_dimension_numbers<[2], [1], [1], [2], [0, 0, 0, 1, 1, 2], [0], [0]>} : vector<2x1x8xbf16>, vector<2x8x8xbf16>, vector<2x1x8xf32> -> vector<2x1x8xf32>
    "tpu.trace_stop"() : () -> ()
    %133 = vector.shape_cast %132 : vector<2x1x8xf32> to vector<2x8xf32>
    %134 = tpu.concatenate %58, %83, %108, %133 in 1 : vector<2x8xf32>, vector<2x8xf32>, vector<2x8xf32>, vector<2x8xf32> -> vector<2x32xf32>
    %135 = arith.truncf %134 : vector<2x32xf32> to vector<2x32xbf16>
    %c0_48 = arith.constant 0 : index
    %c0_49 = arith.constant 0 : index
    %136 = vector.load %arg7[%c0_48, %c0_49] : memref<32x32xbf16, #tpu.memory_space<vmem>>, vector<32x32xbf16>
    %cst_50 = arith.constant dense<0.000000e+00> : vector<2x32xf32>
    %137 = tpu.matmul %135, %136, %cst_50 {dimension_numbers = #tpu.dot_dimension_numbers<[1], [0], [0], [1], [0, 0, 1, 1], [], []>} : vector<2x32xbf16>, vector<32x32xbf16>, vector<2x32xf32> -> vector<2x32xf32>
    %138 = arith.addf %1, %137 : vector<2x32xf32>
    %c0_51 = arith.constant 0 : index
    %c0_52 = arith.constant 0 : index
    %139 = vector.load %arg8[%c0_51, %c0_52] : memref<1x32xf32, #tpu.memory_space<vmem>>, vector<1x32xf32>
    %140 = vector.broadcast %139 : vector<1x32xf32> to vector<2x32xf32>
    %141 = arith.addf %138, %140 : vector<2x32xf32>
    %c0_53 = arith.constant 0 : index
    %c0_54 = arith.constant 0 : index
    %142 = vector.load %arg9[%c0_53, %c0_54] : memref<1x32xf32, #tpu.memory_space<vmem>>, vector<1x32xf32>
    %c0_55 = arith.constant 0 : index
    %c0_56 = arith.constant 0 : index
    %143 = vector.load %arg10[%c0_55, %c0_56] : memref<1x32xf32, #tpu.memory_space<vmem>>, vector<1x32xf32>
    %cst_57 = arith.constant dense<0.000000e+00> : vector<2xf32>
    %144 = vector.multi_reduction <add>, %141, %cst_57 [1] : vector<2x32xf32> to vector<2xf32>
    %145 = vector.shape_cast %144 : vector<2xf32> to vector<2x1xf32>
    %cst_58 = arith.constant 3.200000e+01 : f32
    %146 = vector.broadcast %cst_58 : f32 to vector<2x1xf32>
    %147 = arith.divf %145, %146 : vector<2x1xf32>
    %148 = vector.broadcast %147 : vector<2x1xf32> to vector<2x32xf32>
    %149 = arith.subf %141, %148 : vector<2x32xf32>
    %150 = arith.mulf %149, %149 : vector<2x32xf32>
    %cst_59 = arith.constant dense<0.000000e+00> : vector<2xf32>
    %151 = vector.multi_reduction <add>, %150, %cst_59 [1] : vector<2x32xf32> to vector<2xf32>
    %152 = vector.shape_cast %151 : vector<2xf32> to vector<2x1xf32>
    %cst_60 = arith.constant 3.100000e+01 : f32
    %153 = vector.broadcast %cst_60 : f32 to vector<2x1xf32>
    %154 = arith.divf %152, %153 : vector<2x1xf32>
    %155 = vector.broadcast %147 : vector<2x1xf32> to vector<2x32xf32>
    %156 = arith.subf %141, %155 : vector<2x32xf32>
    %157 = vector.broadcast %142 : vector<1x32xf32> to vector<2x32xf32>
    %158 = arith.mulf %157, %156 : vector<2x32xf32>
    %159 = math.sqrt %154 : vector<2x1xf32>
    %cst_61 = arith.constant 9.99999997E-7 : f32
    %160 = vector.broadcast %cst_61 : f32 to vector<2x1xf32>
    %161 = arith.addf %159, %160 : vector<2x1xf32>
    %162 = vector.broadcast %161 : vector<2x1xf32> to vector<2x32xf32>
    %163 = arith.divf %158, %162 : vector<2x32xf32>
    %164 = vector.broadcast %143 : vector<1x32xf32> to vector<2x32xf32>
    %165 = arith.addf %163, %164 : vector<2x32xf32>
    %166 = arith.truncf %165 : vector<2x32xf32> to vector<2x32xbf16>
    %c0_62 = arith.constant 0 : index
    %c0_63 = arith.constant 0 : index
    %167 = vector.load %arg11[%c0_62, %c0_63] : memref<32x64xbf16, #tpu.memory_space<vmem>>, vector<32x64xbf16>
    %cst_64 = arith.constant dense<0.000000e+00> : vector<2x64xf32>
    %168 = tpu.matmul %166, %167, %cst_64 {dimension_numbers = #tpu.dot_dimension_numbers<[1], [0], [0], [1], [0, 0, 1, 1], [], []>} : vector<2x32xbf16>, vector<32x64xbf16>, vector<2x64xf32> -> vector<2x64xf32>
    %c0_65 = arith.constant 0 : index
    %c0_66 = arith.constant 0 : index
    %169 = vector.load %arg12[%c0_65, %c0_66] : memref<1x64xf32, #tpu.memory_space<vmem>>, vector<1x64xf32>
    %170 = vector.broadcast %169 : vector<1x64xf32> to vector<2x64xf32>
    %171 = arith.addf %168, %170 : vector<2x64xf32>
    %cst_67 = arith.constant 0.000000e+00 : f32
    %172 = vector.broadcast %cst_67 : f32 to vector<2x64xf32>
    %173 = arith.maximumf %171, %172 : vector<2x64xf32>
    %174 = arith.truncf %173 : vector<2x64xf32> to vector<2x64xbf16>
    %c0_68 = arith.constant 0 : index
    %c0_69 = arith.constant 0 : index
    %175 = vector.load %arg13[%c0_68, %c0_69] : memref<64x32xbf16, #tpu.memory_space<vmem>>, vector<64x32xbf16>
    %cst_70 = arith.constant dense<0.000000e+00> : vector<2x32xf32>
    %176 = tpu.matmul %174, %175, %cst_70 {dimension_numbers = #tpu.dot_dimension_numbers<[1], [0], [0], [1], [0, 0, 1, 1], [], []>} : vector<2x64xbf16>, vector<64x32xbf16>, vector<2x32xf32> -> vector<2x32xf32>
    %c0_71 = arith.constant 0 : index
    %c0_72 = arith.constant 0 : index
    %177 = vector.load %arg14[%c0_71, %c0_72] : memref<1x32xf32, #tpu.memory_space<vmem>>, vector<1x32xf32>
    %178 = vector.broadcast %177 : vector<1x32xf32> to vector<2x32xf32>
    %179 = arith.addf %176, %178 : vector<2x32xf32>
    %180 = arith.addf %141, %179 : vector<2x32xf32>
    %181 = arith.truncf %180 : vector<2x32xf32> to vector<2x32xbf16>
    %c0_73 = arith.constant 0 : index
    %c0_74 = arith.constant 0 : index
    %182 = vector.load %arg15[%c0_73, %c0_74] : memref<2x32xbf16, #tpu.memory_space<vmem>>, vector<2x32xbf16>
    tpu.vector_store %arg15[%c0_73, %c0_74], %181 {strides = array<i32>} : memref<2x32xbf16, #tpu.memory_space<vmem>>, vector<2x32xbf16>,
    return
  }
}

</mosaic_0001>

<bundles_post_ra>
// kernel: custom-call.4
= control target key start
LH: loop header
LB: loop body
LE: loop exit
PB: predicated region body
PF: predicated region fallthrough
CT: control target
= control target key end

     0   :  { %s6_s0 = inlined_call_operand.hbm [shape: f32[2,6,16], index: 0, kind: output, shape index: {}]  }

// kernel: translator_forward.13
= control target key start
LH: loop header
LB: loop body
LE: loop exit
PB: predicated region body
PF: predicated region fallthrough
CT: control target
= control target key end

     0   :  { %v143_v0 = vmov 0.0   ;;  %vm144_vm0 = vmmov 0   ;;  %vm48_vm1 = vcmask 261120   ;;  %vm107_vm2 = vcmask 257024   ;;  %s191_s2 = inlined_call_operand.vmem [shape: bf16[32,32], index: 2, kind: input, shape index: {}]   ;;  %s192_s0 = inlined_call_operand.vmem [shape: bf16[16,32], index: 0, kind: input, shape index: {}]   ;;  %s193_s1 = inlined_call_operand.vmem [shape: bf16[16,32], index: 1, kind: input, shape index: {}]   ;;  %s194_s3 = inlined_call_operand.vmem [shape: f32[1,32], index: 3, kind: input, shape index: {}]   ;;  %s195_s4 = inlined_call_operand.vmem [shape: bf16[16,32], index: 4, kind: output, shape index: {}]  }
   0x1   :  { %130 = vmatprep.subr.bf16.mxu0 %v143_v0  ;;  %v140_v1 = vld [vmem:[%s191_s2 + $0x8] sm:$0xff]   ;;  %134 = vmatprep.mubr.msk.bf16.mxu0 %vm144_vm0, %v143_v0  ;;  %v141_v2 = vld [vmem:[%s191_s2] sm:$0xff]  }
   0x2   :  { %131 = vmatpush3.bf16.msra.mxu0 %v140_v1  ;;  %v142_v3 = vld [vmem:[%s192_s0] sm:$0xff]  }
   0x3   :  { %132 = vmatprep.subr.bf16.mxu0 %v143_v0  ;;  %v124_v4 = vld [vmem:[%s193_s1] sm:$0xff]  }
   0x4   :  { %v114_v5 = vld [vmem:[%s194_s3] ss:$0 sm:$0xff]  ;;  %v125_v6 = vunpack.c.l.bf16 %v124_v4  ;;  %v126_v11 = vunpack.c.h.bf16 %v124_v4 }
   0x6   :  { %133 = vmatpush3.bf16.msra.mxu0 %v141_v2 }
   0x9   :  { %135 = vmatmul.mubr.msk.bf16.vlgmr.msra.gmra.mxu0 %vm48_vm1, %v142_v3 }
  0xc9   :  { %v86_v7 = vpop.f32.mrf.mxu0 }
  0xca   :  { %v87_v8 = vadd.f32 %v114_v5, %v86_v7 }
  0xcb   :  { %v136_v9 = vpop.f32.mrf.mxu0 }
  0xcc   :  { %v97_v10 = vadd.f32 %v125_v6, %v87_v8 }
  0xcd   :  { %v89_v12 = vpop.f32.mrf.mxu0 }
  0xce   :  { %v121_v13 = vpack.c.bf16 %v97_v10, %v97_v10  ;;  %v90_v14 = vadd.f32 %v114_v5, %v89_v12 }
  0xcf   :  { %v137_v15 = vpop.f32.mrf.mxu0 }
  0xd0   :  { %108 = vst.msk [vmem:[%s195_s4] sm:$0xf] %vm107_vm2, %v121_v13  ;;  %v98_v16 = vadd.f32 %v126_v11, %v90_v14 }
  0xd2   :  { %v122_v17 = vpack.c.bf16 %v98_v16, %v98_v16 }
  0xd4   :  { %109 = vst.msk [vmem:[%s195_s4 + $0x4] sm:$0xf] %vm107_vm2, %v122_v17 }

// kernel: translator_forward.11
= control target key start
LH: loop header
LB: loop body
LE: loop exit
PB: predicated region body
PF: predicated region fallthrough
CT: control target
= control target key end

     0   :  { %vm27_vm0 = vcmask 261120   ;;  %v206_v15 = vmov 0.0   ;;  %vm207_vm1 = vmmov 0   ;;  %vm162_vm6 = vcmask 781312   ;;  %s267_s0 = inlined_call_operand.vmem [shape: bf16[16,32], index: 0, kind: input, shape index: {}]   ;;  %s268_s3 = inlined_call_operand.vmem [shape: bf16[32,96], index: 3, kind: input, shape index: {}]   ;;  %s269_s1 = inlined_call_operand.vmem [shape: f32[1,32], index: 1, kind: input, shape index: {}]   ;;  %s270_s2 = inlined_call_operand.vmem [shape: f32[1,32], index: 2, kind: input, shape index: {}]   ;;  %s271_s4 = inlined_call_operand.vmem [shape: f32[1,96], index: 4, kind: input, shape index: {}]   ;;  %s272_s5 = inlined_call_operand.vmem [shape: bf16[16,96], index: 5, kind: output, shape index: {}]  }
   0x1   :  { %v180_v0 = vld [vmem:[%s267_s0] sm:$0xff]   ;;  %186 = vmatprep.subr.bf16.mxu0 %v206_v15  ;;  %v196_v16 = vld [vmem:[%s268_s3 + $0x8] sm:$0xff]   ;;  %190 = vmatprep.mubr.msk.bf16.mxu0 %vm207_vm1, %v206_v15 }
   0x2   :  { %v181_v1 = vunpack.c.l.bf16 %v180_v0  ;;  %v182_v2 = vunpack.c.h.bf16 %v180_v0  ;;  %187 = vmatpush3.bf16.msra.mxu0 %v196_v16  ;;  %v197_v17 = vld [vmem:[%s268_s3] sm:$0xff]  }
   0x3   :  { %188 = vmatprep.subr.bf16.mxu0 %v206_v15  ;;  %v169_v34 = vld [vmem:[%s269_s1] ss:$0 sm:$0xff] }
   0x4   :  { %v28_v3 = vsel %vm27_vm0, %v181_v1, 0.0  ;;  %v31_v4 = vsel %vm27_vm0, %v182_v2, 0.0  ;;  %v170_v40 = vld [vmem:[%s270_s2] ss:$0 sm:$0xff] }
   0x5   :  { %29 = vadd.xlane.f32.xlu0 %v28_v3  ;;  %v171_v45 = vld [vmem:[%s271_s4] ss:$0 sm:$0xff] }
   0x6   :  { %189 = vmatpush3.bf16.msra.mxu0 %v197_v17 }
   0x9   :  { %32 = vadd.xlane.f32.xlu0 %v31_v4 }
  0x8e   :  { %v30_v5 = vpop.xlane.xlu0 %29 }
  0x8f   :  { %v35_v6 = vmul.f32 0.03125, %v30_v5 }
  0x91   :  { %v37_v7 = vsub.f32 %v181_v1, %v35_v6 }
  0x92   :  { %v33_v8 = vpop.xlane.xlu0 %32 }
  0x93   :  { %v36_v9 = vmul.f32 0.03125, %v33_v8  ;;  %v39_v10 = vmul.f32 %v37_v7, %v37_v7  ;;  %v56_v36 = vmul.f32 %v169_v34, %v37_v7 }
  0x95   :  { %v38_v11 = vsub.f32 %v182_v2, %v36_v9  ;;  %v41_v12 = vsel %vm27_vm0, %v39_v10, 0.0 }
  0x96   :  { %42 = vadd.xlane.f32.xlu1 %v41_v12 }
  0x97   :  { %v40_v13 = vmul.f32 %v38_v11, %v38_v11  ;;  %v57_v37 = vmul.f32 %v169_v34, %v38_v11 }
  0x99   :  { %v44_v14 = vsel %vm27_vm0, %v40_v13, 0.0 }
  0x9a   :  { %45 = vadd.xlane.f32.xlu1 %v44_v14 }
 0x11f   :  { %v43_v18 = vpop.xlane.xlu1 %42 }
 0x120   :  { %v48_v19 = vmul.f32 0.032258064, %v43_v18 }
 0x122   :  { %198 = vrsqrt.f32 %v48_v19  ;;  %vm60_vm2 = vcmp.eq.f32.partialorder %v48_v19, inf  ;;  %v63_v24 = vand.u32 2147483648, %v48_v19  ;;  %vm62_vm3 = vcmp.eq.f32.partialorder %v48_v19, 0.0 }
 0x123   :  { %v46_v20 = vpop.xlane.xlu1 %45 }
 0x124   :  { %v49_v21 = vmul.f32 0.032258064, %v46_v20 }
 0x126   :  { %200 = vrsqrt.f32 %v49_v21  ;;  %vm67_vm4 = vcmp.eq.f32.partialorder %v49_v21, inf  ;;  %v70_v30 = vand.u32 2147483648, %v49_v21  ;;  %vm69_vm5 = vcmp.eq.f32.partialorder %v49_v21, 0.0 }
 0x12f   :  { %v199_v22 = vpop.eup %198 }
 0x130   :  { %v59_v23 = vmul.f32 %v199_v22, %v48_v19 }
 0x132   :  { %v61_v25 = vsel %vm60_vm2, %v48_v19, %v59_v23 }
 0x133   :  { %v201_v26 = vpop.eup %200  ;;  %v64_v27 = vsel %vm62_vm3, %v63_v24, %v61_v25 }
 0x134   :  { %v72_v28 = vadd.f32 1e-06, %v64_v27  ;;  %v66_v29 = vmul.f32 %v201_v26, %v49_v21 }
 0x136   :  { %202 = vrcp.f32 %v72_v28  ;;  %v68_v31 = vsel %vm67_vm4, %v49_v21, %v66_v29 }
 0x137   :  { %v71_v32 = vsel %vm69_vm5, %v70_v30, %v68_v31 }
 0x138   :  { %v73_v33 = vadd.f32 1e-06, %v71_v32 }
 0x13a   :  { %204 = vrcp.f32 %v73_v33 }
 0x143   :  { %v203_v35 = vpop.eup %202 }
 0x144   :  { %v75_v38 = vmul.f32 %v203_v35, %v56_v36 }
 0x146   :  { %v84_v42 = vadd.f32 %v170_v40, %v75_v38 }
 0x147   :  { %v205_v39 = vpop.eup %204 }
 0x148   :  { %v77_v41 = vmul.f32 %v205_v39, %v57_v37 }
 0x14a   :  { %v85_v43 = vadd.f32 %v170_v40, %v77_v41 }
 0x14c   :  { %v86_v44 = vpack.c.bf16 %v85_v43, %v84_v42 }
 0x14e   :  { %191 = vmatmul.mubr.msk.bf16.vlgmr.msra.gmra.mxu0 %vm27_vm0, %v86_v44 }
 0x20e   :  { %v147_v46 = vpop.f32.mrf.mxu0 }
 0x20f   :  { %v148_v47 = vadd.f32 %v171_v45, %v147_v46 }
 0x210   :  { %v192_v48 = vpop.f32.mrf.mxu0 }
 0x211   :  { %v177_v49 = vpack.c.bf16 %v148_v47, %v148_v47 }
 0x212   :  { %v150_v50 = vpop.f32.mrf.mxu0 }
 0x213   :  { %163 = vst.msk [vmem:[%s272_s5] sm:$0xf] %vm162_vm6, %v177_v49  ;;  %v151_v51 = vadd.f32 %v171_v45, %v150_v50 }
 0x214   :  { %v193_v52 = vpop.f32.mrf.mxu0 }
 0x215   :  { %v178_v53 = vpack.c.bf16 %v151_v51, %v151_v51 }
 0x217   :  { %164 = vst.msk [vmem:[%s272_s5 + $0x4] sm:$0xf] %vm162_vm6, %v178_v53 }

// kernel: translator_forward.12
= control target key start
LH: loop header
LB: loop body
LE: loop exit
PB: predicated region body
PF: predicated region fallthrough
CT: control target
= control target key end

     0   :  { %s857_s9 = smov 0   ;;  %s958_s0 = inlined_call_operand.vmem [shape: bf16[2,8,96], index: 0, kind: input, shape index: {}]   ;;  %s959_s1 = inlined_call_operand.vmem [shape: f32[2,1,8], index: 1, kind: input, shape index: {}]   ;;  %s960_s2 = inlined_call_operand.vmem [shape: bf16[2,8,32], index: 2, kind: output, shape index: {}]  }
   0x1 LB: > { %s702_s10 = sadd.s32 4294967295, %s829_s9   ;;  %p706_p0 = scmp.ge.s32.totalorder %s829_s9, 1  ;;  %s829_s9 = sphi %s857_s9, %s12_s9  }
   0x2   : > { %p119_p1 = scmp.lt.s32.totalorder %s829_s9, 3 }
   0x4   : > { %p120_p2 = pnand %p706_p0, %p119_p1 }
   0x5   : > { %p142_p3 = scmp.lt.s32.totalorder (!%p120_p2), %s702_s10, 1  ;;  %s833_s15 = smov (!%p120_p2), 104  }
   0x6   : > { %123 = sbr.rel (%p120_p2) target bundleno = 1085 (0x43d), region = 28  ;;  %s834_s16 = smov (!%p120_p2), 120  }
   0x7   : > { %s835_s17 = smov (!%p120_p2), 112   ;;  %s836_s18 = smov (!%p120_p2), 96  }
   0x8   : > { %s838_s22 = smov (!%p120_p2), 64   ;;  %s839_s23 = smov (!%p120_p2), 8  }
   0x9   : > { %s840_s24 = smov (!%p120_p2), 16   ;;  %s841_s25 = smov (!%p120_p2), 24  }
   0xb   : > { %v831_v0 = vmov 0.0   ;;  %vm832_vm0 = vmmov 0   ;;  %s962_s10 = smov (!%p142_p3, %s702_s10), 1  ;;  %vm166_vm1 = vcmask 64512   ;;  %v370_v17 = vlaneseq }
   0xc   : > { %739 = vmatprep.subr.bf16.mxu0 %v831_v0  ;;  %741 = vmatprep.mubr.msk.bf16.mxu0 %vm832_vm0, %v831_v0  ;;  %s707_s11 = sshll.u32 %s962_s10, 2  ;;  %s148_s21 = scalar_lea.vmem %s959_s1, %s962_s10  ;;  %v837_v21 = vmov 0   ;;  %vm432_vm4 = vcmask 1043456   ;;  %vm633_vm5 = vcmask 130048   ;;  %vm635_vm6 = vcmask 195584  }
   0xd   : > { %745 = vmatprep.subr.bf16.mxu1 %v831_v0  ;;  %747 = vmatprep.mubr.msk.bf16.mxu1 %vm832_vm0, %v831_v0  ;;  %s145_s14 = scalar_lea.vmem %s958_s0, %s707_s11  ;;  %v367_v18 = vld [vmem:[%s148_s21] sm:$0x1]  ;;  %v371_v19 = vshrl.u32 %v370_v17, 7  ;;  %s152_s28 = scalar_lea.vmem %s960_s2, %s707_s11  ;;  %vm638_vm7 = vcmask 257024  }
   0xe   : > { %v154_v1 = vld [vmem:[%s145_s14] sm:$0xf]  ;;  %vm368_vm2 = vcmp.gt.f32.partialorder %v367_v18, 0.0 }
   0xf   : > { %160 = vrot.lane.b32.xlu1 %v154_v1, %s833_s15  ;;  %156 = vrot.lane.b32.xlu0 %v154_v1, %s834_s16  ;;  %v879_v2 = vcombine.low %v154_v1, %v154_v1  ;;  %v372_v20 = vsub.s32 0, %v371_v19  ;;  %v369_v22 = vsel %vm368_vm2, 1, %v837_v21 }
  0x11   : > { %v373_v23 = vrot.slane %v369_v22, %v372_v20 }
  0x13   : > { %158 = vrot.lane.b32.xlu0 %v154_v1, %s835_s17  ;;  %164 = vrot.lane.b32.xlu1 %v879_v2, %s836_s18  ;;  %vm374_vm3 = vcmp.eq.s32.totalorder %v373_v23, 1 }
  0x81   : > { %v161_v3 = vpop.permute.xlu1 %160  ;;  %v157_v4 = vpop.permute.xlu0 %156 }
  0x82   : > { %v882_v5 = vcombine.low %v157_v4, %v157_v4  ;;  %v884_v6 = vcombine.low %v161_v3, %v161_v3 }
  0x84   : > { %215 = vrot.lane.b32.xlu0 %v882_v5, %s836_s18 }
  0x85   : > { %v159_v7 = vpop.permute.xlu0 %158  ;;  %v165_v8 = vpop.permute.xlu1 %164 }
  0x86   : > { %v887_v9 = vcombine.low %v159_v7, %v159_v7  ;;  %v171_v10 = vsel %vm166_vm1, %v165_v8, 0 }
  0x87   : > { %740 = vmatpush3.bf16.xpose.msra.mxu0 %v171_v10 }
  0x88   : > { %265 = vrot.lane.b32.xlu1 %v887_v9, %s836_s18  ;;  %315 = vrot.lane.b32.xlu0 %v884_v6, %s836_s18 }
  0x89   : > { %751 = vmatprep.subr.bf16.mxu0 %v831_v0 }
  0x8e   : > { %742 = vmatmul.mubr.msk.bf16.vlgmr.msra.gmra.mxu0 %vm166_vm1, %v154_v1 }
  0x8f   : > { %753 = vmatprep.mubr.msk.bf16.mxu0 %vm832_vm0, %v831_v0 }
  0xf6   : > { %v216_v11 = vpop.permute.xlu0 %215 }
  0xf7   : > { %v221_v12 = vsel %vm166_vm1, %v216_v11, 0 }
  0xf8   : > { %746 = vmatpush3.bf16.xpose.msra.mxu1 %v221_v12 }
  0xf9   : > { %757 = vmatprep.subr.bf16.mxu1 %v831_v0 }
  0xfa   : > { %v266_v13 = vpop.permute.xlu1 %265  ;;  %v316_v14 = vpop.permute.xlu0 %315 }
  0xfb   : > { %v271_v15 = vsel %vm166_vm1, %v266_v13, 0  ;;  %v321_v16 = vsel %vm166_vm1, %v316_v14, 0 }
  0xfc   : > { %752 = vmatpush3.bf16.xpose.msra.mxu0 %v271_v15 }
  0xfd   : > { %763 = vmatprep.subr.bf16.mxu0 %v831_v0 }
  0xff   : > { %748 = vmatmul.mubr.msk.bf16.vlgmr.msra.gmra.mxu1 %vm166_vm1, %v157_v4 }
 0x100   : > { %758 = vmatpush3.bf16.xpose.msra.mxu1 %v321_v16  ;;  %759 = vmatprep.mubr.msk.bf16.mxu1 %vm832_vm0, %v831_v0 }
 0x101   : > { %769 = vmatprep.subr.bf16.mxu1 %v831_v0 }
 0x103   : > { %754 = vmatmul.mubr.msk.bf16.vlgmr.msra.gmra.mxu0 %vm166_vm1, %v159_v7 }
 0x104   : > { %765 = vmatprep.mubr.msk.bf16.mxu0 %vm832_vm0, %v831_v0 }
 0x107   : > { %760 = vmatmul.mubr.msk.bf16.vlgmr.msra.gmra.mxu1 %vm166_vm1, %v161_v3 }
 0x108   : > { %771 = vmatprep.mubr.msk.bf16.mxu1 %vm832_vm0, %v831_v0 }
 0x14e   : > { %v207_v24 = vpop.f32.mrf.mxu0 }
 0x14f   : > { %v363_v25 = vmul.f32 0.35355338, %v207_v24 }
 0x150   : > { %v743_v26 = vpop.f32.mrf.mxu0 }
 0x151   : > { %v375_v27 = vsel %vm374_vm3, %v363_v25, -1e+09 }
 0x152   : > { %v379_v28 = vsel %vm166_vm1, %v375_v27, -inf  ;;  %v210_v29 = vpop.f32.mrf.mxu0 }
 0x153   : > { %380 = vmax.xlane.f32.xlu1 %v379_v28 }
 0x154   : > { %v744_v30 = vpop.f32.mrf.mxu0 }
 0x1bf   : > { %v257_v31 = vpop.f32.mrf.mxu1 }
 0x1c0   : > { %v364_v32 = vmul.f32 0.35355338, %v257_v31 }
 0x1c1   : > { %v749_v33 = vpop.f32.mrf.mxu1 }
 0x1c2   : > { %v376_v34 = vsel %vm374_vm3, %v364_v32, -1e+09 }
 0x1c3   : > { %v260_v35 = vpop.f32.mrf.mxu1  ;;  %v307_v36 = vpop.f32.mrf.mxu0  ;;  %v382_v37 = vsel %vm166_vm1, %v376_v34, -inf }
 0x1c4   : > { %v365_v38 = vmul.f32 0.35355338, %v307_v36  ;;  %383 = vmax.xlane.f32.xlu0 %v382_v37 }
 0x1c5   : > { %v750_v39 = vpop.f32.mrf.mxu1  ;;  %v755_v40 = vpop.f32.mrf.mxu0 }
 0x1c6   : > { %v377_v41 = vsel %vm374_vm3, %v365_v38, -1e+09 }
 0x1c7   : > { %v310_v42 = vpop.f32.mrf.mxu0  ;;  %v357_v43 = vpop.f32.mrf.mxu1  ;;  %v385_v44 = vsel %vm166_vm1, %v377_v41, -inf }
 0x1c8   : > { %v366_v45 = vmul.f32 0.35355338, %v357_v43  ;;  %386 = vmax.xlane.f32.xlu0 %v385_v44 }
 0x1c9   : > { %v756_v46 = vpop.f32.mrf.mxu0  ;;  %v761_v47 = vpop.f32.mrf.mxu1 }
 0x1ca   : > { %v378_v48 = vsel %vm374_vm3, %v366_v45, -1e+09 }
 0x1cb   : > { %v360_v49 = vpop.f32.mrf.mxu1  ;;  %v388_v50 = vsel %vm166_vm1, %v378_v48, -inf }
 0x1cc   : > { %389 = vmax.xlane.f32.xlu1 %v388_v50 }
 0x1cd   : > { %v762_v51 = vpop.f32.mrf.mxu1 }
 0x1dc   : > { %v381_v52 = vpop.xlane.xlu1 %380 }
 0x1dd   : > { %476 = vrot.lane.b32.xlu1 %v882_v5, %s838_s22  ;;  %v391_v53 = vsub.f32 %v375_v27, %v381_v52 }
 0x1de   : > { %427 = vrot.lane.b32.xlu0 %v879_v2, %s838_s22 }
 0x1df   : > { %v395_v54 = vmul.f32 1.442695, %v391_v53 }
 0x1e1   : > { %807 = vpow2.f32 %v395_v54 }
 0x1ee   : > { %v808_v55 = vpop.eup %807 }
 0x1ef   : > { %v403_v56 = vsel %vm166_vm1, %v808_v55, 0.0 }
 0x1fd   : > { %404 = vadd.xlane.f32.xlu0 %v403_v56 }
 0x24d   : > { %v384_v57 = vpop.xlane.xlu0 %383 }
 0x24e   : > { %v392_v58 = vsub.f32 %v376_v34, %v384_v57 }
 0x250   : > { %v397_v59 = vmul.f32 1.442695, %v392_v58 }
 0x251   : > { %v387_v60 = vpop.xlane.xlu0 %386 }
 0x252   : > { %809 = vpow2.f32 %v397_v59  ;;  %v393_v61 = vsub.f32 %v377_v41, %v387_v60 }
 0x254   : > { %v399_v62 = vmul.f32 1.442695, %v393_v61 }
 0x255   : > { %v390_v63 = vpop.xlane.xlu1 %389  ;;  %v428_v1 = vpop.permute.xlu0 %427 }
 0x256   : > { %811 = vpow2.f32 %v399_v62  ;;  %v394_v2 = vsub.f32 %v378_v48, %v390_v63  ;;  %v434_v3 = vsel %vm432_vm4, %v428_v1, 0 }
 0x257   : > { %764 = vmatpush3.bf16.msra.mxu0 %v434_v3 }
 0x258   : > { %v401_v4 = vmul.f32 1.442695, %v394_v2  ;;  %775 = vmatprep.subr.bf16.mxu0 %v831_v0 }
 0x259   : > { %v477_v5 = vpop.permute.xlu1 %476 }
 0x25a   : > { %813 = vpow2.f32 %v401_v4  ;;  %v482_v7 = vsel %vm432_vm4, %v477_v5, 0 }
 0x25b   : > { %770 = vmatpush3.bf16.msra.mxu1 %v482_v7 }
 0x25c   : > { %781 = vmatprep.subr.bf16.mxu1 %v831_v0 }
 0x25f   : > { %v810_v8 = vpop.eup %809 }
 0x260   : > { %v406_v10 = vsel %vm166_vm1, %v810_v8, 0.0 }
 0x261   : > { %407 = vadd.xlane.f32.xlu1 %v406_v10 }
 0x263   : > { %v812_v11 = vpop.eup %811 }
 0x264   : > { %v409_v12 = vsel %vm166_vm1, %v812_v11, 0.0 }
 0x265   : > { %410 = vadd.xlane.f32.xlu0 %v409_v12 }
 0x267   : > { %v814_v13 = vpop.eup %813 }
 0x268   : > { %v412_v14 = vsel %vm166_vm1, %v814_v13, 0.0 }
 0x269   : > { %413 = vadd.xlane.f32.xlu1 %v412_v14 }
 0x27a   : > { %524 = vrot.lane.b32.xlu1 %v887_v9, %s838_s22 }
 0x27b   : > { %572 = vrot.lane.b32.xlu0 %v884_v6, %s838_s22 }
 0x286   : > { %v405_v15 = vpop.xlane.xlu0 %404 }
 0x287   : > { %815 = vrcp.f32 %v405_v15 }
 0x294   : > { %v816_v16 = vpop.eup %815 }
 0x295   : > { %v419_v17 = vmul.f32 %v816_v16, %v808_v55 }
 0x297   : > { %v423_v18 = vpack.c.bf16 %v419_v17, %v419_v17 }
 0x299   : > { %766 = vmatmul.mubr.msk.bf16.vlgmr.msra.gmra.mxu0 %vm166_vm1, %v423_v18 }
 0x29a   : > { %777 = vmatprep.mubr.msk.bf16.mxu0 %vm832_vm0, %v831_v0 }
 0x2ea   : > { %v408_v19 = vpop.xlane.xlu1 %407 }
 0x2eb   : > { %817 = vrcp.f32 %v408_v19 }
 0x2ee   : > { %v411_v20 = vpop.xlane.xlu0 %410 }
 0x2ef   : > { %819 = vrcp.f32 %v411_v20 }
 0x2f2   : > { %v414_v21 = vpop.xlane.xlu1 %413  ;;  %v573_v24 = vpop.permute.xlu0 %572 }
 0x2f3   : > { %821 = vrcp.f32 %v414_v21  ;;  %v578_v27 = vsel %vm432_vm4, %v573_v24, 0 }
 0x2f6   : > { %v525_v9 = vpop.permute.xlu1 %524 }
 0x2f7   : > { %v530_v22 = vsel %vm432_vm4, %v525_v9, 0 }
 0x2f8   : > { %v818_v6 = vpop.eup %817  ;;  %776 = vmatpush3.bf16.msra.mxu0 %v530_v22 }
 0x2f9   : > { %v420_v23 = vmul.f32 %v818_v6, %v810_v8 }
 0x2fb   : > { %v424_v25 = vpack.c.bf16 %v420_v23, %v420_v23 }
 0x2fc   : > { %v820_v26 = vpop.eup %819 }
 0x2fd   : > { %772 = vmatmul.mubr.msk.bf16.vlgmr.msra.gmra.mxu1 %vm166_vm1, %v424_v25  ;;  %v421_v28 = vmul.f32 %v820_v26, %v812_v11 }
 0x2fe   : > { %782 = vmatpush3.bf16.msra.mxu1 %v578_v27  ;;  %783 = vmatprep.mubr.msk.bf16.mxu1 %vm832_vm0, %v831_v0 }
 0x2ff   : > { %v425_v29 = vpack.c.bf16 %v421_v28, %v421_v28 }
 0x300   : > { %v822_v30 = vpop.eup %821 }
 0x301   : > { %778 = vmatmul.mubr.msk.bf16.vlgmr.msra.gmra.mxu0 %vm166_vm1, %v425_v29  ;;  %v422_v31 = vmul.f32 %v822_v30, %v814_v13 }
 0x303   : > { %v426_v32 = vpack.c.bf16 %v422_v31, %v422_v31 }
 0x305   : > { %784 = vmatmul.mubr.msk.bf16.vlgmr.msra.gmra.mxu1 %vm166_vm1, %v426_v32 }
 0x359   : > { %v470_v33 = vpop.f32.mrf.mxu0 }
 0x35b   : > { %v767_v34 = vpop.f32.mrf.mxu0 }
 0x35d   : > { %v473_v35 = vpop.f32.mrf.mxu0 }
 0x35f   : > { %v768_v36 = vpop.f32.mrf.mxu0 }
 0x3bd   : > { %v518_v37 = vpop.f32.mrf.mxu1 }
 0x3be   : > { %621 = vrot.lane.b32.xlu1 %v518_v37, %s839_s23 }
 0x3bf   : > { %v773_v38 = vpop.f32.mrf.mxu1 }
 0x3c1   : > { %v521_v39 = vpop.f32.mrf.mxu1  ;;  %v566_v40 = vpop.f32.mrf.mxu0 }
 0x3c2   : > { %625 = vrot.lane.b32.xlu0 %v566_v40, %s840_s24 }
 0x3c3   : > { %v774_v0 = vpop.f32.mrf.mxu1  ;;  %v779_v41 = vpop.f32.mrf.mxu0 }
 0x3c5   : > { %v569_v42 = vpop.f32.mrf.mxu0  ;;  %v614_v43 = vpop.f32.mrf.mxu1 }
 0x3c6   : > { %629 = vrot.lane.b32.xlu1 %v614_v43, %s841_s25 }
 0x3c7   : > { %v780_v44 = vpop.f32.mrf.mxu0  ;;  %v785_v45 = vpop.f32.mrf.mxu1 }
 0x3c9   : > { %v617_v46 = vpop.f32.mrf.mxu1 }
 0x3cb   : > { %v786_v47 = vpop.f32.mrf.mxu1 }
 0x430   : > { %v622_v48 = vpop.permute.xlu1 %621 }
 0x431   : > { %v632_v50 = vsel %vm166_vm1, %v470_v33, %v622_v48 }
 0x434   : > { %v626_v49 = vpop.permute.xlu0 %625 }
 0x435   : > { %v634_v51 = vsel %vm633_vm5, %v632_v50, %v626_v49 }
 0x438   : > { %v630_v52 = vpop.permute.xlu1 %629 }
 0x439   : > { %v636_v53 = vsel %vm635_vm6, %v634_v51, %v630_v52 }
 0x43a   : > { %v637_v54 = vpack.c.bf16 %v636_v53, %v636_v53 }
 0x43c   : > { %639 = vst.msk [vmem:[%s152_s28] sm:$0xf] %vm638_vm7, %v637_v54 }
 0x43d PF: > { %s12_s9 = sadd.s32 1, %s829_s9  }
 0x43e   : > { %p9_p4 = scmp.ge.s32.totalorder %s12_s9, 4  }
 0x440   :  { %11 = sbr.rel (!%p9_p4) target bundleno = 1 (0x1), region = 61 }

// kernel: translator_forward.14
= control target key start
LH: loop header
LB: loop body
LE: loop exit
PB: predicated region body
PF: predicated region fallthrough
CT: control target
= control target key end

     0   :  { %vm33_vm0 = vcmask 261120   ;;  %v328_v15 = vmov 0.0   ;;  %vm329_vm1 = vmmov 0   ;;  %vm202_vm6 = vcmask 523264   ;;  %s424_s0 = inlined_call_operand.vmem [shape: bf16[16,32], index: 0, kind: input, shape index: {}]   ;;  %s425_s3 = inlined_call_operand.vmem [shape: bf16[32,64], index: 3, kind: input, shape index: {}]   ;;  %s426_s5 = inlined_call_operand.vmem [shape: bf16[64,32], index: 5, kind: input, shape index: {}]   ;;  %s427_s1 = inlined_call_operand.vmem [shape: f32[1,32], index: 1, kind: input, shape index: {}]   ;;  %s428_s2 = inlined_call_operand.vmem [shape: f32[1,32], index: 2, kind: input, shape index: {}]   ;;  %s429_s4 = inlined_call_operand.vmem [shape: f32[1,64], index: 4, kind: input, shape index: {}]   ;;  %s430_s6 = inlined_call_operand.vmem [shape: f32[1,32], index: 6, kind: input, shape index: {}]   ;;  %s431_s7 = inlined_call_operand.vmem [shape: bf16[16,32], index: 7, kind: output, shape index: {}]  }
   0x1   :  { %v281_v0 = vld [vmem:[%s424_s0] sm:$0xff]   ;;  %292 = vmatprep.subr.bf16.mxu0 %v328_v15  ;;  %v314_v16 = vld [vmem:[%s425_s3 + $0x8] sm:$0xff]   ;;  %296 = vmatprep.mubr.msk.bf16.mxu0 %vm329_vm1, %v328_v15  ;;  %v316_v18 = vld [vmem:[%s426_s5 + $0x18] sm:$0xff]   ;;  %vm257_vm7 = vcmask 257024  }
   0x2   :  { %v373_v1 = vunpack.c.l.bf16 %v281_v0  ;;  %v375_v2 = vunpack.c.h.bf16 %v281_v0  ;;  %300 = vmatprep.subr.bf16.mxu1 %v328_v15  ;;  %308 = vmatprep.mubr.msk.bf16.mxu1 %vm329_vm1, %v328_v15  ;;  %v315_v17 = vld [vmem:[%s425_s3] sm:$0xff]   ;;  %v317_v46 = vld [vmem:[%s426_s5 + $0x10] sm:$0xff]   ;;  %v318_v47 = vld [vmem:[%s426_s5 + $0x8] sm:$0xff]  }
   0x3   :  { %293 = vmatpush3.bf16.msra.mxu0 %v314_v16  ;;  %301 = vmatpush3.bf16.msra.mxu1 %v316_v18  ;;  %v264_v35 = vld [vmem:[%s427_s1] ss:$0 sm:$0xff] }
   0x4   :  { %v34_v3 = vsel %vm33_vm0, %v373_v1, 0.0  ;;  %v37_v4 = vsel %vm33_vm0, %v375_v2, 0.0  ;;  %294 = vmatprep.subr.bf16.mxu0 %v328_v15  ;;  %302 = vmatprep.subr.bf16.mxu1 %v328_v15  ;;  %v265_v41 = vld [vmem:[%s428_s2] ss:$0 sm:$0xff] }
   0x5   :  { %35 = vadd.xlane.f32.xlu0 %v34_v3  ;;  %v319_v48 = vld [vmem:[%s426_s5] sm:$0xff]  }
   0x6   :  { %v266_v49 = vld [vmem:[%s429_s4] ss:$0 sm:$0xff] }
   0x7   :  { %295 = vmatpush3.bf16.msra.mxu0 %v315_v17  ;;  %303 = vmatpush3.bf16.msra.mxu1 %v317_v46  ;;  %v270_v59 = vld [vmem:[%s430_s6] ss:$0 sm:$0xff] }
   0x8   :  { %304 = vmatprep.subr.bf16.mxu1 %v328_v15 }
   0x9   :  { %38 = vadd.xlane.f32.xlu0 %v37_v4 }
   0xb   :  { %305 = vmatpush3.bf16.msra.mxu1 %v318_v47 }
   0xc   :  { %306 = vmatprep.subr.bf16.mxu1 %v328_v15 }
   0xf   :  { %307 = vmatpush3.bf16.msra.mxu1 %v319_v48 }
  0x8e   :  { %v36_v5 = vpop.xlane.xlu0 %35 }
  0x8f   :  { %v41_v6 = vmul.f32 0.03125, %v36_v5 }
  0x91   :  { %v43_v7 = vsub.f32 %v373_v1, %v41_v6 }
  0x92   :  { %v39_v8 = vpop.xlane.xlu0 %38 }
  0x93   :  { %v42_v9 = vmul.f32 0.03125, %v39_v8  ;;  %v45_v10 = vmul.f32 %v43_v7, %v43_v7  ;;  %v62_v37 = vmul.f32 %v264_v35, %v43_v7 }
  0x95   :  { %v44_v11 = vsub.f32 %v375_v2, %v42_v9  ;;  %v47_v12 = vsel %vm33_vm0, %v45_v10, 0.0 }
  0x96   :  { %48 = vadd.xlane.f32.xlu1 %v47_v12 }
  0x97   :  { %v46_v13 = vmul.f32 %v44_v11, %v44_v11  ;;  %v63_v38 = vmul.f32 %v264_v35, %v44_v11 }
  0x99   :  { %v50_v14 = vsel %vm33_vm0, %v46_v13, 0.0 }
  0x9a   :  { %51 = vadd.xlane.f32.xlu1 %v50_v14 }
 0x11f   :  { %v49_v19 = vpop.xlane.xlu1 %48 }
 0x120   :  { %v54_v20 = vmul.f32 0.032258064, %v49_v19 }
 0x122   :  { %320 = vrsqrt.f32 %v54_v20  ;;  %vm66_vm2 = vcmp.eq.f32.partialorder %v54_v20, inf  ;;  %v69_v25 = vand.u32 2147483648, %v54_v20  ;;  %vm68_vm3 = vcmp.eq.f32.partialorder %v54_v20, 0.0 }
 0x123   :  { %v52_v21 = vpop.xlane.xlu1 %51 }
 0x124   :  { %v55_v22 = vmul.f32 0.032258064, %v52_v21 }
 0x126   :  { %322 = vrsqrt.f32 %v55_v22  ;;  %vm73_vm4 = vcmp.eq.f32.partialorder %v55_v22, inf  ;;  %v76_v31 = vand.u32 2147483648, %v55_v22  ;;  %vm75_vm5 = vcmp.eq.f32.partialorder %v55_v22, 0.0 }
 0x12f   :  { %v321_v23 = vpop.eup %320 }
 0x130   :  { %v65_v24 = vmul.f32 %v321_v23, %v54_v20 }
 0x132   :  { %v67_v26 = vsel %vm66_vm2, %v54_v20, %v65_v24 }
 0x133   :  { %v323_v27 = vpop.eup %322  ;;  %v70_v28 = vsel %vm68_vm3, %v69_v25, %v67_v26 }
 0x134   :  { %v78_v29 = vadd.f32 1e-06, %v70_v28  ;;  %v72_v30 = vmul.f32 %v323_v27, %v55_v22 }
 0x136   :  { %324 = vrcp.f32 %v78_v29  ;;  %v74_v32 = vsel %vm73_vm4, %v55_v22, %v72_v30 }
 0x137   :  { %v77_v33 = vsel %vm75_vm5, %v76_v31, %v74_v32 }
 0x138   :  { %v79_v34 = vadd.f32 1e-06, %v77_v33 }
 0x13a   :  { %326 = vrcp.f32 %v79_v34 }
 0x143   :  { %v325_v36 = vpop.eup %324 }
 0x144   :  { %v81_v39 = vmul.f32 %v325_v36, %v62_v37 }
 0x146   :  { %v90_v43 = vadd.f32 %v265_v41, %v81_v39 }
 0x147   :  { %v327_v40 = vpop.eup %326 }
 0x148   :  { %v83_v42 = vmul.f32 %v327_v40, %v63_v38 }
 0x14a   :  { %v91_v44 = vadd.f32 %v265_v41, %v83_v42 }
 0x14c   :  { %v92_v45 = vpack.c.bf16 %v91_v44, %v90_v43 }
 0x14e   :  { %297 = vmatmul.mubr.msk.bf16.vlgmr.msra.gmra.mxu0 %vm33_vm0, %v92_v45 }
 0x20e   :  { %v153_v50 = vpop.f32.mrf.mxu0 }
 0x20f   :  { %v154_v52 = vadd.f32 %v266_v49, %v153_v50 }
 0x210   :  { %v298_v51 = vpop.f32.mrf.mxu0 }
 0x211   :  { %v160_v56 = vmax.f32 %v154_v52, 0.0 }
 0x212   :  { %v156_v53 = vpop.f32.mrf.mxu0 }
 0x213   :  { %v157_v54 = vadd.f32 %v266_v49, %v156_v53 }
 0x214   :  { %v299_v55 = vpop.f32.mrf.mxu0 }
 0x215   :  { %v161_v57 = vmax.f32 %v157_v54, 0.0 }
 0x217   :  { %v162_v58 = vpack.c.bf16 %v161_v57, %v160_v56 }
 0x219   :  { %309 = vmatmul.mubr.msk.bf16.vlgmr.msra.gmra.mxu1 %vm202_vm6, %v162_v58 }
 0x2d9   :  { %v240_v60 = vpop.f32.mrf.mxu1 }
 0x2da   :  { %v241_v61 = vadd.f32 %v270_v59, %v240_v60 }
 0x2db   :  { %v310_v62 = vpop.f32.mrf.mxu1 }
 0x2dc   :  { %v247_v63 = vadd.f32 %v373_v1, %v241_v61 }
 0x2dd   :  { %v243_v0 = vpop.f32.mrf.mxu1 }
 0x2de   :  { %v278_v3 = vpack.c.bf16 %v247_v63, %v247_v63  ;;  %v244_v4 = vadd.f32 %v270_v59, %v243_v0 }
 0x2df   :  { %v311_v5 = vpop.f32.mrf.mxu1 }
 0x2e0   :  { %258 = vst.msk [vmem:[%s431_s7] sm:$0xf] %vm257_vm7, %v278_v3  ;;  %v248_v6 = vadd.f32 %v375_v2, %v244_v4 }
 0x2e2   :  { %v279_v7 = vpack.c.bf16 %v248_v6, %v248_v6 }
 0x2e4   :  { %259 = vst.msk [vmem:[%s431_s7 + $0x4] sm:$0xf] %vm257_vm7, %v279_v7 }

// kernel: translator_forward.19
= control target key start
LH: loop header
LB: loop body
LE: loop exit
PB: predicated region body
PF: predicated region fallthrough
CT: control target
= control target key end

     0   :  { %vm20_vm0 = vcmask 261120   ;;  %vm87_vm5 = vcmask 257024   ;;  %s151_s0 = inlined_call_operand.vmem [shape: bf16[16,32], index: 0, kind: input, shape index: {}]   ;;  %s152_s1 = inlined_call_operand.vmem [shape: f32[1,32], index: 1, kind: input, shape index: {}]   ;;  %s153_s2 = inlined_call_operand.vmem [shape: f32[1,32], index: 2, kind: input, shape index: {}]   ;;  %s154_s3 = inlined_call_operand.vmem [shape: bf16[16,32], index: 3, kind: output, shape index: {}]  }
   0x1   :  { %v101_v0 = vld [vmem:[%s151_s0] sm:$0xff]  }
   0x2   :  { %v102_v1 = vunpack.c.l.bf16 %v101_v0  ;;  %v103_v2 = vunpack.c.h.bf16 %v101_v0  ;;  %v94_v31 = vld [vmem:[%s152_s1] ss:$0 sm:$0xff] }
   0x3   :  { %v95_v34 = vld [vmem:[%s153_s2] ss:$0 sm:$0xff] }
   0x4   :  { %v21_v3 = vsel %vm20_vm0, %v102_v1, 0.0  ;;  %v24_v4 = vsel %vm20_vm0, %v103_v2, 0.0 }
   0x5   :  { %22 = vadd.xlane.f32.xlu0 %v21_v3 }
   0x9   :  { %25 = vadd.xlane.f32.xlu0 %v24_v4 }
  0x8e   :  { %v23_v5 = vpop.xlane.xlu0 %22 }
  0x8f   :  { %v28_v6 = vmul.f32 0.03125, %v23_v5 }
  0x91   :  { %v30_v7 = vsub.f32 %v102_v1, %v28_v6 }
  0x92   :  { %v26_v8 = vpop.xlane.xlu0 %25 }
  0x93   :  { %v29_v9 = vmul.f32 0.03125, %v26_v8  ;;  %v32_v10 = vmul.f32 %v30_v7, %v30_v7  ;;  %v49_v32 = vmul.f32 %v94_v31, %v30_v7 }
  0x95   :  { %v31_v11 = vsub.f32 %v103_v2, %v29_v9  ;;  %v34_v12 = vsel %vm20_vm0, %v32_v10, 0.0 }
  0x96   :  { %35 = vadd.xlane.f32.xlu1 %v34_v12 }
  0x97   :  { %v33_v13 = vmul.f32 %v31_v11, %v31_v11  ;;  %v50_v36 = vmul.f32 %v94_v31, %v31_v11 }
  0x99   :  { %v37_v14 = vsel %vm20_vm0, %v33_v13, 0.0 }
  0x9a   :  { %38 = vadd.xlane.f32.xlu1 %v37_v14 }
 0x11f   :  { %v36_v15 = vpop.xlane.xlu1 %35 }
 0x120   :  { %v41_v16 = vmul.f32 0.032258064, %v36_v15 }
 0x122   :  { %104 = vrsqrt.f32 %v41_v16  ;;  %vm53_vm1 = vcmp.eq.f32.partialorder %v41_v16, inf  ;;  %v56_v21 = vand.u32 2147483648, %v41_v16  ;;  %vm55_vm2 = vcmp.eq.f32.partialorder %v41_v16, 0.0 }
 0x123   :  { %v39_v17 = vpop.xlane.xlu1 %38 }
 0x124   :  { %v42_v18 = vmul.f32 0.032258064, %v39_v17 }
 0x126   :  { %106 = vrsqrt.f32 %v42_v18  ;;  %vm60_vm3 = vcmp.eq.f32.partialorder %v42_v18, inf  ;;  %v63_v27 = vand.u32 2147483648, %v42_v18  ;;  %vm62_vm4 = vcmp.eq.f32.partialorder %v42_v18, 0.0 }
 0x12f   :  { %v105_v19 = vpop.eup %104 }
 0x130   :  { %v52_v20 = vmul.f32 %v105_v19, %v41_v16 }
 0x132   :  { %v54_v22 = vsel %vm53_vm1, %v41_v16, %v52_v20 }
 0x133   :  { %v107_v23 = vpop.eup %106  ;;  %v57_v24 = vsel %vm55_vm2, %v56_v21, %v54_v22 }
 0x134   :  { %v65_v25 = vadd.f32 1e-06, %v57_v24  ;;  %v59_v26 = vmul.f32 %v107_v23, %v42_v18 }
 0x136   :  { %108 = vrcp.f32 %v65_v25  ;;  %v61_v28 = vsel %vm60_vm3, %v42_v18, %v59_v26 }
 0x137   :  { %v64_v29 = vsel %vm62_vm4, %v63_v27, %v61_v28 }
 0x138   :  { %v66_v30 = vadd.f32 1e-06, %v64_v29 }
 0x13a   :  { %110 = vrcp.f32 %v66_v30 }
 0x143   :  { %v109_v33 = vpop.eup %108 }
 0x144   :  { %v68_v35 = vmul.f32 %v109_v33, %v49_v32 }
 0x146   :  { %v77_v37 = vadd.f32 %v95_v34, %v68_v35 }
 0x147   :  { %v111_v38 = vpop.eup %110 }
 0x148   :  { %v98_v39 = vpack.c.bf16 %v77_v37, %v77_v37  ;;  %v70_v40 = vmul.f32 %v111_v38, %v50_v36 }
 0x14a   :  { %88 = vst.msk [vmem:[%s154_s3] sm:$0xf] %vm87_vm5, %v98_v39  ;;  %v78_v41 = vadd.f32 %v95_v34, %v70_v40 }
 0x14c   :  { %v99_v42 = vpack.c.bf16 %v78_v41, %v78_v41 }
 0x14e   :  { %89 = vst.msk [vmem:[%s154_s3 + $0x4] sm:$0xf] %vm87_vm5, %v99_v42 }

// kernel: translator_forward.21
= control target key start
LH: loop header
LB: loop body
LE: loop exit
PB: predicated region body
PF: predicated region fallthrough
CT: control target
= control target key end

     0   :  { %v130_v0 = vmov 0.0   ;;  %vm131_vm0 = vmmov 0   ;;  %vm45_vm1 = vcmask 261120   ;;  %vm98_vm2 = vcmask 519168   ;;  %s170_s1 = inlined_call_operand.vmem [shape: bf16[32,64], index: 1, kind: input, shape index: {}]   ;;  %s171_s0 = inlined_call_operand.vmem [shape: bf16[16,32], index: 0, kind: input, shape index: {}]   ;;  %s172_s2 = inlined_call_operand.vmem [shape: f32[1,64], index: 2, kind: input, shape index: {}]   ;;  %s173_s3 = inlined_call_operand.vmem [shape: bf16[16,64], index: 3, kind: output, shape index: {}]  }
   0x1   :  { %117 = vmatprep.subr.bf16.mxu0 %v130_v0  ;;  %v127_v1 = vld [vmem:[%s170_s1 + $0x8] sm:$0xff]   ;;  %121 = vmatprep.mubr.msk.bf16.mxu0 %vm131_vm0, %v130_v0  ;;  %v128_v2 = vld [vmem:[%s170_s1] sm:$0xff]  }
   0x2   :  { %118 = vmatpush3.bf16.msra.mxu0 %v127_v1  ;;  %v129_v3 = vld [vmem:[%s171_s0] sm:$0xff]  }
   0x3   :  { %119 = vmatprep.subr.bf16.mxu0 %v130_v0  ;;  %v105_v4 = vld [vmem:[%s172_s2] ss:$0 sm:$0xff] }
   0x6   :  { %120 = vmatpush3.bf16.msra.mxu0 %v128_v2 }
   0x9   :  { %122 = vmatmul.mubr.msk.bf16.vlgmr.msra.gmra.mxu0 %vm45_vm1, %v129_v3 }
  0xc9   :  { %v83_v5 = vpop.f32.mrf.mxu0 }
  0xca   :  { %v84_v6 = vadd.f32 %v105_v4, %v83_v5 }
  0xcb   :  { %v123_v7 = vpop.f32.mrf.mxu0 }
  0xcc   :  { %v112_v8 = vpack.c.bf16 %v84_v6, %v84_v6 }
  0xcd   :  { %v86_v9 = vpop.f32.mrf.mxu0 }
  0xce   :  { %99 = vst.msk [vmem:[%s173_s3] sm:$0xf] %vm98_vm2, %v112_v8  ;;  %v87_v10 = vadd.f32 %v105_v4, %v86_v9 }
  0xcf   :  { %v124_v11 = vpop.f32.mrf.mxu0 }
  0xd0   :  { %v113_v12 = vpack.c.bf16 %v87_v10, %v87_v10 }
  0xd2   :  { %100 = vst.msk [vmem:[%s173_s3 + $0x4] sm:$0xf] %vm98_vm2, %v113_v12 }

// kernel: translator_forward.20
= control target key start
LH: loop header
LB: loop body
LE: loop exit
PB: predicated region body
PF: predicated region fallthrough
CT: control target
= control target key end

     0   :  { %8 = vsyncpa [#allocation3], 0  ;;  %s166_s12 = smov [#allocation2]   ;;  %s207_s0 = inlined_call_operand.vmem [shape: bf16[16,32], index: 0, kind: input, shape index: {}]   ;;  %s208_s1 = inlined_call_operand.vmem [shape: bf16[32,64], index: 1, kind: input, shape index: {}]   ;;  %s209_s2 = inlined_call_operand.hbm [shape: f32[1,64], index: 2, kind: input, shape index: {}]   ;;  %s210_s3 = inlined_call_operand.vmem [shape: bf16[16,64], index: 3, kind: output, shape index: {}]  }
   0x1   :  { %s19_s13 = sshll.u32 %s166_s12, 4  ;;  %s20_s13 = int_to_ptr.vmem [resolvable:$true] %s19_s13 }
   0x2   :  { %s152_s14 = scalar_lea.vmem %s20_s13, 16  ;;  %s156_s15 = scalar_lea.vmem %s20_s13, 32 }
   0x3   :  { %p153_p0 = scmp.ne.s32.totalorder %s20_s13, %s152_s14  ;;  %p157_p1 = scmp.lt.s32.totalorder %s20_s13, %s20_s13 }
   0x4   :  { %p158_p2 = scmp.lt.s32.totalorder %s156_s15, %s152_s14 }
   0x6   :  { %p159_p3 = por %p158_p2, %p157_p1 }
   0x8   :  { %p160_p4 = pnand %p159_p3, %p153_p0 }
   0xa   :  { %163 = shalt.err (!%p160_p4)
}
   0xb   :  { %22 = dma.hbm_to_vmem [thread:$0]  %s209_s2, 16, %s20_s13, [#allocation3]  }
   0xc   :  { %164 = dma.done.wait [#allocation3], 16  }
   0xd   :  { %165 = vsyncadd [#allocation3], 4294967280  ;;  %v167_v0 = vmov 0.0   ;;  %vm168_vm0 = vmmov 0   ;;  %v141_v1 = vld [vmem:[%s208_s1 + $0x8] sm:$0xff]   ;;  %v142_v2 = vld [vmem:[%s208_s1] sm:$0xff]  }
   0xe   :  { %130 = vmatprep.subr.bf16.mxu0 %v167_v0  ;;  %134 = vmatprep.mubr.msk.bf16.mxu0 %vm168_vm0, %v167_v0  ;;  %v143_v3 = vld [vmem:[%s207_s0] sm:$0xff]   ;;  %vm57_vm1 = vcmask 261120   ;;  %vm110_vm2 = vcmask 519168  }
   0xf   :  { %131 = vmatpush3.bf16.msra.mxu0 %v141_v1  ;;  %v118_v4 = vld [vmem:[#allocation2] ss:$0 sm:$0xff] }
  0x10   :  { %132 = vmatprep.subr.bf16.mxu0 %v167_v0 }
  0x13   :  { %133 = vmatpush3.bf16.msra.mxu0 %v142_v2 }
  0x16   :  { %135 = vmatmul.mubr.msk.bf16.vlgmr.msra.gmra.mxu0 %vm57_vm1, %v143_v3 }
  0xd6   :  { %v95_v5 = vpop.f32.mrf.mxu0 }
  0xd7   :  { %v96_v6 = vadd.f32 %v118_v4, %v95_v5 }
  0xd8   :  { %v136_v7 = vpop.f32.mrf.mxu0 }
  0xd9   :  { %v125_v8 = vpack.c.bf16 %v96_v6, %v96_v6 }
  0xda   :  { %v98_v9 = vpop.f32.mrf.mxu0 }
  0xdb   :  { %111 = vst.msk [vmem:[%s210_s3] sm:$0xf] %vm110_vm2, %v125_v8  ;;  %v99_v10 = vadd.f32 %v118_v4, %v98_v9 }
  0xdc   :  { %v137_v11 = vpop.f32.mrf.mxu0 }
  0xdd   :  { %v126_v12 = vpack.c.bf16 %v99_v10, %v99_v10 }
  0xdf   :  { %112 = vst.msk [vmem:[%s210_s3 + $0x4] sm:$0xf] %vm110_vm2, %v126_v12 }
  0xe0   :  { %117 = vsyncpa [#allocation3], 1 }

// kernel: closed_call.87
= control target key start
LH: loop header
LB: loop body
LE: loop exit
PB: predicated region body
PF: predicated region fallthrough
CT: control target
= control target key end

     0   :  { %vm25_vm0 = vcmask 254976   ;;  %v177_v8 = vmov 0.0   ;;  %vm178_vm1 = vmmov 0   ;;  %vm86_vm4 = vcmask 261120   ;;  %s233_s0 = inlined_call_operand.vmem [shape: bf16[2,32], index: 0, kind: input, shape index: {}]   ;;  %s234_s3 = inlined_call_operand.vmem [shape: bf16[32,16], index: 3, kind: input, shape index: {}]   ;;  %s235_s1 = inlined_call_operand.vmem [shape: f32[1,32], index: 1, kind: input, shape index: {}]   ;;  %s236_s2 = inlined_call_operand.vmem [shape: f32[1,32], index: 2, kind: input, shape index: {}]   ;;  %s237_s4 = inlined_call_operand.vmem [shape: f32[1,16], index: 4, kind: input, shape index: {}]   ;;  %s238_s5 = inlined_call_operand.vmem [shape: f32[2,16], index: 5, kind: output, shape index: {}]  }
   0x1   :  { %v21_v0 = vld [vmem:[%s233_s0] sm:$0x1]  ;;  %157 = vmatprep.subr.bf16.mxu0 %v177_v8  ;;  %v167_v9 = vld [vmem:[%s234_s3 + $0x8] sm:$0xff]   ;;  %161 = vmatprep.mubr.msk.bf16.mxu0 %vm178_vm1, %v177_v8  ;;  %vm130_vm5 = vcmask 123904  }
   0x2   :  { %v22_v1 = vunpack.c.l.bf16 %v21_v0  ;;  %158 = vmatpush3.bf16.msra.mxu0 %v167_v9  ;;  %v168_v10 = vld [vmem:[%s234_s3] sm:$0xff]  }
   0x3   :  { %159 = vmatprep.subr.bf16.mxu0 %v177_v8  ;;  %v148_v19 = vld [vmem:[%s235_s1] ss:$0 sm:$0xff] }
   0x4   :  { %v26_v2 = vsel %vm25_vm0, %v22_v1, 0.0  ;;  %v149_v22 = vld [vmem:[%s236_s2] ss:$0 sm:$0xff] }
   0x5   :  { %27 = vadd.xlane.f32.xlu0 %v26_v2  ;;  %v150_v26 = vld [vmem:[%s237_s4] ss:$0 sm:$0xff] }
   0x6   :  { %160 = vmatpush3.bf16.msra.mxu0 %v168_v10 }
  0x8e   :  { %v28_v3 = vpop.xlane.xlu0 %27 }
  0x8f   :  { %v30_v4 = vmul.f32 0.03125, %v28_v3 }
  0x91   :  { %v31_v5 = vsub.f32 %v22_v1, %v30_v4 }
  0x93   :  { %v32_v6 = vmul.f32 %v31_v5, %v31_v5  ;;  %v44_v20 = vmul.f32 %v148_v19, %v31_v5 }
  0x95   :  { %v33_v7 = vsel %vm25_vm0, %v32_v6, 0.0 }
  0x96   :  { %34 = vadd.xlane.f32.xlu0 %v33_v7 }
 0x11f   :  { %v35_v11 = vpop.xlane.xlu0 %34 }
 0x120   :  { %v37_v12 = vmul.f32 0.032258064, %v35_v11 }
 0x122   :  { %169 = vrsqrt.f32 %v37_v12  ;;  %vm47_vm2 = vcmp.eq.f32.partialorder %v37_v12, inf  ;;  %v50_v15 = vand.u32 2147483648, %v37_v12  ;;  %vm49_vm3 = vcmp.eq.f32.partialorder %v37_v12, 0.0 }
 0x12f   :  { %v170_v13 = vpop.eup %169 }
 0x130   :  { %v46_v14 = vmul.f32 %v170_v13, %v37_v12 }
 0x132   :  { %v48_v16 = vsel %vm47_vm2, %v37_v12, %v46_v14 }
 0x133   :  { %v51_v17 = vsel %vm49_vm3, %v50_v15, %v48_v16 }
 0x134   :  { %v52_v18 = vadd.f32 1e-06, %v51_v17 }
 0x136   :  { %171 = vrcp.f32 %v52_v18 }
 0x143   :  { %v172_v21 = vpop.eup %171 }
 0x144   :  { %v54_v23 = vmul.f32 %v172_v21, %v44_v20 }
 0x146   :  { %v61_v24 = vadd.f32 %v149_v22, %v54_v23 }
 0x148   :  { %v62_v25 = vpack.c.bf16 %v61_v24, %v61_v24 }
 0x14a   :  { %162 = vmatmul.mubr.msk.bf16.vlgmr.msra.gmra.mxu0 %vm86_vm4, %v62_v25 }
 0x20a   :  { %v124_v27 = vpop.f32.mrf.mxu0 }
 0x20b   :  { %v125_v28 = vadd.f32 %v150_v26, %v124_v27 }
 0x20c   :  { %v163_v29 = vpop.f32.mrf.mxu0 }
 0x20d   :  { %v131_v30 = vsel %vm130_vm5, %v125_v28, -inf }
 0x20e   :  { %132 = vmax.xlane.f32.xlu1 %v131_v30  ;;  %v127_v31 = vpop.f32.mrf.mxu0 }
 0x210   :  { %v164_v32 = vpop.f32.mrf.mxu0 }
 0x297   :  { %v133_v33 = vpop.xlane.xlu1 %132 }
 0x298   :  { %v134_v34 = vsub.f32 %v125_v28, %v133_v33 }
 0x29a   :  { %v135_v35 = vmul.f32 1.442695, %v134_v34 }
 0x29c   :  { %173 = vpow2.f32 %v135_v35 }
 0x2a9   :  { %v174_v36 = vpop.eup %173 }
 0x2aa   :  { %v137_v37 = vsel %vm130_vm5, %v174_v36, 0.0 }
 0x2ab   :  { %138 = vadd.xlane.f32.xlu1 %v137_v37 }
 0x334   :  { %v139_v38 = vpop.xlane.xlu1 %138 }
 0x335   :  { %175 = vlog2.f32 %v139_v38 }
 0x342   :  { %v176_v39 = vpop.eup %175 }
 0x343   :  { %v141_v40 = vmul.f32 0.6931472, %v176_v39 }
 0x345   :  { %v142_v41 = vsub.f32 %v134_v34, %v141_v40 }
 0x347   :  { %143 = vst.msk [vmem:[%s238_s5] sm:$0x3] %vm130_vm5, %v142_v41 }

// kernel: closed_call.83
= control target key start
LH: loop header
LB: loop body
LE: loop exit
PB: predicated region body
PF: predicated region fallthrough
CT: control target
= control target key end

     0   :  { %vm43_vm0 = vcmask 254976   ;;  %v1627_v8 = vmov 0.0   ;;  %vm1628_vm1 = vmmov 0   ;;  %vm104_vm4 = vcmask 261120   ;;  %s1633_s20 = smov 104   ;;  %s1634_s21 = smov 48   ;;  %s2171_s0 = inlined_call_operand.vmem [shape: bf16[2,32], index: 0, kind: input, shape index: {}]   ;;  %s2172_s6 = inlined_call_operand.vmem [shape: bf16[32,96], index: 6, kind: input, shape index: {}]   ;;  %s2173_s4 = inlined_call_operand.vmem [shape: f32[1,32], index: 4, kind: input, shape index: {}]   ;;  %s2174_s5 = inlined_call_operand.vmem [shape: f32[1,32], index: 5, kind: input, shape index: {}]   ;;  %s2175_s1 = inlined_call_operand.vmem [shape: bf16[2,6,32], index: 1, kind: input, shape index: {}]   ;;  %s2176_s7 = inlined_call_operand.vmem [shape: f32[1,96], index: 7, kind: input, shape index: {}]   ;;  %s2177_s3 = inlined_call_operand.vmem [shape: f32[1,6], index: 3, kind: input, shape index: {}]   ;;  %s2178_s2 = inlined_call_operand.vmem [shape: bf16[2,6,32], index: 2, kind: input, shape index: {}]   ;;  %s2179_s8 = inlined_call_operand.vmem [shape: bf16[32,32], index: 8, kind: input, shape index: {}]   ;;  %s2180_s11 = inlined_call_operand.vmem [shape: bf16[2,32], index: 11, kind: output, shape index: {1}]   ;;  %s2181_s12 = inlined_call_operand.vmem [shape: bf16[2,32], index: 12, kind: output, shape index: {2}]   ;;  %s2182_s9 = inlined_call_operand.vmem [shape: f32[1,32], index: 9, kind: input, shape index: {}]   ;;  %s2183_s10 = inlined_call_operand.vmem [shape: bf16[2,32], index: 10, kind: output, shape index: {0}]  }
   0x1   :  { %v39_v0 = vld [vmem:[%s2171_s0] sm:$0x1]  ;;  %1441 = vmatprep.subr.bf16.mxu0 %v1627_v8  ;;  %v1567_v9 = vld [vmem:[%s2172_s6 + $0x8] sm:$0xff]   ;;  %1445 = vmatprep.mubr.msk.bf16.mxu0 %vm1628_vm1, %v1627_v8  ;;  %vm205_vm5 = vcmask 64512   ;;  %v1746_v28 = vld [vmem:[%s2175_s1 + $0x4] sm:$0x7]  ;;  %v153_v32 = vlaneseq }
   0x2   :  { %v1709_v1 = vunpack.c.l.bf16 %v39_v0  ;;  %1449 = vmatprep.subr.bf16.mxu1 %v1627_v8  ;;  %1451 = vmatprep.mubr.msk.bf16.mxu1 %vm1628_vm1, %v1627_v8  ;;  %v1568_v10 = vld [vmem:[%s2172_s6] sm:$0xff]   ;;  %v256_v29 = vsel %vm205_vm5, %v1746_v28, 0  ;;  %v1629_v30 = vmov 1966171168   ;;  %vm313_vm6 = vcmask 57344   ;;  %s1635_s22 = smov 56  }
   0x3   :  { %1442 = vmatpush3.bf16.msra.mxu0 %v1567_v9  ;;  %v1373_v19 = vld [vmem:[%s2173_s4] ss:$0 sm:$0xff]  ;;  %v151_v31 = vunpack.c.l.s4 %v1629_v30  ;;  %v1752_v34 = vshrl.u32 %v153_v32, 7  ;;  %vm322_vm8 = vcmask 40960   ;;  %vm375_vm9 = vcmask 1042432   ;;  %s1636_s23 = smov 40  }
   0x4   :  { %v44_v2 = vsel %vm43_vm0, %v1709_v1, 0.0  ;;  %1443 = vmatprep.subr.bf16.mxu0 %v1627_v8  ;;  %v1374_v22 = vld [vmem:[%s2174_s5] ss:$0 sm:$0xff]  ;;  %vm371_vm10 = vcmask 48128   ;;  %s1637_s24 = smov 64   ;;  %vm1262_vm11 = vcmask 1041409  }
   0x5   :  { %45 = vadd.xlane.f32.xlu0 %v44_v2  ;;  %v1739_v26 = vld [vmem:[%s2175_s1] sm:$0x7]  ;;  %v152_v33 = vunpack.c.0.s8 %v151_v31  ;;  %s1630_s1 = smov 96   ;;  %s1638_s0 = smov 8   ;;  %vm167_vm12 = vcmask 253952   ;;  %vm1287_vm13 = vcmask 130048  }
   0x6   :  { %v210_v27 = vsel %vm205_vm5, %v1739_v26, 0  ;;  %v1375_v35 = vld [vmem:[%s2176_s7] ss:$0 sm:$0xff]  ;;  %s1631_s7 = smov 120   ;;  %s1639_s25 = smov 16   ;;  %vm1289_vm14 = vcmask 195584  }
   0x7   :  { %1444 = vmatpush3.bf16.msra.mxu0 %v1568_v10  ;;  %1450 = vmatpush3.bf16.xpose.msra.mxu1 %v210_v27  ;;  %v155_v36 = vsub.s32 %v152_v33, %v1752_v34  ;;  %v1793_v58 = vld [vmem:[%s2177_s3] sm:$0x1]  ;;  %v1804_v10 = vcombine.low %v1746_v28, %v1746_v28 }
   0x8   :  { %1455 = vmatprep.subr.bf16.mxu0 %v1627_v8  ;;  %1461 = vmatprep.subr.bf16.mxu1 %v1627_v8  ;;  %vm300_vm7 = vcmp.gt.f32.partialorder %v1793_v58, 0.0 }
  0x8e   :  { %v46_v3 = vpop.xlane.xlu0 %45 }
  0x8f   :  { %v48_v4 = vmul.f32 0.03125, %v46_v3 }
  0x91   :  { %v49_v5 = vsub.f32 %v1709_v1, %v48_v4 }
  0x93   :  { %v50_v6 = vmul.f32 %v49_v5, %v49_v5  ;;  %v62_v20 = vmul.f32 %v1373_v19, %v49_v5 }
  0x95   :  { %v51_v7 = vsel %vm43_vm0, %v50_v6, 0.0 }
  0x96   :  { %52 = vadd.xlane.f32.xlu0 %v51_v7 }
 0x11f   :  { %v53_v11 = vpop.xlane.xlu0 %52 }
 0x120   :  { %v55_v12 = vmul.f32 0.032258064, %v53_v11  ;;  %v1808_v11 = vcombine.low %v1739_v26, %v1739_v26 }
 0x122   :  { %1575 = vrsqrt.f32 %v55_v12  ;;  %vm65_vm2 = vcmp.eq.f32.partialorder %v55_v12, inf  ;;  %v68_v15 = vand.u32 2147483648, %v55_v12  ;;  %vm67_vm3 = vcmp.eq.f32.partialorder %v55_v12, 0.0 }
 0x12f   :  { %v1576_v13 = vpop.eup %1575 }
 0x130   :  { %v64_v14 = vmul.f32 %v1576_v13, %v55_v12  ;;  %v1818_v13 = vld [vmem:[%s2178_s2 + $0x4] sm:$0x7] }
 0x132   :  { %v66_v16 = vsel %vm65_vm2, %v55_v12, %v64_v14  ;;  %v175_v12 = vld [vmem:[%s2178_s2] sm:$0x7]  ;;  %s1632_s2 = smov 112  }
 0x133   :  { %v69_v17 = vsel %vm67_vm3, %v68_v15, %v66_v16  ;;  %v377_v14 = vsel %vm375_vm9, %v175_v12, 0  ;;  %v423_v15 = vsel %vm375_vm9, %v1818_v13, 0  ;;  %v1828_v16 = vsub.s32 0, %v1752_v34 }
 0x134   :  { %v70_v18 = vadd.f32 1e-06, %v69_v17 }
 0x136   :  { %1577 = vrcp.f32 %v70_v18 }
 0x143   :  { %v1578_v21 = vpop.eup %1577 }
 0x144   :  { %v72_v23 = vmul.f32 %v1578_v21, %v62_v20 }
 0x146   :  { %v79_v24 = vadd.f32 %v1374_v22, %v72_v23 }
 0x148   :  { %v80_v25 = vpack.c.bf16 %v79_v24, %v79_v24 }
 0x14a   :  { %1446 = vmatmul.mubr.msk.bf16.vlgmr.msra.gmra.mxu0 %vm104_vm4, %v80_v25 }
 0x14b   :  { %1457 = vmatprep.mubr.msk.bf16.mxu0 %vm1628_vm1, %v1627_v8  ;;  %1456 = vmatpush3.bf16.xpose.msra.mxu0 %v256_v29 }
 0x14c   :  { %1467 = vmatprep.subr.bf16.mxu0 %v1627_v8 }
 0x20a   :  { %v142_v37 = vpop.f32.mrf.mxu0 }
 0x20b   :  { %v143_v38 = vadd.f32 %v1375_v35, %v142_v37 }
 0x20c   :  { %v1447_v39 = vpop.f32.mrf.mxu0 }
 0x20d   :  { %v148_v40 = vpack.c.bf16 %v143_v38, %v143_v38  ;;  %v185_v41 = vrot.slane %v143_v38, %v155_v36 }
 0x20e   :  { %v145_v42 = vpop.f32.mrf.mxu0 }
 0x20f   :  { %v156_v43 = vrot.slane %v148_v40, %v155_v36  ;;  %v186_v44 = vcombine.high %v185_v41, %v185_v41  ;;  %v1758_v45 = vrot.slane %v185_v41, %v155_v36 }
 0x210   :  { %v1448_v46 = vpop.f32.mrf.mxu0 }
 0x211   :  { %v1760_v47 = vrot.slane %v186_v44, %v155_v36  ;;  %v1764_v48 = vpack.c.bf16 %v1758_v45, %v1758_v45  ;;  %v1766_v49 = vrot.slane %v156_v43, %v155_v36 }
 0x213   :  { %1452 = vmatmul.mubr.msk.bf16.vlgmr.msra.gmra.mxu1 %vm205_vm5, %v1764_v48  ;;  %307 = vrot.lane.b32.xlu1 %v1760_v47, %s1630_s1  ;;  %v1774_v50 = vpack.c.bf16 %v1760_v47, %v1760_v47 }
 0x214   :  { %1463 = vmatprep.mubr.msk.bf16.mxu1 %vm1628_vm1, %v1627_v8  ;;  %1462 = vmatpush3.bf16.msra.mxu1 %v377_v14 }
 0x215   :  { %1458 = vmatmul.mubr.msk.bf16.vlgmr.msra.gmra.mxu0 %vm205_vm5, %v1774_v50  ;;  %1473 = vmatprep.subr.bf16.mxu1 %v1627_v8 }
 0x216   :  { %1469 = vmatprep.mubr.msk.bf16.mxu0 %vm1628_vm1, %v1627_v8  ;;  %1468 = vmatpush3.bf16.msra.mxu0 %v423_v15 }
 0x217   :  { %305 = vrot.lane.b32.xlu1 %v1758_v45, %s1630_s1  ;;  %1479 = vmatprep.subr.bf16.mxu0 %v1627_v8 }
 0x285   :  { %v308_v51 = vpop.permute.xlu1 %307 }
 0x286   :  { %v312_v52 = vmul.f32 %v308_v51, %v1760_v47 }
 0x288   :  { %v317_v53 = vsel %vm313_vm6, %v312_v52, 0.0  ;;  %v1833_v17 = vrot.slane %v312_v52, %v1828_v16  ;;  %v1387_v52 = vcombine.low %v175_v12, %v175_v12 }
 0x289   :  { %318 = vadd.xlane.f32.xlu0 %v317_v53  ;;  %v306_v54 = vpop.permute.xlu1 %305 }
 0x28a   :  { %v311_v55 = vmul.f32 %v306_v54, %v1758_v45 }
 0x28c   :  { %v314_v56 = vsel %vm313_vm6, %v311_v55, 0.0  ;;  %v1838_v18 = vrot.slane %v311_v55, %v1828_v16 }
 0x28d   :  { %315 = vadd.xlane.f32.xlu1 %v314_v56 }
 0x29e   :  { %522 = vrot.lane.b32.xlu1 %v1774_v50, %s1631_s7 }
 0x2d3   :  { %v246_v57 = vpop.f32.mrf.mxu1 }
 0x2d4   :  { %v298_v61 = vmul.f32 0.35355338, %v246_v57 }
 0x2d5   :  { %v1453_v59 = vpop.f32.mrf.mxu1  ;;  %v292_v60 = vpop.f32.mrf.mxu0 }
 0x2d6   :  { %v299_v62 = vmul.f32 0.35355338, %v292_v60  ;;  %v303_v6 = vsel %vm300_vm7, %v298_v61, -1e+09 }
 0x2d7   :  { %v249_v63 = vpop.f32.mrf.mxu1  ;;  %v1459_v0 = vpop.f32.mrf.mxu0  ;;  %v323_v9 = vsel %vm322_vm8, %v303_v6, -inf }
 0x2d8   :  { %v304_v2 = vsel %vm300_vm7, %v299_v62, -1e+09 }
 0x2d9   :  { %v1454_v3 = vpop.f32.mrf.mxu1  ;;  %v295_v4 = vpop.f32.mrf.mxu0  ;;  %v326_v5 = vsel %vm322_vm8, %v304_v2, -inf }
 0x2da   :  { %327 = vmax.xlane.f32.xlu0 %v326_v5 }
 0x2db   :  { %v1460_v7 = vpop.f32.mrf.mxu0 }
 0x2de   :  { %324 = vmax.xlane.f32.xlu0 %v323_v9 }
 0x2f4   :  { %527 = vrot.lane.b32.xlu0 %v1804_v10, %s1631_s7 }
 0x2f8   :  { %473 = vrot.lane.b32.xlu0 %v1808_v11, %s1631_s7 }
 0x2fc   :  { %468 = vrot.lane.b32.xlu0 %v1764_v48, %s1631_s7 }
 0x300   :  { %591 = vrot.lane.b32.xlu0 %v1833_v17, %s1631_s7 }
 0x304   :  { %589 = vrot.lane.b32.xlu0 %v1838_v18, %s1631_s7 }
 0x312   :  { %v319_v19 = vpop.xlane.xlu0 %318 }
 0x313   :  { %v1842_v20 = vmul.f32 0.35355338, %v319_v19 }
 0x316   :  { %v316_v21 = vpop.xlane.xlu1 %315 }
 0x317   :  { %v1847_v24 = vmul.f32 0.35355338, %v316_v21 }
 0x31a   :  { %v523_v51 = vpop.permute.xlu1 %522 }
 0x363   :  { %v328_v22 = vpop.xlane.xlu0 %327 }
 0x364   :  { %v1845_v23 = vmax.f32 %v328_v22, %v1842_v20 }
 0x366   :  { %v332_v25 = vsub.f32 %v304_v2, %v1845_v23  ;;  %v338_v26 = vsub.f32 %v1842_v20, %v1845_v23 }
 0x367   :  { %v325_v27 = vpop.xlane.xlu0 %324 }
 0x368   :  { %v335_v28 = vmul.f32 1.442695, %v332_v25  ;;  %v1853_v29 = vmax.f32 %v325_v27, %v1847_v24 }
 0x36a   :  { %1579 = vpow2.f32 %v335_v28  ;;  %v331_v30 = vsub.f32 %v303_v6, %v1853_v29  ;;  %v337_v31 = vsub.f32 %v1847_v24, %v1853_v29  ;;  %v1923_v28 = vcombine.low %v1818_v13, %v1818_v13 }
 0x36b   :  { %v528_v32 = vpop.permute.xlu0 %527 }
 0x36c   :  { %v333_v33 = vmul.f32 1.442695, %v331_v30  ;;  %v533_v38 = vsel %vm205_vm5, %v528_v32, 0 }
 0x36e   :  { %1581 = vpow2.f32 %v333_v33 }
 0x36f   :  { %v474_v34 = vpop.permute.xlu0 %473 }
 0x370   :  { %v479_v43 = vsel %vm205_vm5, %v474_v34, 0 }
 0x373   :  { %v469_v35 = vpop.permute.xlu0 %468 }
 0x377   :  { %v1858_v36 = vpop.eup %1579  ;;  %v592_v37 = vpop.permute.xlu0 %591 }
 0x378   :  { %v598_v39 = vsel %vm313_vm6, %v592_v37, 0.0  ;;  %v354_v40 = vpack.c.bf16 %v1858_v36, %v1858_v36  ;;  %v346_v58 = vsel %vm322_vm8, %v1858_v36, 0.0 }
 0x379   :  { %599 = vadd.xlane.f32.xlu0 %v598_v39 }
 0x37a   :  { %1470 = vmatmul.mubr.msk.bf16.vlgmr.msra.gmra.mxu0 %vm371_vm10, %v354_v40 }
 0x37b   :  { %v1865_v41 = vpop.eup %1581  ;;  %1480 = vmatpush3.bf16.xpose.msra.mxu0 %v533_v38  ;;  %v590_v42 = vpop.permute.xlu0 %589  ;;  %1481 = vmatprep.mubr.msk.bf16.mxu0 %vm1628_vm1, %v1627_v8 }
 0x37c   :  { %v595_v44 = vsel %vm313_vm6, %v590_v42, 0.0  ;;  %v353_v46 = vpack.c.bf16 %v1865_v41, %v1865_v41  ;;  %1491 = vmatprep.subr.bf16.mxu0 %v1627_v8 }
 0x37d   :  { %596 = vadd.xlane.f32.xlu1 %v595_v44 }
 0x37e   :  { %1464 = vmatmul.mubr.msk.bf16.vlgmr.msra.gmra.mxu1 %vm371_vm10, %v353_v46 }
 0x37f   :  { %1474 = vmatpush3.bf16.xpose.msra.mxu1 %v479_v43  ;;  %1475 = vmatprep.mubr.msk.bf16.mxu1 %vm1628_vm1, %v1627_v8 }
 0x380   :  { %1485 = vmatprep.subr.bf16.mxu1 %v1627_v8 }
 0x382   :  { %1482 = vmatmul.mubr.msk.bf16.vlgmr.msra.gmra.mxu0 %vm205_vm5, %v523_v51 }
 0x383   :  { %1493 = vmatprep.mubr.msk.bf16.mxu0 %vm1628_vm1, %v1627_v8 }
 0x386   :  { %1476 = vmatmul.mubr.msk.bf16.vlgmr.msra.gmra.mxu1 %vm205_vm5, %v469_v35 }
 0x387   :  { %1487 = vmatprep.mubr.msk.bf16.mxu1 %vm1628_vm1, %v1627_v8 }
 0x38e   :  { %646 = vrot.lane.b32.xlu1 %v1387_v52, %s1631_s7 }
 0x392   :  { %799 = vrot.lane.b32.xlu1 %v1804_v10, %s1632_s2 }
 0x396   :  { %749 = vrot.lane.b32.xlu1 %v1808_v11, %s1632_s2 }
 0x39a   :  { %747 = vrot.lane.b32.xlu1 %v1764_v48, %s1632_s2 }
 0x39e   :  { %851 = vrot.lane.b32.xlu1 %v1838_v18, %s1632_s2 }
 0x402   :  { %v600_v38 = vpop.xlane.xlu0 %599 }
 0x403   :  { %v1941_v43 = vmul.f32 0.35355338, %v600_v38 }
 0x406   :  { %v597_v53 = vpop.xlane.xlu1 %596 }
 0x407   :  { %v601_v39 = vmul.f32 0.35355338, %v597_v53 }
 0x40a   :  { %v647_v54 = vpop.permute.xlu1 %646 }
 0x40b   :  { %v652_v55 = vsel %vm375_vm9, %v647_v54, 0 }
 0x40c   :  { %1486 = vmatpush3.bf16.msra.mxu1 %v652_v55 }
 0x40d   :  { %1497 = vmatprep.subr.bf16.mxu1 %v1627_v8 }
 0x40e   :  { %v1895_v56 = vpop.permute.xlu1 %799 }
 0x412   :  { %v1897_v57 = vpop.permute.xlu1 %749 }
 0x416   :  { %v1899_v59 = vpop.permute.xlu1 %747 }
 0x41a   :  { %v852_v60 = vpop.permute.xlu1 %851 }
 0x41b   :  { %v857_v61 = vsel %vm313_vm6, %v852_v60, 0.0 }
 0x41c   :  { %858 = vadd.xlane.f32.xlu1 %v857_v61 }
 0x42d   :  { %905 = vrot.lane.b32.xlu1 %v1387_v52, %s1632_s2 }
 0x431   :  { %1055 = vrot.lane.b32.xlu1 %v1804_v10, %s1633_s20 }
 0x435   :  { %1005 = vrot.lane.b32.xlu1 %v1808_v11, %s1633_s20 }
 0x439   :  { %1003 = vrot.lane.b32.xlu1 %v1764_v48, %s1633_s20 }
 0x43a   :  { %v1909_v62 = vpop.f32.mrf.mxu0 }
 0x43c   :  { %v1471_v63 = vpop.f32.mrf.mxu0 }
 0x43d   :  { %1107 = vrot.lane.b32.xlu1 %v1838_v18, %s1633_s20 }
 0x43e   :  { %v1913_v0 = vpop.f32.mrf.mxu1  ;;  %v462_v2 = vpop.f32.mrf.mxu0 }
 0x440   :  { %v1465_v3 = vpop.f32.mrf.mxu1  ;;  %v1472_v4 = vpop.f32.mrf.mxu0 }
 0x442   :  { %v416_v5 = vpop.f32.mrf.mxu1  ;;  %v569_v6 = vpop.f32.mrf.mxu0 }
 0x443   :  { %v576_v12 = vmul.f32 0.35355338, %v569_v6  ;;  %v755_v6 = vsel %vm205_vm5, %v1897_v57, 0 }
 0x444   :  { %v1466_v7 = vpop.f32.mrf.mxu1  ;;  %v1483_v9 = vpop.f32.mrf.mxu0 }
 0x445   :  { %v578_v22 = vsel %vm300_vm7, %v576_v12, -1e+09 }
 0x446   :  { %v515_v10 = vpop.f32.mrf.mxu1  ;;  %v572_v11 = vpop.f32.mrf.mxu0  ;;  %v606_v27 = vsel %vm322_vm8, %v578_v22, -inf }
 0x447   :  { %v575_v14 = vmul.f32 0.35355338, %v515_v10  ;;  %v805_v11 = vsel %vm205_vm5, %v1895_v56, 0  ;;  %v1980_v56 = vrot.slane %v1760_v47, %v1828_v16 }
 0x448   :  { %v1477_v48 = vpop.f32.mrf.mxu1  ;;  %v1484_v15 = vpop.f32.mrf.mxu0 }
 0x449   :  { %v577_v19 = vsel %vm300_vm7, %v575_v14, -1e+09 }
 0x44a   :  { %v518_v21 = vpop.f32.mrf.mxu1  ;;  %v603_v18 = vsel %vm322_vm8, %v577_v19, -inf }
 0x44b   :  { %604 = vmax.xlane.f32.xlu0 %v603_v18 }
 0x44c   :  { %v1478_v25 = vpop.f32.mrf.mxu1 }
 0x44f   :  { %607 = vmax.xlane.f32.xlu0 %v606_v27 }
 0x465   :  { %697 = vrot.lane.b32.xlu0 %v1923_v28, %s1631_s7 }
 0x469   :  { %797 = vrot.lane.b32.xlu0 %v1774_v50, %s1632_s2 }
 0x46d   :  { %853 = vrot.lane.b32.xlu0 %v1833_v17, %s1632_s2 }
 0x4a5   :  { %v1931_v30 = vpop.xlane.xlu1 %858 }
 0x4a9   :  { %v906_v32 = vpop.permute.xlu1 %905 }
 0x4aa   :  { %v911_v12 = vsel %vm375_vm9, %v906_v32, 0 }
 0x4ad   :  { %v1933_v33 = vpop.permute.xlu1 %1055 }
 0x4b1   :  { %v1935_v34 = vpop.permute.xlu1 %1005 }
 0x4b5   :  { %v1937_v35 = vpop.permute.xlu1 %1003 }
 0x4b9   :  { %v1108_v13 = vpop.permute.xlu1 %1107 }
 0x4ba   :  { %v1113_v37 = vsel %vm313_vm6, %v1108_v13, 0.0 }
 0x4bb   :  { %1114 = vadd.xlane.f32.xlu1 %v1113_v37 }
 0x4cc   :  { %1161 = vrot.lane.b32.xlu1 %v1387_v52, %s1633_s20 }
 0x4d4   :  { %v605_v40 = vpop.xlane.xlu0 %604 }
 0x4d5   :  { %v609_v42 = vmax.f32 %v605_v40, %v601_v39 }
 0x4d7   :  { %v611_v44 = vsub.f32 %v577_v19, %v609_v42  ;;  %v617_v46 = vsub.f32 %v601_v39, %v609_v42 }
 0x4d8   :  { %v608_v51 = vpop.xlane.xlu0 %607 }
 0x4d9   :  { %v613_v54 = vmul.f32 1.442695, %v611_v44  ;;  %v1944_v55 = vmax.f32 %v608_v51, %v1941_v43  ;;  %v619_v48 = vmul.f32 1.442695, %v617_v46 }
 0x4db   :  { %1583 = vpow2.f32 %v613_v54  ;;  %v612_v60 = vsub.f32 %v578_v22, %v1944_v55  ;;  %v618_v61 = vsub.f32 %v1941_v43, %v1944_v55 }
 0x4dc   :  { %v698_v52 = vpop.permute.xlu0 %697 }
 0x4dd   :  { %v615_v63 = vmul.f32 1.442695, %v612_v60  ;;  %v703_v53 = vsel %vm375_vm9, %v698_v52, 0 }
 0x4de   :  { %1492 = vmatpush3.bf16.msra.mxu0 %v703_v53 }
 0x4df   :  { %1585 = vpow2.f32 %v615_v63  ;;  %1503 = vmatprep.subr.bf16.mxu0 %v1627_v8 }
 0x4e0   :  { %v798_v2 = vpop.permute.xlu0 %797  ;;  %1587 = vpow2.f32 %v619_v48 }
 0x4e4   :  { %v854_v3 = vpop.permute.xlu0 %853 }
 0x4e5   :  { %v860_v4 = vsel %vm313_vm6, %v854_v3, 0.0 }
 0x4e6   :  { %861 = vadd.xlane.f32.xlu0 %v860_v4 }
 0x4e8   :  { %v1952_v5 = vpop.eup %1583 }
 0x4e9   :  { %v633_v7 = vpack.c.bf16 %v1952_v5, %v1952_v5 }
 0x4eb   :  { %1488 = vmatmul.mubr.msk.bf16.vlgmr.msra.gmra.mxu1 %vm371_vm10, %v633_v7 }
 0x4ec   :  { %v1586_v9 = vpop.eup %1585  ;;  %1498 = vmatpush3.bf16.xpose.msra.mxu1 %v755_v6  ;;  %1499 = vmatprep.mubr.msk.bf16.mxu1 %vm1628_vm1, %v1627_v8 }
 0x4ed   :  { %v634_v10 = vpack.c.bf16 %v1586_v9, %v1586_v9  ;;  %1509 = vmatprep.subr.bf16.mxu1 %v1627_v8  ;;  %v626_v57 = vsel %vm322_vm8, %v1586_v9, 0.0  ;;  %v2020_v9 = vmul.f32 0.35355338, %v1931_v30 }
 0x4ef   :  { %1494 = vmatmul.mubr.msk.bf16.vlgmr.msra.gmra.mxu0 %vm371_vm10, %v634_v10 }
 0x4f0   :  { %1504 = vmatpush3.bf16.xpose.msra.mxu0 %v805_v11  ;;  %627 = vadd.xlane.f32.xlu1 %v626_v57 }
 0x4f1   :  { %1505 = vmatprep.mubr.msk.bf16.mxu0 %vm1628_vm1, %v1627_v8  ;;  %1515 = vmatprep.subr.bf16.mxu0 %v1627_v8 }
 0x4f3   :  { %1500 = vmatmul.mubr.msk.bf16.vlgmr.msra.gmra.mxu1 %vm205_vm5, %v1899_v59  ;;  %v1986_v59 = vrot.slane %v1758_v45, %v1828_v16  ;;  %v2000_v16 = vpop.eup %1587 }
 0x4f4   :  { %1510 = vmatpush3.bf16.msra.mxu1 %v911_v12  ;;  %1511 = vmatprep.mubr.msk.bf16.mxu1 %vm1628_vm1, %v1627_v8 }
 0x4f5   :  { %1521 = vmatprep.subr.bf16.mxu1 %v1627_v8 }
 0x4f7   :  { %1506 = vmatmul.mubr.msk.bf16.vlgmr.msra.gmra.mxu0 %vm205_vm5, %v798_v2 }
 0x4f8   :  { %1517 = vmatprep.mubr.msk.bf16.mxu0 %vm1628_vm1, %v1627_v8 }
 0x501   :  { %899 = vrot.lane.b32.xlu1 %v1980_v56, %s1634_s21 }
 0x505   :  { %635 = vrot.lane.b32.xlu1 %v1986_v59, %s1635_s22 }
 0x509   :  { %1155 = vrot.lane.b32.xlu1 %v1980_v56, %s1636_s23 }
 0x544   :  { %v1992_v14 = vpop.xlane.xlu1 %1114 }
 0x548   :  { %v1994_v47 = vpop.permute.xlu1 %1161 }
 0x56f   :  { %v862_v7 = vpop.xlane.xlu0 %861 }
 0x570   :  { %v864_v57 = vmul.f32 0.35355338, %v862_v7 }
 0x579   :  { %v1996_v15 = vpop.xlane.xlu1 %627 }
 0x57d   :  { %v1998_v19 = vpop.permute.xlu1 %899 }
 0x581   :  { %v636_v45 = vpop.permute.xlu1 %635 }
 0x582   :  { %v641_v21 = vmul.f32 %v2000_v16, %v636_v45 }
 0x5ab   :  { %v688_v18 = vpop.f32.mrf.mxu1 }
 0x5ac   :  { %v2003_v22 = vadd.f32 %v688_v18, %v641_v21 }
 0x5ad   :  { %v1489_v25 = vpop.f32.mrf.mxu1 }
 0x5af   :  { %v691_v27 = vpop.f32.mrf.mxu1  ;;  %v2005_v32 = vpop.f32.mrf.mxu0 }
 0x5b1   :  { %v1490_v13 = vpop.f32.mrf.mxu1  ;;  %v1495_v37 = vpop.f32.mrf.mxu0 }
 0x5b3   :  { %v742_v38 = vpop.f32.mrf.mxu0  ;;  %v791_v39 = vpop.f32.mrf.mxu1 }
 0x5b4   :  { %v847_v40 = vmul.f32 0.35355338, %v791_v39 }
 0x5b5   :  { %v1496_v42 = vpop.f32.mrf.mxu0  ;;  %v1501_v44 = vpop.f32.mrf.mxu1 }
 0x5b6   :  { %v849_v46 = vsel %vm300_vm7, %v847_v40, -1e+09  ;;  %v1011_v40 = vsel %vm205_vm5, %v1935_v34, 0  ;;  %v1167_v34 = vsel %vm375_vm9, %v1994_v47, 0 }
 0x5b7   :  { %v794_v51 = vpop.f32.mrf.mxu1  ;;  %v841_v54 = vpop.f32.mrf.mxu0  ;;  %v865_v60 = vsel %vm322_vm8, %v849_v46, -inf }
 0x5b8   :  { %v848_v52 = vmul.f32 0.35355338, %v841_v54  ;;  %866 = vmax.xlane.f32.xlu0 %v865_v60  ;;  %v1061_v51 = vsel %vm205_vm5, %v1933_v33, 0 }
 0x5b9   :  { %v1502_v63 = vpop.f32.mrf.mxu1  ;;  %v1507_v53 = vpop.f32.mrf.mxu0 }
 0x5ba   :  { %v850_v2 = vsel %vm300_vm7, %v848_v52, -1e+09 }
 0x5bb   :  { %v844_v3 = vpop.f32.mrf.mxu0  ;;  %v868_v4 = vsel %vm322_vm8, %v850_v2, -inf }
 0x5bc   :  { %869 = vmax.xlane.f32.xlu0 %v868_v4 }
 0x5bd   :  { %v1508_v6 = vpop.f32.mrf.mxu0 }
 0x5d2   :  { %953 = vrot.lane.b32.xlu0 %v1923_v28, %s1632_s2 }
 0x5d6   :  { %1053 = vrot.lane.b32.xlu0 %v1774_v50, %s1633_s20 }
 0x5da   :  { %1109 = vrot.lane.b32.xlu0 %v1833_v17, %s1633_s20 }
 0x641   :  { %v867_v10 = vpop.xlane.xlu0 %866 }
 0x642   :  { %v2023_v11 = vmax.f32 %v867_v10, %v2020_v9 }
 0x644   :  { %v873_v12 = vsub.f32 %v849_v46, %v2023_v11  ;;  %v879_v48 = vsub.f32 %v2020_v9, %v2023_v11 }
 0x645   :  { %v870_v45 = vpop.xlane.xlu0 %869 }
 0x646   :  { %v875_v21 = vmul.f32 1.442695, %v873_v12  ;;  %v872_v50 = vmax.f32 %v870_v45, %v864_v57 }
 0x648   :  { %1589 = vpow2.f32 %v875_v21  ;;  %v874_v18 = vsub.f32 %v850_v2, %v872_v50  ;;  %v880_v17 = vsub.f32 %v864_v57, %v872_v50 }
 0x649   :  { %v954_v25 = vpop.permute.xlu0 %953 }
 0x64a   :  { %v877_v27 = vmul.f32 1.442695, %v874_v18  ;;  %v959_v30 = vsel %vm375_vm9, %v954_v25, 0  ;;  %v883_v33 = vmul.f32 1.442695, %v880_v17 }
 0x64b   :  { %1516 = vmatpush3.bf16.msra.mxu0 %v959_v30 }
 0x64c   :  { %1591 = vpow2.f32 %v877_v27  ;;  %1527 = vmatprep.subr.bf16.mxu0 %v1627_v8 }
 0x64d   :  { %v1054_v13 = vpop.permute.xlu0 %1053  ;;  %1593 = vpow2.f32 %v883_v33 }
 0x651   :  { %v1110_v37 = vpop.permute.xlu0 %1109 }
 0x652   :  { %v1116_v38 = vsel %vm313_vm6, %v1110_v37, 0.0 }
 0x653   :  { %1117 = vadd.xlane.f32.xlu0 %v1116_v38  ;;  %v623_v38 = vsel %vm322_vm8, %v1952_v5, 0.0 }
 0x655   :  { %v1590_v39 = vpop.eup %1589 }
 0x656   :  { %v895_v42 = vpack.c.bf16 %v1590_v39, %v1590_v39 }
 0x658   :  { %1512 = vmatmul.mubr.msk.bf16.vlgmr.msra.gmra.mxu1 %vm371_vm10, %v895_v42  ;;  %v2080_v42 = vmul.f32 0.35355338, %v1992_v14 }
 0x659   :  { %v1592_v44 = vpop.eup %1591  ;;  %1522 = vmatpush3.bf16.xpose.msra.mxu1 %v1011_v40  ;;  %1523 = vmatprep.mubr.msk.bf16.mxu1 %vm1628_vm1, %v1627_v8  ;;  %v885_v40 = vsel %vm322_vm8, %v1590_v39, 0.0 }
 0x65a   :  { %v896_v46 = vpack.c.bf16 %v1592_v44, %v1592_v44  ;;  %1533 = vmatprep.subr.bf16.mxu1 %v1627_v8  ;;  %v2053_v54 = vpop.eup %1593  ;;  %v888_v37 = vsel %vm322_vm8, %v1592_v44, 0.0 }
 0x65c   :  { %1518 = vmatmul.mubr.msk.bf16.vlgmr.msra.gmra.mxu0 %vm371_vm10, %v896_v46 }
 0x65d   :  { %1528 = vmatpush3.bf16.xpose.msra.mxu0 %v1061_v51  ;;  %1529 = vmatprep.mubr.msk.bf16.mxu0 %vm1628_vm1, %v1627_v8 }
 0x65e   :  { %1539 = vmatprep.subr.bf16.mxu0 %v1627_v8 }
 0x660   :  { %1524 = vmatmul.mubr.msk.bf16.vlgmr.msra.gmra.mxu1 %vm205_vm5, %v1937_v35  ;;  %v904_v35 = vmul.f32 %v2053_v54, %v1998_v19 }
 0x661   :  { %1534 = vmatpush3.bf16.msra.mxu1 %v1167_v34  ;;  %1535 = vmatprep.mubr.msk.bf16.mxu1 %vm1628_vm1, %v1627_v8 }
 0x662   :  { %1545 = vmatprep.subr.bf16.mxu1 %v1627_v8 }
 0x664   :  { %1530 = vmatmul.mubr.msk.bf16.vlgmr.msra.gmra.mxu0 %vm205_vm5, %v1054_v13 }
 0x665   :  { %1541 = vmatprep.mubr.msk.bf16.mxu0 %vm1628_vm1, %v1627_v8 }
 0x718   :  { %v2055_v47 = vpop.f32.mrf.mxu1 }
 0x71a   :  { %v1513_v60 = vpop.f32.mrf.mxu1 }
 0x71c   :  { %v950_v52 = vpop.f32.mrf.mxu1  ;;  %v995_v63 = vpop.f32.mrf.mxu0 }
 0x71d   :  { %v2059_v53 = vadd.f32 %v995_v63, %v904_v35 }
 0x71e   :  { %v1514_v2 = vpop.f32.mrf.mxu1  ;;  %v1519_v3 = vpop.f32.mrf.mxu0 }
 0x720   :  { %v998_v4 = vpop.f32.mrf.mxu0  ;;  %v1047_v6 = vpop.f32.mrf.mxu1 }
 0x721   :  { %v1103_v7 = vmul.f32 0.35355338, %v1047_v6 }
 0x722   :  { %v1520_v10 = vpop.f32.mrf.mxu0  ;;  %v1525_v57 = vpop.f32.mrf.mxu1 }
 0x723   :  { %v1105_v12 = vsel %vm300_vm7, %v1103_v7, -1e+09  ;;  %v621_v10 = vmul.f32 1.442695, %v618_v61  ;;  %v881_v57 = vmul.f32 1.442695, %v879_v48 }
 0x724   :  { %v1050_v45 = vpop.f32.mrf.mxu1  ;;  %v1097_v21 = vpop.f32.mrf.mxu0  ;;  %v1121_v50 = vsel %vm322_vm8, %v1105_v12, -inf }
 0x725   :  { %v1104_v18 = vmul.f32 0.35355338, %v1097_v21  ;;  %1122 = vmax.xlane.f32.xlu0 %v1121_v50 }
 0x726   :  { %v1526_v19 = vpop.f32.mrf.mxu1  ;;  %v1531_v17 = vpop.f32.mrf.mxu0 }
 0x727   :  { %v1106_v25 = vsel %vm300_vm7, %v1104_v18, -1e+09 }
 0x728   :  { %v1100_v27 = vpop.f32.mrf.mxu0  ;;  %v1124_v30 = vsel %vm322_vm8, %v1106_v25, -inf }
 0x729   :  { %1125 = vmax.xlane.f32.xlu0 %v1124_v30 }
 0x72a   :  { %v1532_v13 = vpop.f32.mrf.mxu0 }
 0x73f   :  { %1209 = vrot.lane.b32.xlu0 %v1923_v28, %s1633_s20  ;;  %v1118_v28 = vpop.xlane.xlu0 %1117 }
 0x740   :  { %v2085_v39 = vmul.f32 0.35355338, %v1118_v28 }
 0x75e   :  { %889 = vadd.xlane.f32.xlu0 %v888_v37 }
 0x762   :  { %624 = vadd.xlane.f32.xlu0 %v623_v38 }
 0x766   :  { %886 = vadd.xlane.f32.xlu0 %v885_v40 }
 0x77c   :  { %637 = vrot.lane.b32.xlu0 %v1980_v56, %s1635_s22 }
 0x780   :  { %897 = vrot.lane.b32.xlu0 %v1986_v59, %s1634_s21 }
 0x79f   :  { %347 = vadd.xlane.f32.xlu0 %v346_v58 }
 0x7ae   :  { %v1123_v44 = vpop.xlane.xlu0 %1122 }
 0x7af   :  { %v2083_v5 = vmax.f32 %v1123_v44, %v2080_v42 }
 0x7b1   :  { %v1129_v46 = vsub.f32 %v1105_v12, %v2083_v5  ;;  %v1135_v51 = vsub.f32 %v2080_v42, %v2083_v5 }
 0x7b2   :  { %v1126_v34 = vpop.xlane.xlu0 %1125 }
 0x7b3   :  { %v1131_v33 = vmul.f32 1.442695, %v1129_v46  ;;  %v2091_v36 = vmax.f32 %v1126_v34, %v2085_v39  ;;  %v341_v46 = vmul.f32 1.442695, %v338_v26  ;;  %v1156_v34 = vpop.permute.xlu1 %1155 }
 0x7b5   :  { %1595 = vpow2.f32 %v1131_v33  ;;  %v1130_v14 = vsub.f32 %v1106_v25, %v2091_v36  ;;  %v1136_v60 = vsub.f32 %v2085_v39, %v2091_v36  ;;  %365 = vrot.lane.b32.xlu0 %v1980_v56, %s1637_s24 }
 0x7b6   :  { %v1210_v35 = vpop.permute.xlu0 %1209 }
 0x7b7   :  { %v1133_v52 = vmul.f32 1.442695, %v1130_v14  ;;  %v1215_v63 = vsel %vm375_vm9, %v1210_v35, 0 }
 0x7b8   :  { %1540 = vmatpush3.bf16.msra.mxu0 %v1215_v63 }
 0x7b9   :  { %1597 = vpow2.f32 %v1133_v52 }
 0x7ba   :  { %1599 = vpow2.f32 %v621_v10 }
 0x7bb   :  { %1601 = vpow2.f32 %v881_v57 }
 0x7c2   :  { %v1596_v2 = vpop.eup %1595 }
 0x7c3   :  { %v1141_v3 = vsel %vm322_vm8, %v1596_v2, 0.0  ;;  %v1151_v4 = vpack.c.bf16 %v1596_v2, %v1596_v2 }
 0x7c4   :  { %1142 = vadd.xlane.f32.xlu1 %v1141_v3 }
 0x7c5   :  { %1536 = vmatmul.mubr.msk.bf16.vlgmr.msra.gmra.mxu1 %vm371_vm10, %v1151_v4 }
 0x7c6   :  { %v1598_v6 = vpop.eup %1597  ;;  %1549 = vmatprep.mubr.msk.bf16.mxu1 %vm1628_vm1, %v1627_v8 }
 0x7c7   :  { %v1144_v7 = vsel %vm322_vm8, %v1598_v6, 0.0  ;;  %v1152_v56 = vpack.c.bf16 %v1598_v6, %v1598_v6  ;;  %v1600_v12 = vpop.eup %1599 }
 0x7c8   :  { %1145 = vadd.xlane.f32.xlu1 %v1144_v7  ;;  %v630_v45 = vadd.f32 %v1600_v12, %v1996_v15  ;;  %v1602_v55 = vpop.eup %1601 }
 0x7c9   :  { %1542 = vmatmul.mubr.msk.bf16.vlgmr.msra.gmra.mxu0 %vm371_vm10, %v1152_v56 }
 0x7ca   :  { %1603 = vrcp.f32 %v630_v45 }
 0x7d7   :  { %v1604_v11 = vpop.eup %1603 }
 0x7d9   :  { %1153 = vrot.lane.b32.xlu1 %v1986_v59, %s1636_s23 }
 0x7e7   :  { %v890_v21 = vpop.xlane.xlu0 %889 }
 0x7e8   :  { %v892_v50 = vadd.f32 %v2053_v54, %v890_v21 }
 0x7ea   :  { %1605 = vrcp.f32 %v892_v50 }
 0x7eb   :  { %v625_v18 = vpop.xlane.xlu0 %624 }
 0x7ec   :  { %v629_v43 = vadd.f32 %v2000_v16, %v625_v18  ;;  %v343_v16 = vsel %vm322_vm8, %v1865_v41, 0.0  ;;  %v1573_v41 = vld [vmem:[%s2179_s8 + $0x8] sm:$0xff]  }
 0x7ed   :  { %1546 = vmatpush3.bf16.msra.mxu1 %v1573_v41 }
 0x7ee   :  { %1607 = vrcp.f32 %v629_v43  ;;  %1547 = vmatprep.subr.bf16.mxu1 %v1627_v8  ;;  %v339_v8 = vmul.f32 1.442695, %v337_v31 }
 0x7ef   :  { %v887_v61 = vpop.xlane.xlu0 %886 }
 0x7f0   :  { %v891_v19 = vadd.f32 %v1602_v55, %v887_v61 }
 0x7f2   :  { %1609 = vrcp.f32 %v891_v19 }
 0x7f3   :  { %v638_v17 = vpop.permute.xlu0 %637 }
 0x7f4   :  { %v642_v9 = vmul.f32 %v1600_v12, %v638_v17 }
 0x7f6   :  { %v740_v48 = vadd.f32 %v2005_v32, %v642_v9 }
 0x7f7   :  { %v1606_v25 = vpop.eup %1605  ;;  %v898_v15 = vpop.permute.xlu0 %897 }
 0x7f8   :  { %v746_v27 = vmul.f32 %v1604_v11, %v740_v48  ;;  %v1002_v54 = vmul.f32 %v1606_v25, %v2059_v53  ;;  %v903_v30 = vmul.f32 %v1602_v55, %v898_v15 }
 0x7fa   :  { %v1267_v37 = vrot.slane %v746_v27, 7  ;;  %v948_v40 = vadd.f32 %v2055_v47, %v903_v30  ;;  %v1274_v44 = vrot.slane %v1002_v54, 7  ;;  %v1137_v47 = vmul.f32 1.442695, %v1135_v51 }
 0x7fb   :  { %v1608_v13 = vpop.eup %1607 }
 0x7fc   :  { %v745_v38 = vmul.f32 %v1608_v13, %v2003_v22  ;;  %v1574_v22 = vld [vmem:[%s2179_s8] sm:$0xff]   ;;  %s1640_s8 = smov 24  }
 0x7fd   :  { %344 = vadd.xlane.f32.xlu1 %v343_v16  ;;  %1548 = vmatpush3.bf16.msra.mxu1 %v1574_v22 }
 0x7fe   :  { %v1268_v58 = vsel %vm1262_vm11, %v1267_v37, %v745_v38 }
 0x7ff   :  { %v1610_v32 = vpop.eup %1609  ;;  %1269 = vrot.lane.b32.xlu0 %v1268_v58, %s1638_s0 }
 0x800   :  { %v1001_v28 = vmul.f32 %v1610_v32, %v948_v40 }
 0x802   :  { %v1275_v53 = vsel %vm1262_vm11, %v1274_v44, %v1001_v28 }
 0x80e   :  { %363 = vrot.lane.b32.xlu1 %v1986_v59, %s1637_s24  ;;  %v1139_v59 = vmul.f32 1.442695, %v1136_v60 }
 0x810   :  { %1611 = vpow2.f32 %v1139_v59 }
 0x811   :  { %1613 = vpow2.f32 %v1137_v47 }
 0x812   :  { %1276 = vrot.lane.b32.xlu1 %v1275_v53, %s1639_s25  ;;  %1615 = vpow2.f32 %v341_v46 }
 0x813   :  { %1617 = vpow2.f32 %v339_v8 }
 0x816   :  { %164 = vrot.lane.b32.xlu1 %v1766_v49, %s1630_s1 }
 0x81d   :  { %v1612_v39 = vpop.eup %1611 }
 0x81e   :  { %v1614_v60 = vpop.eup %1613  ;;  %v1160_v29 = vmul.f32 %v1612_v39, %v1156_v34 }
 0x81f   :  { %v1616_v51 = vpop.eup %1615 }
 0x820   :  { %v1618_v26 = vpop.eup %1617 }
 0x828   :  { %v348_v42 = vpop.xlane.xlu0 %347 }
 0x829   :  { %v350_v35 = vadd.f32 %v1616_v51, %v348_v42 }
 0x82c   :  { %v366_v4 = vpop.permute.xlu0 %365 }
 0x82d   :  { %v370_v18 = vmul.f32 %v1616_v51, %v366_v4 }
 0x82f   :  { %v460_v48 = vadd.f32 %v1909_v62, %v370_v18 }
 0x84d   :  { %v1143_v33 = vpop.xlane.xlu1 %1142 }
 0x84e   :  { %v1147_v5 = vadd.f32 %v1614_v60, %v1143_v33 }
 0x851   :  { %v1146_v14 = vpop.xlane.xlu1 %1145 }
 0x852   :  { %v1148_v36 = vadd.f32 %v1612_v39, %v1146_v14 }
 0x854   :  { %1619 = vrcp.f32 %v1148_v36 }
 0x855   :  { %1621 = vrcp.f32 %v1147_v5  ;;  %v1154_v20 = vpop.permute.xlu1 %1153 }
 0x856   :  { %1623 = vrcp.f32 %v350_v35  ;;  %v1159_v24 = vmul.f32 %v1614_v60, %v1154_v20 }
 0x861   :  { %v1620_v10 = vpop.eup %1619 }
 0x862   :  { %v1622_v50 = vpop.eup %1621 }
 0x863   :  { %v1624_v9 = vpop.eup %1623 }
 0x864   :  { %v466_v15 = vmul.f32 %v1624_v9, %v460_v48 }
 0x866   :  { %v1261_v30 = vrot.slane %v466_v15, 7 }
 0x871   :  { %v1270_v37 = vpop.permute.xlu0 %1269 }
 0x885   :  { %v1203_v23 = vpop.f32.mrf.mxu1 }
 0x886   :  { %v345_v52 = vpop.xlane.xlu1 %344  ;;  %v1204_v6 = vadd.f32 %v1203_v23, %v1159_v24 }
 0x887   :  { %v349_v63 = vadd.f32 %v1618_v26, %v345_v52  ;;  %v1537_v2 = vpop.f32.mrf.mxu1 }
 0x888   :  { %v1257_v55 = vmul.f32 %v1622_v50, %v1204_v6 }
 0x889   :  { %1625 = vrcp.f32 %v349_v63  ;;  %v1206_v31 = vpop.f32.mrf.mxu1  ;;  %v1251_v3 = vpop.f32.mrf.mxu0 }
 0x88a   :  { %v1252_v7 = vadd.f32 %v1251_v3, %v1160_v29  ;;  %v364_v56 = vpop.permute.xlu1 %363 }
 0x88b   :  { %v369_v57 = vmul.f32 %v1618_v26, %v364_v56  ;;  %v1538_v12 = vpop.f32.mrf.mxu1  ;;  %v1543_v45 = vpop.f32.mrf.mxu0 }
 0x88c   :  { %v1258_v21 = vmul.f32 %v1620_v10, %v1252_v7 }
 0x88d   :  { %v1254_v43 = vpop.f32.mrf.mxu0  ;;  %v414_v27 = vadd.f32 %v1913_v0, %v369_v57 }
 0x88e   :  { %v1281_v61 = vrot.slane %v1258_v21, 7  ;;  %v1277_v19 = vpop.permute.xlu1 %1276 }
 0x88f   :  { %v1544_v17 = vpop.f32.mrf.mxu0 }
 0x890   :  { %v1282_v11 = vsel %vm1262_vm11, %v1281_v61, %v1257_v55 }
 0x891   :  { %1283 = vrot.lane.b32.xlu0 %v1282_v11, %s1640_s8 }
 0x892   :  { %v165_v25 = vpop.permute.xlu1 %164 }
 0x893   :  { %168 = vst.msk [vmem:[%s2180_s11] sm:$0x1] %vm167_vm12, %v165_v25 }
 0x895   :  { %169 = vrot.lane.b32.xlu0 %v1766_v49, %s1637_s24  ;;  %v1399_v49 = vld [vmem:[%s2182_s9] ss:$0 sm:$0xff] }
 0x896   :  { %v1626_v54 = vpop.eup %1625 }
 0x897   :  { %v465_v13 = vmul.f32 %v1626_v54, %v414_v27 }
 0x899   :  { %v1263_v62 = vsel %vm1262_vm11, %v1261_v30, %v465_v13 }
 0x89a   :  { %v1286_v16 = vsel %vm205_vm5, %v1263_v62, %v1270_v37 }
 0x89b   :  { %v1288_v38 = vsel %vm1287_vm13, %v1286_v16, %v1277_v19 }
 0x903   :  { %v1284_v40 = vpop.permute.xlu0 %1283 }
 0x904   :  { %v1290_v58 = vsel %vm1289_vm14, %v1288_v38, %v1284_v40 }
 0x905   :  { %v1291_v32 = vpack.c.bf16 %v1290_v58, %v1290_v58 }
 0x907   :  { %1550 = vmatmul.mubr.msk.bf16.vlgmr.msra.gmra.mxu1 %vm104_vm4, %v1291_v32  ;;  %v170_v0 = vpop.permute.xlu0 %169 }
 0x908   :  { %172 = vst.msk [vmem:[%s2181_s12] sm:$0x1] %vm167_vm12, %v170_v0 }
 0x9c7   :  { %v1352_v28 = vpop.f32.mrf.mxu1 }
 0x9c8   :  { %v1353_v44 = vadd.f32 %v1399_v49, %v1352_v28 }
 0x9c9   :  { %v1551_v53 = vpop.f32.mrf.mxu1 }
 0x9ca   :  { %v1358_v41 = vadd.f32 %v1353_v44, %v1709_v1 }
 0x9cb   :  { %v1355_v22 = vpop.f32.mrf.mxu1 }
 0x9cc   :  { %v1359_v59 = vpack.c.bf16 %v1358_v41, %v1358_v41 }
 0x9cd   :  { %v1552_v47 = vpop.f32.mrf.mxu1 }
 0x9ce   :  { %1360 = vst.msk [vmem:[%s2183_s10] sm:$0x1] %vm167_vm12, %v1359_v59 }

// kernel: closed_call.84
= control target key start
LH: loop header
LB: loop body
LE: loop exit
PB: predicated region body
PF: predicated region fallthrough
CT: control target
= control target key end

     0   :  { %vm55_vm0 = vcmask 254976   ;;  %v1672_v8 = vmov 0.0   ;;  %vm1673_vm1 = vmmov 0   ;;  %vm116_vm4 = vcmask 261120   ;;  %s1676_s17 = smov 120   ;;  %s1677_s18 = smov 88   ;;  %s2041_s0 = inlined_call_operand.vmem [shape: bf16[2,32], index: 0, kind: input, shape index: {}]   ;;  %s2042_s5 = inlined_call_operand.vmem [shape: bf16[32,32], index: 5, kind: input, shape index: {}]   ;;  %s2043_s3 = inlined_call_operand.vmem [shape: f32[1,32], index: 3, kind: input, shape index: {}]   ;;  %s2044_s4 = inlined_call_operand.vmem [shape: f32[1,32], index: 4, kind: input, shape index: {}]   ;;  %s2045_s1 = inlined_call_operand.vmem [shape: bf16[2,8,64], index: 1, kind: input, shape index: {}]   ;;  %s2046_s6 = inlined_call_operand.vmem [shape: f32[1,32], index: 6, kind: input, shape index: {}]   ;;  %s2047_s2 = inlined_call_operand.vmem [shape: f32[2,1,8], index: 2, kind: input, shape index: {}]   ;;  %s2048_s7 = inlined_call_operand.vmem [shape: bf16[32,32], index: 7, kind: input, shape index: {}]   ;;  %s2049_s8 = inlined_call_operand.vmem [shape: f32[1,32], index: 8, kind: input, shape index: {}]   ;;  %s2050_s11 = inlined_call_operand.vmem [shape: bf16[32,64], index: 11, kind: input, shape index: {}]   ;;  %s2051_s13 = inlined_call_operand.vmem [shape: bf16[64,32], index: 13, kind: input, shape index: {}]   ;;  %s2052_s9 = inlined_call_operand.vmem [shape: f32[1,32], index: 9, kind: input, shape index: {}]   ;;  %s2053_s10 = inlined_call_operand.vmem [shape: f32[1,32], index: 10, kind: input, shape index: {}]   ;;  %s2054_s12 = inlined_call_operand.vmem [shape: f32[1,64], index: 12, kind: input, shape index: {}]   ;;  %s2055_s14 = inlined_call_operand.vmem [shape: f32[1,32], index: 14, kind: input, shape index: {}]   ;;  %s2056_s15 = inlined_call_operand.vmem [shape: bf16[2,32], index: 15, kind: output, shape index: {}]  }
   0x1   :  { %v51_v0 = vld [vmem:[%s2041_s0] sm:$0x1]  ;;  %1475 = vmatprep.subr.bf16.mxu0 %v1672_v8  ;;  %v1620_v9 = vld [vmem:[%s2042_s5 + $0x8] sm:$0xff]   ;;  %1479 = vmatprep.mubr.msk.bf16.mxu0 %vm1673_vm1, %v1672_v8  ;;  %vm191_vm5 = vcmask 64512   ;;  %v1807_v28 = vld [vmem:[%s2045_s1 + $0x4] sm:$0xf]  ;;  %v168_v32 = vlaneseq }
   0x2   :  { %v1768_v1 = vunpack.c.l.bf16 %v51_v0  ;;  %1483 = vmatprep.subr.bf16.mxu1 %v1672_v8  ;;  %1485 = vmatprep.mubr.msk.bf16.mxu1 %vm1673_vm1, %v1672_v8  ;;  %v1621_v10 = vld [vmem:[%s2042_s5] sm:$0xff]   ;;  %v242_v29 = vsel %vm191_vm5, %v1807_v28, 0  ;;  %v1674_v30 = vmov 1966171168   ;;  %vm290_vm8 = vcmask 57344   ;;  %s1678_s19 = smov 112  }
   0x3   :  { %1476 = vmatpush3.bf16.msra.mxu0 %v1620_v9  ;;  %v1389_v19 = vld [vmem:[%s2043_s3] ss:$0 sm:$0xff]  ;;  %v166_v31 = vunpack.c.l.s4 %v1674_v30  ;;  %v169_v34 = vshrl.u32 %v168_v32, 7  ;;  %v1831_v48 = vld [vmem:[%s2047_s2 + $0x1] sm:$0x1]  ;;  %vm323_vm9 = vcmask 1043456  }
   0x4   :  { %v56_v2 = vsel %vm55_vm0, %v1768_v1, 0.0  ;;  %1477 = vmatprep.subr.bf16.mxu0 %v1672_v8  ;;  %v1390_v22 = vld [vmem:[%s2044_s4] ss:$0 sm:$0xff]  ;;  %vm287_vm6 = vcmp.gt.f32.partialorder %v1831_v48, 0.0  ;;  %vm1095_vm10 = vcmask 1041409   ;;  %s1679_s20 = smov 80  }
   0x5   :  { %57 = vadd.xlane.f32.xlu0 %v56_v2  ;;  %v1800_v26 = vld [vmem:[%s2045_s1] sm:$0xf]  ;;  %v167_v33 = vunpack.c.0.s8 %v166_v31  ;;  %s1680_s0 = smov 104   ;;  %s1681_s21 = smov 72   ;;  %vm1120_vm11 = vcmask 130048   ;;  %vm1122_vm12 = vcmask 195584  }
   0x6   :  { %v196_v27 = vsel %vm191_vm5, %v1800_v26, 0  ;;  %v1391_v35 = vld [vmem:[%s2046_s6] ss:$0 sm:$0xff]  ;;  %s1682_s22 = smov 8   ;;  %s1683_s23 = smov 16   ;;  %vm1337_vm15 = vcmask 523264  }
   0x7   :  { %1478 = vmatpush3.bf16.msra.mxu0 %v1621_v10  ;;  %1484 = vmatpush3.bf16.xpose.msra.mxu1 %v196_v27  ;;  %v170_v36 = vsub.s32 %v167_v33, %v169_v34  ;;  %v1836_v50 = vld [vmem:[%s2047_s2] sm:$0x1]  ;;  %s1675_s2 = smov 96   ;;  %s1684_s27 = smov 24  }
   0x8   :  { %1489 = vmatprep.subr.bf16.mxu0 %v1672_v8  ;;  %1495 = vmatprep.subr.bf16.mxu1 %v1672_v8  ;;  %vm286_vm7 = vcmp.gt.f32.partialorder %v1836_v50, 0.0 }
  0x8e   :  { %v58_v3 = vpop.xlane.xlu0 %57 }
  0x8f   :  { %v60_v4 = vmul.f32 0.03125, %v58_v3 }
  0x91   :  { %v61_v5 = vsub.f32 %v1768_v1, %v60_v4 }
  0x93   :  { %v62_v6 = vmul.f32 %v61_v5, %v61_v5  ;;  %v74_v20 = vmul.f32 %v1389_v19, %v61_v5 }
  0x95   :  { %v63_v7 = vsel %vm55_vm0, %v62_v6, 0.0 }
  0x96   :  { %64 = vadd.xlane.f32.xlu0 %v63_v7 }
 0x11f   :  { %v65_v11 = vpop.xlane.xlu0 %64 }
 0x120   :  { %v67_v12 = vmul.f32 0.032258064, %v65_v11 }
 0x122   :  { %1632 = vrsqrt.f32 %v67_v12  ;;  %vm77_vm2 = vcmp.eq.f32.partialorder %v67_v12, inf  ;;  %v80_v15 = vand.u32 2147483648, %v67_v12  ;;  %vm79_vm3 = vcmp.eq.f32.partialorder %v67_v12, 0.0 }
 0x12f   :  { %v1633_v13 = vpop.eup %1632 }
 0x130   :  { %v76_v14 = vmul.f32 %v1633_v13, %v67_v12  ;;  %v1854_v13 = vcombine.low %v1807_v28, %v1807_v28 }
 0x132   :  { %v78_v16 = vsel %vm77_vm2, %v67_v12, %v76_v14  ;;  %v1850_v12 = vcombine.low %v1800_v26, %v1800_v26 }
 0x133   :  { %v81_v17 = vsel %vm79_vm3, %v80_v15, %v78_v16 }
 0x134   :  { %v82_v18 = vadd.f32 1e-06, %v81_v17 }
 0x136   :  { %1634 = vrcp.f32 %v82_v18 }
 0x143   :  { %v1635_v21 = vpop.eup %1634 }
 0x144   :  { %v84_v23 = vmul.f32 %v1635_v21, %v74_v20 }
 0x146   :  { %v91_v24 = vadd.f32 %v1390_v22, %v84_v23 }
 0x148   :  { %v92_v25 = vpack.c.bf16 %v91_v24, %v91_v24 }
 0x14a   :  { %1480 = vmatmul.mubr.msk.bf16.vlgmr.msra.gmra.mxu0 %vm116_vm4, %v92_v25 }
 0x14b   :  { %1491 = vmatprep.mubr.msk.bf16.mxu0 %vm1673_vm1, %v1672_v8  ;;  %1490 = vmatpush3.bf16.xpose.msra.mxu0 %v242_v29 }
 0x14c   :  { %1501 = vmatprep.subr.bf16.mxu0 %v1672_v8 }
 0x20a   :  { %v154_v37 = vpop.f32.mrf.mxu0 }
 0x20b   :  { %v155_v38 = vadd.f32 %v1391_v35, %v154_v37 }
 0x20c   :  { %v1481_v39 = vpop.f32.mrf.mxu0 }
 0x20d   :  { %v171_v40 = vrot.slane %v155_v38, %v170_v36 }
 0x20e   :  { %v157_v41 = vpop.f32.mrf.mxu0 }
 0x20f   :  { %v172_v42 = vcombine.high %v171_v40, %v171_v40  ;;  %v179_v43 = vrot.slane %v171_v40, %v170_v36 }
 0x210   :  { %v1482_v44 = vpop.f32.mrf.mxu0 }
 0x211   :  { %v186_v45 = vrot.slane %v172_v42, %v170_v36  ;;  %v1816_v46 = vpack.c.bf16 %v179_v43, %v179_v43 }
 0x213   :  { %v1818_v47 = vpack.c.bf16 %v186_v45, %v186_v45  ;;  %1486 = vmatmul.mubr.msk.bf16.vlgmr.msra.gmra.mxu1 %vm191_vm5, %v1816_v46 }
 0x214   :  { %1497 = vmatprep.mubr.msk.bf16.mxu1 %vm1673_vm1, %v1672_v8 }
 0x215   :  { %1492 = vmatmul.mubr.msk.bf16.vlgmr.msra.gmra.mxu0 %vm191_vm5, %v1818_v47 }
 0x216   :  { %1503 = vmatprep.mubr.msk.bf16.mxu0 %vm1673_vm1, %v1672_v8 }
 0x2d3   :  { %v232_v49 = vpop.f32.mrf.mxu1 }
 0x2d4   :  { %v284_v53 = vmul.f32 0.35355338, %v232_v49 }
 0x2d5   :  { %v1487_v51 = vpop.f32.mrf.mxu1  ;;  %v278_v52 = vpop.f32.mrf.mxu0 }
 0x2d6   :  { %v285_v54 = vmul.f32 0.35355338, %v278_v52  ;;  %v288_v61 = vsel %vm286_vm7, %v284_v53, -1e+09 }
 0x2d7   :  { %v235_v55 = vpop.f32.mrf.mxu1  ;;  %v1493_v56 = vpop.f32.mrf.mxu0  ;;  %v291_v63 = vsel %vm290_vm8, %v288_v61, -inf }
 0x2d8   :  { %v289_v57 = vsel %vm287_vm6, %v285_v54, -1e+09 }
 0x2d9   :  { %v1488_v58 = vpop.f32.mrf.mxu1  ;;  %v281_v59 = vpop.f32.mrf.mxu0  ;;  %v294_v60 = vsel %vm290_vm8, %v289_v57, -inf }
 0x2da   :  { %295 = vmax.xlane.f32.xlu1 %v294_v60 }
 0x2db   :  { %v1494_v62 = vpop.f32.mrf.mxu0 }
 0x2de   :  { %292 = vmax.xlane.f32.xlu1 %v291_v63 }
 0x363   :  { %v296_v0 = vpop.xlane.xlu1 %295 }
 0x364   :  { %v298_v2 = vsub.f32 %v289_v57, %v296_v0 }
 0x366   :  { %v301_v3 = vmul.f32 1.442695, %v298_v2 }
 0x367   :  { %v293_v4 = vpop.xlane.xlu1 %292 }
 0x368   :  { %1636 = vpow2.f32 %v301_v3  ;;  %v297_v5 = vsub.f32 %v288_v61, %v293_v4 }
 0x36a   :  { %v299_v6 = vmul.f32 1.442695, %v297_v5 }
 0x36c   :  { %1638 = vpow2.f32 %v299_v6 }
 0x375   :  { %v1637_v7 = vpop.eup %1636 }
 0x376   :  { %v306_v9 = vsel %vm290_vm8, %v1637_v7, 0.0 }
 0x377   :  { %307 = vadd.xlane.f32.xlu0 %v306_v9 }
 0x379   :  { %v1639_v10 = vpop.eup %1638 }
 0x37a   :  { %v303_v11 = vsel %vm290_vm8, %v1639_v10, 0.0 }
 0x37b   :  { %304 = vadd.xlane.f32.xlu1 %v303_v11 }
 0x38c   :  { %318 = vrot.lane.b32.xlu1 %v1850_v12, %s1675_s2 }
 0x38d   :  { %370 = vrot.lane.b32.xlu0 %v1854_v13, %s1675_s2 }
 0x390   :  { %472 = vrot.lane.b32.xlu1 %v1854_v13, %s1676_s17 }
 0x391   :  { %470 = vrot.lane.b32.xlu0 %v1818_v47, %s1676_s17 }
 0x394   :  { %421 = vrot.lane.b32.xlu1 %v1850_v12, %s1676_s17 }
 0x398   :  { %419 = vrot.lane.b32.xlu1 %v1816_v46, %s1676_s17 }
 0x400   :  { %v308_v14 = vpop.xlane.xlu0 %307 }
 0x401   :  { %1640 = vrcp.f32 %v308_v14 }
 0x404   :  { %v371_v15 = vpop.permute.xlu0 %370  ;;  %v305_v16 = vpop.xlane.xlu1 %304 }
 0x405   :  { %v376_v17 = vsel %vm323_vm9, %v371_v15, 0  ;;  %1642 = vrcp.f32 %v305_v16 }
 0x406   :  { %1502 = vmatpush3.bf16.msra.mxu0 %v376_v17 }
 0x407   :  { %1513 = vmatprep.subr.bf16.mxu0 %v1672_v8 }
 0x408   :  { %v319_v18 = vpop.permute.xlu1 %318  ;;  %v471_v30 = vpop.permute.xlu0 %470 }
 0x409   :  { %v325_v19 = vsel %vm323_vm9, %v319_v18, 0 }
 0x40a   :  { %1496 = vmatpush3.bf16.msra.mxu1 %v325_v19 }
 0x40b   :  { %1507 = vmatprep.subr.bf16.mxu1 %v1672_v8 }
 0x40c   :  { %v473_v21 = vpop.permute.xlu1 %472 }
 0x40d   :  { %v478_v23 = vsel %vm191_vm5, %v473_v21, 0 }
 0x40e   :  { %v1641_v20 = vpop.eup %1640 }
 0x40f   :  { %v312_v22 = vmul.f32 %v1641_v20, %v1637_v7 }
 0x410   :  { %v422_v27 = vpop.permute.xlu1 %421 }
 0x411   :  { %v314_v24 = vpack.c.bf16 %v312_v22, %v312_v22  ;;  %v427_v28 = vsel %vm191_vm5, %v422_v27, 0 }
 0x412   :  { %v1643_v25 = vpop.eup %1642 }
 0x413   :  { %1504 = vmatmul.mubr.msk.bf16.vlgmr.msra.gmra.mxu0 %vm191_vm5, %v314_v24  ;;  %v311_v26 = vmul.f32 %v1643_v25, %v1639_v10 }
 0x414   :  { %1514 = vmatpush3.bf16.xpose.msra.mxu0 %v478_v23  ;;  %1515 = vmatprep.mubr.msk.bf16.mxu0 %vm1673_vm1, %v1672_v8  ;;  %v420_v31 = vpop.permute.xlu1 %419 }
 0x415   :  { %v313_v29 = vpack.c.bf16 %v311_v26, %v311_v26  ;;  %1525 = vmatprep.subr.bf16.mxu0 %v1672_v8 }
 0x417   :  { %1498 = vmatmul.mubr.msk.bf16.vlgmr.msra.gmra.mxu1 %vm191_vm5, %v313_v29 }
 0x418   :  { %1508 = vmatpush3.bf16.xpose.msra.mxu1 %v427_v28  ;;  %1509 = vmatprep.mubr.msk.bf16.mxu1 %vm1673_vm1, %v1672_v8 }
 0x419   :  { %1519 = vmatprep.subr.bf16.mxu1 %v1672_v8 }
 0x41b   :  { %1516 = vmatmul.mubr.msk.bf16.vlgmr.msra.gmra.mxu0 %vm191_vm5, %v471_v30 }
 0x41c   :  { %1527 = vmatprep.mubr.msk.bf16.mxu0 %vm1673_vm1, %v1672_v8 }
 0x41f   :  { %1510 = vmatmul.mubr.msk.bf16.vlgmr.msra.gmra.mxu1 %vm191_vm5, %v420_v31 }
 0x420   :  { %1521 = vmatprep.mubr.msk.bf16.mxu1 %vm1673_vm1, %v1672_v8 }
 0x4d3   :  { %v412_v32 = vpop.f32.mrf.mxu0 }
 0x4d4   :  { %v1094_v34 = vrot.slane %v412_v32, 7 }
 0x4d5   :  { %v1505_v33 = vpop.f32.mrf.mxu0 }
 0x4d7   :  { %v361_v35 = vpop.f32.mrf.mxu1  ;;  %v415_v36 = vpop.f32.mrf.mxu0 }
 0x4d8   :  { %v1883_v37 = vsel %vm1095_vm10, %v1094_v34, %v361_v35 }
 0x4d9   :  { %v1499_v38 = vpop.f32.mrf.mxu1  ;;  %v1506_v39 = vpop.f32.mrf.mxu0 }
 0x4db   :  { %v364_v40 = vpop.f32.mrf.mxu1  ;;  %v514_v41 = vpop.f32.mrf.mxu0 }
 0x4dc   :  { %v521_v42 = vmul.f32 0.35355338, %v514_v41 }
 0x4dd   :  { %v1500_v43 = vpop.f32.mrf.mxu1  ;;  %v1517_v44 = vpop.f32.mrf.mxu0 }
 0x4de   :  { %v523_v45 = vsel %vm287_vm6, %v521_v42, -1e+09 }
 0x4df   :  { %v463_v49 = vpop.f32.mrf.mxu1  ;;  %v517_v51 = vpop.f32.mrf.mxu0  ;;  %v527_v52 = vsel %vm290_vm8, %v523_v45, -inf }
 0x4e0   :  { %v520_v53 = vmul.f32 0.35355338, %v463_v49  ;;  %528 = vmax.xlane.f32.xlu0 %v527_v52 }
 0x4e1   :  { %v1511_v54 = vpop.f32.mrf.mxu1  ;;  %v1518_v55 = vpop.f32.mrf.mxu0 }
 0x4e2   :  { %v522_v56 = vsel %vm286_vm7, %v520_v53, -1e+09 }
 0x4e3   :  { %v466_v57 = vpop.f32.mrf.mxu1  ;;  %v524_v58 = vsel %vm290_vm8, %v522_v56, -inf }
 0x4e4   :  { %525 = vmax.xlane.f32.xlu1 %v524_v58 }
 0x4e5   :  { %v1512_v59 = vpop.f32.mrf.mxu1 }
 0x4f5   :  { %548 = vrot.lane.b32.xlu1 %v1850_v12, %s1677_s18 }
 0x4f9   :  { %696 = vrot.lane.b32.xlu1 %v1854_v13, %s1678_s19 }
 0x4fd   :  { %646 = vrot.lane.b32.xlu1 %v1850_v12, %s1678_s19 }
 0x501   :  { %644 = vrot.lane.b32.xlu1 %v1816_v46, %s1678_s19 }
 0x569   :  { %v529_v60 = vpop.xlane.xlu0 %528 }
 0x56a   :  { %v531_v61 = vsub.f32 %v523_v45, %v529_v60 }
 0x56c   :  { %v534_v0 = vmul.f32 1.442695, %v531_v61 }
 0x56d   :  { %v526_v62 = vpop.xlane.xlu1 %525 }
 0x56e   :  { %v530_v63 = vsub.f32 %v522_v56, %v526_v62 }
 0x570   :  { %v532_v2 = vmul.f32 1.442695, %v530_v63 }
 0x571   :  { %v549_v3 = vpop.permute.xlu1 %548 }
 0x572   :  { %1644 = vpow2.f32 %v532_v2  ;;  %v554_v4 = vsel %vm323_vm9, %v549_v3, 0 }
 0x573   :  { %1520 = vmatpush3.bf16.msra.mxu1 %v554_v4  ;;  %1646 = vpow2.f32 %v534_v0 }
 0x574   :  { %1531 = vmatprep.subr.bf16.mxu1 %v1672_v8 }
 0x575   :  { %v697_v16 = vpop.permute.xlu1 %696 }
 0x576   :  { %v702_v25 = vsel %vm191_vm5, %v697_v16, 0 }
 0x579   :  { %v647_v19 = vpop.permute.xlu1 %646 }
 0x57a   :  { %v652_v20 = vsel %vm191_vm5, %v647_v19, 0 }
 0x57d   :  { %v645_v26 = vpop.permute.xlu1 %644 }
 0x57f   :  { %v1645_v5 = vpop.eup %1644 }
 0x580   :  { %v536_v6 = vsel %vm290_vm8, %v1645_v5, 0.0  ;;  %v1647_v7 = vpop.eup %1646 }
 0x581   :  { %537 = vadd.xlane.f32.xlu0 %v536_v6  ;;  %v539_v9 = vsel %vm290_vm8, %v1647_v7, 0.0 }
 0x585   :  { %540 = vadd.xlane.f32.xlu0 %v539_v9 }
 0x59b   :  { %596 = vrot.lane.b32.xlu0 %v1854_v13, %s1677_s18 }
 0x59f   :  { %694 = vrot.lane.b32.xlu0 %v1818_v47, %s1678_s19 }
 0x60a   :  { %v538_v10 = vpop.xlane.xlu0 %537 }
 0x60b   :  { %1648 = vrcp.f32 %v538_v10 }
 0x60e   :  { %v541_v11 = vpop.xlane.xlu0 %540 }
 0x60f   :  { %1650 = vrcp.f32 %v541_v11 }
 0x612   :  { %v597_v14 = vpop.permute.xlu0 %596 }
 0x613   :  { %v602_v15 = vsel %vm323_vm9, %v597_v14, 0 }
 0x614   :  { %1526 = vmatpush3.bf16.msra.mxu0 %v602_v15 }
 0x615   :  { %1537 = vmatprep.subr.bf16.mxu0 %v1672_v8 }
 0x616   :  { %v695_v27 = vpop.permute.xlu0 %694 }
 0x618   :  { %v1649_v17 = vpop.eup %1648 }
 0x619   :  { %v544_v18 = vmul.f32 %v1649_v17, %v1645_v5 }
 0x61b   :  { %v546_v21 = vpack.c.bf16 %v544_v18, %v544_v18 }
 0x61c   :  { %v1651_v22 = vpop.eup %1650 }
 0x61d   :  { %1522 = vmatmul.mubr.msk.bf16.vlgmr.msra.gmra.mxu1 %vm191_vm5, %v546_v21  ;;  %v545_v23 = vmul.f32 %v1651_v22, %v1647_v7 }
 0x61e   :  { %1532 = vmatpush3.bf16.xpose.msra.mxu1 %v652_v20  ;;  %1533 = vmatprep.mubr.msk.bf16.mxu1 %vm1673_vm1, %v1672_v8 }
 0x61f   :  { %v547_v24 = vpack.c.bf16 %v545_v23, %v545_v23  ;;  %1543 = vmatprep.subr.bf16.mxu1 %v1672_v8 }
 0x621   :  { %1528 = vmatmul.mubr.msk.bf16.vlgmr.msra.gmra.mxu0 %vm191_vm5, %v547_v24 }
 0x622   :  { %1538 = vmatpush3.bf16.xpose.msra.mxu0 %v702_v25  ;;  %1539 = vmatprep.mubr.msk.bf16.mxu0 %vm1673_vm1, %v1672_v8 }
 0x623   :  { %1549 = vmatprep.subr.bf16.mxu0 %v1672_v8 }
 0x625   :  { %1534 = vmatmul.mubr.msk.bf16.vlgmr.msra.gmra.mxu1 %vm191_vm5, %v645_v26 }
 0x626   :  { %1545 = vmatprep.mubr.msk.bf16.mxu1 %vm1673_vm1, %v1672_v8 }
 0x629   :  { %1540 = vmatmul.mubr.msk.bf16.vlgmr.msra.gmra.mxu0 %vm191_vm5, %v695_v27 }
 0x62a   :  { %1551 = vmatprep.mubr.msk.bf16.mxu0 %vm1673_vm1, %v1672_v8 }
 0x6dd   :  { %v590_v28 = vpop.f32.mrf.mxu1 }
 0x6df   :  { %v1523_v29 = vpop.f32.mrf.mxu1 }
 0x6e1   :  { %v593_v30 = vpop.f32.mrf.mxu1  ;;  %v638_v31 = vpop.f32.mrf.mxu0 }
 0x6e2   :  { %v1100_v32 = vrot.slane %v638_v31, 7 }
 0x6e3   :  { %v1524_v33 = vpop.f32.mrf.mxu1  ;;  %v1529_v34 = vpop.f32.mrf.mxu0 }
 0x6e4   :  { %v1920_v35 = vsel %vm1095_vm10, %v1100_v32, %v590_v28 }
 0x6e5   :  { %v641_v36 = vpop.f32.mrf.mxu0  ;;  %v688_v38 = vpop.f32.mrf.mxu1 }
 0x6e6   :  { %v744_v39 = vmul.f32 0.35355338, %v688_v38 }
 0x6e7   :  { %v1530_v40 = vpop.f32.mrf.mxu0  ;;  %v1535_v41 = vpop.f32.mrf.mxu1 }
 0x6e8   :  { %v746_v42 = vsel %vm286_vm7, %v744_v39, -1e+09 }
 0x6e9   :  { %v691_v43 = vpop.f32.mrf.mxu1  ;;  %v738_v44 = vpop.f32.mrf.mxu0  ;;  %v748_v45 = vsel %vm290_vm8, %v746_v42, -inf }
 0x6ea   :  { %v745_v49 = vmul.f32 0.35355338, %v738_v44  ;;  %749 = vmax.xlane.f32.xlu1 %v748_v45 }
 0x6eb   :  { %v1536_v51 = vpop.f32.mrf.mxu1  ;;  %v1541_v52 = vpop.f32.mrf.mxu0 }
 0x6ec   :  { %v747_v53 = vsel %vm287_vm6, %v745_v49, -1e+09 }
 0x6ed   :  { %v741_v54 = vpop.f32.mrf.mxu0  ;;  %v751_v55 = vsel %vm290_vm8, %v747_v53, -inf }
 0x6ee   :  { %752 = vmax.xlane.f32.xlu0 %v751_v55 }
 0x6ef   :  { %v1542_v56 = vpop.f32.mrf.mxu0 }
 0x6fb   :  { %772 = vrot.lane.b32.xlu1 %v1850_v12, %s1679_s20 }
 0x6ff   :  { %920 = vrot.lane.b32.xlu1 %v1854_v13, %s1680_s0 }
 0x703   :  { %870 = vrot.lane.b32.xlu1 %v1850_v12, %s1680_s0 }
 0x707   :  { %868 = vrot.lane.b32.xlu1 %v1816_v46, %s1680_s0 }
 0x773   :  { %v750_v57 = vpop.xlane.xlu1 %749 }
 0x774   :  { %v754_v58 = vsub.f32 %v746_v42, %v750_v57 }
 0x776   :  { %v756_v59 = vmul.f32 1.442695, %v754_v58 }
 0x777   :  { %v773_v60 = vpop.permute.xlu1 %772  ;;  %v753_v61 = vpop.xlane.xlu0 %752 }
 0x778   :  { %1652 = vpow2.f32 %v756_v59  ;;  %v778_v62 = vsel %vm323_vm9, %v773_v60, 0  ;;  %v755_v63 = vsub.f32 %v747_v53, %v753_v61 }
 0x779   :  { %1544 = vmatpush3.bf16.msra.mxu1 %v778_v62 }
 0x77a   :  { %v758_v0 = vmul.f32 1.442695, %v755_v63  ;;  %1555 = vmatprep.subr.bf16.mxu1 %v1672_v8 }
 0x77b   :  { %v921_v10 = vpop.permute.xlu1 %920 }
 0x77c   :  { %1654 = vpow2.f32 %v758_v0  ;;  %v926_v20 = vsel %vm191_vm5, %v921_v10, 0 }
 0x77f   :  { %v871_v15 = vpop.permute.xlu1 %870 }
 0x780   :  { %v876_v16 = vsel %vm191_vm5, %v871_v15, 0 }
 0x783   :  { %v869_v21 = vpop.permute.xlu1 %868 }
 0x785   :  { %v1653_v2 = vpop.eup %1652 }
 0x786   :  { %v760_v3 = vsel %vm290_vm8, %v1653_v2, 0.0 }
 0x787   :  { %761 = vadd.xlane.f32.xlu0 %v760_v3 }
 0x789   :  { %v1655_v4 = vpop.eup %1654 }
 0x78a   :  { %v763_v46 = vsel %vm290_vm8, %v1655_v4, 0.0 }
 0x78b   :  { %764 = vadd.xlane.f32.xlu0 %v763_v46 }
 0x7a1   :  { %820 = vrot.lane.b32.xlu0 %v1854_v13, %s1679_s20 }
 0x7a5   :  { %918 = vrot.lane.b32.xlu0 %v1818_v47, %s1680_s0 }
 0x810   :  { %v762_v5 = vpop.xlane.xlu0 %761 }
 0x811   :  { %1656 = vrcp.f32 %v762_v5 }
 0x814   :  { %v765_v6 = vpop.xlane.xlu0 %764 }
 0x815   :  { %1658 = vrcp.f32 %v765_v6  ;;  %v1624_v6 = vld [vmem:[%s2048_s7 + $0x8] sm:$0xff]  }
 0x818   :  { %v821_v7 = vpop.permute.xlu0 %820 }
 0x819   :  { %v826_v9 = vsel %vm323_vm9, %v821_v7, 0  ;;  %v1625_v7 = vld [vmem:[%s2048_s7] sm:$0xff]  }
 0x81a   :  { %1550 = vmatpush3.bf16.msra.mxu0 %v826_v9 }
 0x81b   :  { %1561 = vmatprep.subr.bf16.mxu0 %v1672_v8 }
 0x81c   :  { %v919_v22 = vpop.permute.xlu0 %918 }
 0x81e   :  { %v1657_v11 = vpop.eup %1656 }
 0x81f   :  { %v768_v14 = vmul.f32 %v1657_v11, %v1653_v2 }
 0x821   :  { %v770_v17 = vpack.c.bf16 %v768_v14, %v768_v14 }
 0x822   :  { %v1659_v18 = vpop.eup %1658 }
 0x823   :  { %1546 = vmatmul.mubr.msk.bf16.vlgmr.msra.gmra.mxu1 %vm191_vm5, %v770_v17  ;;  %v769_v47 = vmul.f32 %v1659_v18, %v1655_v4 }
 0x824   :  { %1556 = vmatpush3.bf16.xpose.msra.mxu1 %v876_v16  ;;  %1557 = vmatprep.mubr.msk.bf16.mxu1 %vm1673_vm1, %v1672_v8 }
 0x825   :  { %v771_v19 = vpack.c.bf16 %v769_v47, %v769_v47  ;;  %1567 = vmatprep.subr.bf16.mxu1 %v1672_v8 }
 0x827   :  { %1552 = vmatmul.mubr.msk.bf16.vlgmr.msra.gmra.mxu0 %vm191_vm5, %v771_v19 }
 0x828   :  { %1562 = vmatpush3.bf16.xpose.msra.mxu0 %v926_v20  ;;  %1563 = vmatprep.mubr.msk.bf16.mxu0 %vm1673_vm1, %v1672_v8 }
 0x829   :  { %1573 = vmatprep.subr.bf16.mxu0 %v1672_v8 }
 0x82b   :  { %1558 = vmatmul.mubr.msk.bf16.vlgmr.msra.gmra.mxu1 %vm191_vm5, %v869_v21 }
 0x82c   :  { %1569 = vmatprep.mubr.msk.bf16.mxu1 %vm1673_vm1, %v1672_v8 }
 0x82f   :  { %1564 = vmatmul.mubr.msk.bf16.vlgmr.msra.gmra.mxu0 %vm191_vm5, %v919_v22 }
 0x830   :  { %1575 = vmatprep.mubr.msk.bf16.mxu0 %vm1673_vm1, %v1672_v8 }
 0x8e3   :  { %v814_v23 = vpop.f32.mrf.mxu1 }
 0x8e5   :  { %v1547_v24 = vpop.f32.mrf.mxu1 }
 0x8e7   :  { %v817_v25 = vpop.f32.mrf.mxu1  ;;  %v862_v26 = vpop.f32.mrf.mxu0 }
 0x8e8   :  { %v1107_v50 = vrot.slane %v862_v26, 7 }
 0x8e9   :  { %v1548_v27 = vpop.f32.mrf.mxu1  ;;  %v1553_v28 = vpop.f32.mrf.mxu0 }
 0x8ea   :  { %v1108_v51 = vsel %vm1095_vm10, %v1107_v50, %v814_v23  ;;  %v1416_v28 = vld [vmem:[%s2049_s8] ss:$0 sm:$0xff] }
 0x8eb   :  { %v865_v29 = vpop.f32.mrf.mxu0  ;;  %v912_v30 = vpop.f32.mrf.mxu1 }
 0x8ec   :  { %v968_v31 = vmul.f32 0.35355338, %v912_v30 }
 0x8ed   :  { %v1554_v32 = vpop.f32.mrf.mxu0  ;;  %v1559_v33 = vpop.f32.mrf.mxu1 }
 0x8ee   :  { %v970_v34 = vsel %vm286_vm7, %v968_v31, -1e+09 }
 0x8ef   :  { %v915_v36 = vpop.f32.mrf.mxu1  ;;  %v962_v38 = vpop.f32.mrf.mxu0  ;;  %v972_v39 = vsel %vm290_vm8, %v970_v34, -inf }
 0x8f0   :  { %v969_v40 = vmul.f32 0.35355338, %v962_v38  ;;  %973 = vmax.xlane.f32.xlu1 %v972_v39 }
 0x8f1   :  { %v1560_v41 = vpop.f32.mrf.mxu1  ;;  %v1565_v42 = vpop.f32.mrf.mxu0 }
 0x8f2   :  { %v971_v43 = vsel %vm287_vm6, %v969_v40, -1e+09  ;;  %v1627_v41 = vld [vmem:[%s2050_s11] sm:$0xff]   ;;  %v1628_v42 = vld [vmem:[%s2051_s13 + $0x18] sm:$0xff]  }
 0x8f3   :  { %v965_v44 = vpop.f32.mrf.mxu0  ;;  %v975_v45 = vsel %vm290_vm8, %v971_v43, -inf }
 0x8f4   :  { %976 = vmax.xlane.f32.xlu0 %v975_v45 }
 0x8f5   :  { %v1566_v49 = vpop.f32.mrf.mxu0 }
 0x901   :  { %996 = vrot.lane.b32.xlu1 %v1850_v12, %s1681_s21 }
 0x905   :  { %1102 = vrot.lane.b32.xlu1 %v1920_v35, %s1682_s22 }
 0x909   :  { %1109 = vrot.lane.b32.xlu1 %v1108_v51, %s1683_s23 }
 0x979   :  { %v974_v52 = vpop.xlane.xlu1 %973 }
 0x97a   :  { %v978_v53 = vsub.f32 %v970_v34, %v974_v52 }
 0x97c   :  { %v980_v48 = vmul.f32 1.442695, %v978_v53 }
 0x97d   :  { %v997_v54 = vpop.permute.xlu1 %996  ;;  %v977_v55 = vpop.xlane.xlu0 %976 }
 0x97e   :  { %1660 = vpow2.f32 %v980_v48  ;;  %v1002_v56 = vsel %vm323_vm9, %v997_v54, 0  ;;  %v979_v57 = vsub.f32 %v971_v43, %v977_v55  ;;  %v1629_v43 = vld [vmem:[%s2051_s13 + $0x10] sm:$0xff]   ;;  %v1417_v54 = vld [vmem:[%s2052_s9] ss:$0 sm:$0xff] }
 0x97f   :  { %1568 = vmatpush3.bf16.msra.mxu1 %v1002_v56 }
 0x980   :  { %v982_v58 = vmul.f32 1.442695, %v979_v57  ;;  %1579 = vmatprep.subr.bf16.mxu1 %v1672_v8  ;;  %v1418_v57 = vld [vmem:[%s2053_s10] ss:$0 sm:$0xff] }
 0x981   :  { %v1103_v20 = vpop.permute.xlu1 %1102 }
 0x982   :  { %1662 = vpow2.f32 %v982_v58  ;;  %v1119_v22 = vsel %vm191_vm5, %v1883_v37, %v1103_v20 }
 0x985   :  { %v1110_v21 = vpop.permute.xlu1 %1109 }
 0x986   :  { %v1121_v23 = vsel %vm1120_vm11, %v1119_v22, %v1110_v21 }
 0x98b   :  { %v1661_v12 = vpop.eup %1660 }
 0x98c   :  { %v984_v35 = vsel %vm290_vm8, %v1661_v12, 0.0 }
 0x98d   :  { %985 = vadd.xlane.f32.xlu0 %v984_v35 }
 0x98f   :  { %v1663_v59 = vpop.eup %1662 }
 0x990   :  { %v987_v60 = vsel %vm290_vm8, %v1663_v59, 0.0 }
 0x991   :  { %988 = vadd.xlane.f32.xlu0 %v987_v60  ;;  %v1631_v60 = vld [vmem:[%s2051_s13] sm:$0xff]  }
 0x9a7   :  { %1044 = vrot.lane.b32.xlu0 %v1854_v13, %s1681_s21 }
 0xa16   :  { %v986_v61 = vpop.xlane.xlu0 %985 }
 0xa17   :  { %1664 = vrcp.f32 %v986_v61  ;;  %v1419_v61 = vld [vmem:[%s2054_s12] ss:$0 sm:$0xff] }
 0xa1a   :  { %v989_v62 = vpop.xlane.xlu0 %988 }
 0xa1b   :  { %1666 = vrcp.f32 %v989_v62 }
 0xa1e   :  { %v1045_v63 = vpop.permute.xlu0 %1044 }
 0xa1f   :  { %v1050_v0 = vsel %vm323_vm9, %v1045_v63, 0 }
 0xa20   :  { %1574 = vmatpush3.bf16.msra.mxu0 %v1050_v0 }
 0xa21   :  { %1587 = vmatprep.subr.bf16.mxu0 %v1672_v8 }
 0xa24   :  { %v1665_v2 = vpop.eup %1664 }
 0xa25   :  { %v992_v3 = vmul.f32 %v1665_v2, %v1661_v12 }
 0xa27   :  { %v994_v4 = vpack.c.bf16 %v992_v3, %v992_v3 }
 0xa28   :  { %v1667_v46 = vpop.eup %1666 }
 0xa29   :  { %1570 = vmatmul.mubr.msk.bf16.vlgmr.msra.gmra.mxu1 %vm191_vm5, %v994_v4  ;;  %v993_v5 = vmul.f32 %v1667_v46, %v1663_v59  ;;  %v1630_v59 = vld [vmem:[%s2051_s13 + $0x8] sm:$0xff]  }
 0xa2a   :  { %1583 = vmatprep.mubr.msk.bf16.mxu1 %vm1673_vm1, %v1672_v8  ;;  %1580 = vmatpush3.bf16.msra.mxu1 %v1624_v6 }
 0xa2b   :  { %v995_v13 = vpack.c.bf16 %v993_v5, %v993_v5  ;;  %1581 = vmatprep.subr.bf16.mxu1 %v1672_v8 }
 0xa2d   :  { %1576 = vmatmul.mubr.msk.bf16.vlgmr.msra.gmra.mxu0 %vm191_vm5, %v995_v13 }
 0xa2e   :  { %1591 = vmatprep.mubr.msk.bf16.mxu0 %vm1673_vm1, %v1672_v8  ;;  %1582 = vmatpush3.bf16.msra.mxu1 %v1625_v7 }
 0xa2f   :  { %1595 = vmatprep.subr.bf16.mxu1 %v1672_v8 }
 0xae9   :  { %v1038_v9 = vpop.f32.mrf.mxu1 }
 0xaeb   :  { %v1571_v10 = vpop.f32.mrf.mxu1 }
 0xaed   :  { %v1041_v11 = vpop.f32.mrf.mxu1  ;;  %v1086_v14 = vpop.f32.mrf.mxu0 }
 0xaee   :  { %v1114_v15 = vrot.slane %v1086_v14, 7 }
 0xaef   :  { %v1572_v16 = vpop.f32.mrf.mxu1  ;;  %v1577_v17 = vpop.f32.mrf.mxu0 }
 0xaf0   :  { %v1115_v18 = vsel %vm1095_vm10, %v1114_v15, %v1038_v9 }
 0xaf1   :  { %1116 = vrot.lane.b32.xlu0 %v1115_v18, %s1684_s27  ;;  %v1089_v47 = vpop.f32.mrf.mxu0 }
 0xaf3   :  { %v1578_v19 = vpop.f32.mrf.mxu0 }
 0xb63   :  { %v1117_v24 = vpop.permute.xlu0 %1116 }
 0xb64   :  { %v1123_v25 = vsel %vm1122_vm12, %v1121_v23, %v1117_v24 }
 0xb65   :  { %v1124_v26 = vpack.c.bf16 %v1123_v25, %v1123_v25 }
 0xb67   :  { %1584 = vmatmul.mubr.msk.bf16.vlgmr.msra.gmra.mxu1 %vm116_vm4, %v1124_v26 }
 0xb68   :  { %1603 = vmatprep.mubr.msk.bf16.mxu1 %vm1673_vm1, %v1672_v8  ;;  %1596 = vmatpush3.bf16.msra.mxu1 %v1628_v42 }
 0xb69   :  { %1597 = vmatprep.subr.bf16.mxu1 %v1672_v8 }
 0xb6c   :  { %1598 = vmatpush3.bf16.msra.mxu1 %v1629_v43 }
 0xb6d   :  { %1599 = vmatprep.subr.bf16.mxu1 %v1672_v8 }
 0xb70   :  { %1600 = vmatpush3.bf16.msra.mxu1 %v1630_v59 }
 0xb71   :  { %1601 = vmatprep.subr.bf16.mxu1 %v1672_v8 }
 0xb74   :  { %1602 = vmatpush3.bf16.msra.mxu1 %v1631_v60 }
 0xc27   :  { %v1178_v27 = vpop.f32.mrf.mxu1 }
 0xc28   :  { %v1184_v29 = vadd.f32 %v1178_v27, %v1768_v1  ;;  %v1626_v1 = vld [vmem:[%s2050_s11 + $0x8] sm:$0xff]  }
 0xc29   :  { %v1585_v30 = vpop.f32.mrf.mxu1  ;;  %1588 = vmatpush3.bf16.msra.mxu0 %v1626_v1 }
 0xc2a   :  { %v1996_v31 = vadd.f32 %v1416_v28, %v1184_v29  ;;  %1589 = vmatprep.subr.bf16.mxu0 %v1672_v8  ;;  %v1423_v8 = vld [vmem:[%s2055_s14] ss:$0 sm:$0xff] }
 0xc2b   :  { %v1181_v37 = vpop.f32.mrf.mxu1 }
 0xc2c   :  { %v1195_v32 = vsel %vm55_vm0, %v1996_v31, 0.0 }
 0xc2d   :  { %1196 = vadd.xlane.f32.xlu1 %v1195_v32  ;;  %v1586_v33 = vpop.f32.mrf.mxu1  ;;  %1590 = vmatpush3.bf16.msra.mxu0 %v1627_v41 }
 0xcb6   :  { %v1197_v34 = vpop.xlane.xlu1 %1196 }
 0xcb7   :  { %v1198_v36 = vmul.f32 0.03125, %v1197_v34 }
 0xcb9   :  { %v1199_v38 = vsub.f32 %v1996_v31, %v1198_v36 }
 0xcbb   :  { %v1200_v39 = vmul.f32 %v1199_v38, %v1199_v38  ;;  %v1211_v55 = vmul.f32 %v1417_v54, %v1199_v38 }
 0xcbd   :  { %v1201_v40 = vsel %vm55_vm0, %v1200_v39, 0.0  ;;  %vm1383_vm0 = vcmask 253952  }
 0xcbe   :  { %1202 = vadd.xlane.f32.xlu0 %v1201_v40 }
 0xd47   :  { %v1203_v44 = vpop.xlane.xlu0 %1202 }
 0xd48   :  { %v1204_v45 = vmul.f32 0.032258064, %v1203_v44 }
 0xd4a   :  { %1668 = vrsqrt.f32 %v1204_v45  ;;  %vm1214_vm13 = vcmp.eq.f32.partialorder %v1204_v45, inf  ;;  %v1217_v51 = vand.u32 2147483648, %v1204_v45  ;;  %vm1216_vm14 = vcmp.eq.f32.partialorder %v1204_v45, 0.0 }
 0xd57   :  { %v1669_v49 = vpop.eup %1668 }
 0xd58   :  { %v1213_v50 = vmul.f32 %v1669_v49, %v1204_v45 }
 0xd5a   :  { %v1215_v52 = vsel %vm1214_vm13, %v1204_v45, %v1213_v50 }
 0xd5b   :  { %v1218_v53 = vsel %vm1216_vm14, %v1217_v51, %v1215_v52 }
 0xd5c   :  { %v1219_v48 = vadd.f32 1e-06, %v1218_v53 }
 0xd5e   :  { %1670 = vrcp.f32 %v1219_v48 }
 0xd6b   :  { %v1671_v56 = vpop.eup %1670 }
 0xd6c   :  { %v1221_v58 = vmul.f32 %v1671_v56, %v1211_v55 }
 0xd6e   :  { %v1228_v12 = vadd.f32 %v1418_v57, %v1221_v58 }
 0xd70   :  { %v1229_v35 = vpack.c.bf16 %v1228_v12, %v1228_v12 }
 0xd72   :  { %1592 = vmatmul.mubr.msk.bf16.vlgmr.msra.gmra.mxu0 %vm116_vm4, %v1229_v35 }
 0xe32   :  { %v1290_v62 = vpop.f32.mrf.mxu0 }
 0xe33   :  { %v1291_v63 = vadd.f32 %v1419_v61, %v1290_v62 }
 0xe34   :  { %v1593_v0 = vpop.f32.mrf.mxu0 }
 0xe35   :  { %v1296_v2 = vmax.f32 %v1291_v63, 0.0 }
 0xe36   :  { %v1293_v3 = vpop.f32.mrf.mxu0 }
 0xe37   :  { %v1297_v4 = vpack.c.bf16 %v1296_v2, %v1296_v2 }
 0xe38   :  { %v1594_v46 = vpop.f32.mrf.mxu0 }
 0xe39   :  { %1604 = vmatmul.mubr.msk.bf16.vlgmr.msra.gmra.mxu1 %vm1337_vm15, %v1297_v4 }
 0xef9   :  { %v1375_v5 = vpop.f32.mrf.mxu1 }
 0xefa   :  { %v1376_v13 = vadd.f32 %v1423_v8, %v1375_v5 }
 0xefb   :  { %v1605_v6 = vpop.f32.mrf.mxu1 }
 0xefc   :  { %v1381_v7 = vadd.f32 %v1376_v13, %v1996_v31 }
 0xefd   :  { %v1378_v9 = vpop.f32.mrf.mxu1 }
 0xefe   :  { %v1382_v10 = vpack.c.bf16 %v1381_v7, %v1381_v7 }
 0xeff   :  { %v1606_v11 = vpop.f32.mrf.mxu1 }
 0xf00   :  { %1384 = vst.msk [vmem:[%s2056_s15] sm:$0x1] %vm1383_vm0, %v1382_v10 }

</bundles_post_ra>
